<compile_context>
chip_gen: v7x
topology: tpu7x:2x2x1
jax: 0.10.0
libtpu: 0.0.40
codegen_flags: <defaults>
</compile_context>

<pallas_src>
import jax
import jax.numpy as jnp
from jax import lax
from jax.experimental import pallas as pl
from jax.experimental.pallas import tpu as pltpu


# ------------------------------ kernel ---------------------------------------
def wide_conv_kernel(s1_ref, s2_ref, k1_ref, k2_ref, w_ref, kw_ref, kb_ref,
                     o1_ref, o2_ref):
    s1 = s1_ref[...]                        # (Bt, L, E) raw sentences (conv ch 0)
    s2 = s2_ref[...]
    Bt, L, E = s1.shape

    # ---- match_score --------------------------------------------------------
    # keep-factor (mask.eq(0)) precomputed as f32 in the wrapper
    s1m = s1 * k1_ref[...]                  # (Bt, L, E)
    s2m = s2 * k2_ref[...]

    # Stack (s1,s2) and (s2,s1): first Bt slices give A, last Bt give A^T,
    # so the whole thing is computed with ONE batched cross-term matmul and no
    # transposes.
    s_a = jnp.concatenate([s1m, s2m], axis=0)            # (2Bt, L, E)
    s_b = jnp.concatenate([s2m, s1m], axis=0)            # (2Bt, L, E)

    g = jnp.einsum('ble,bme->blm', s_a, s_b,
                   preferred_element_type=jnp.float32)   # (2Bt, L, L)  MXU
    n_a = jnp.sum(s_a * s_a, axis=-1, keepdims=True)     # (2Bt, L, 1)  lane reduce
    ones_row = jnp.ones((2 * Bt, 1, E), jnp.float32)
    n_b = jnp.einsum('bke,bme->bkm', ones_row, s_b * s_b,
                     preferred_element_type=jnp.float32)  # (2Bt, 1, L)  MXU (no XLU transpose)

    d2 = jnp.maximum(n_a + n_b - 2.0 * g, 0.0)            # (2Bt, L, L)
    a = jnp.sqrt(d2)
    A_cat = 1.0 / (1.0 + a)                               # exact, matches torch

    # ---- attention feature maps: one row-stacked MXU matmul ------------------
    attn = jnp.dot(A_cat.reshape(2 * Bt * L, L), w_ref[...],
                   preferred_element_type=jnp.float32)    # (2Bt*L, E)
    attn = attn.reshape(2 * Bt, L, E)
    attn1 = attn[:Bt]                                     # A   @ W
    attn2 = attn[Bt:]                                     # A^T @ W

    # ---- 2-channel 3x3 conv (padding=1) + tanh -------------------------------
    # Hoisted boundary masks (shared by both outputs).
    row = lax.broadcasted_iota(jnp.int32, (Bt, L, E), 1)
    col = lax.broadcasted_iota(jnp.int32, (Bt, L, E), 2)
    m_row_p = row < (L - 1)      # valid output rows for dy = +1
    m_row_m = row >= 1           # valid output rows for dy = -1
    m_col_p = col < (E - 1)      # valid output cols for dx = +1
    m_col_m = col >= 1           # valid output cols for dx = -1

    # Hoisted bias broadcast (built once, reused by both outputs).
    bias_tile = jnp.full((Bt, L, E), kb_ref[0], jnp.float32)

    def lane_variants(x):
        # (dx=-1, dx=0, dx=+1) views: y[..., j] = x[..., j+dx], 0 outside bounds.
        xm = jnp.where(m_col_m, pltpu.roll(x, shift=1, axis=2), 0.0)       # dx = -1
        xp = jnp.where(m_col_p, pltpu.roll(x, shift=E - 1, axis=2), 0.0)   # dx = +1
        return (xm, x, xp)

    def conv_tanh(v0, v1):
        # v0 / v1: lane-shift variants of channel 0 (sent) / channel 1 (attn).
        # For each kernel row dy: weighted sum of both channels' dx variants,
        # then a single sublane shift + row mask (linearity of the conv).
        acc = bias_tile
        for dy in (-1, 0, 1):
            base = (dy + 1) * 3          # flat index of conv_w[0, c, dy+1, dx+1]
            r = (kw_ref[base + 0] * v0[0] + kw_ref[base + 1] * v0[1]
                 + kw_ref[base + 2] * v0[2]
                 + kw_ref[9 + base + 0] * v1[0] + kw_ref[9 + base + 1] * v1[1]
                 + kw_ref[9 + base + 2] * v1[2])
            if dy == 0:
                acc = acc + r
            else:
                rs = pltpu.roll(r, shift=(-dy) % L, axis=1)
                acc = acc + jnp.where(m_row_p if dy == 1 else m_row_m, rs, 0.0)
        return jnp.tanh(acc)

    # channel order matches torch.cat([sent.unsqueeze(1), attn.unsqueeze(1)], 1)
    o1_ref[...] = conv_tanh(lane_variants(s1), lane_variants(attn1))
    o2_ref[...] = conv_tanh(lane_variants(s2), lane_variants(attn2))


# ------------------------------ wrapper ---------------------------------------
def wide_conv_pallas(sent1, sent2, mask1, mask2, W, conv_w, conv_b,
                     *, batch_tile=None):
    """sent*: (B, L, E); mask*: (B, L) int (0 == keep); W: (L, E);
    conv_w: (1, 2, 3, 3); conv_b: (1,).  Returns (o1, o2) each (B, L, E) f32."""
    B, L, E = sent1.shape

    if batch_tile is None:
        # >= 2 grid steps whenever B >= 2 (keeps both v7x TensorCores busy),
        # while a reasonably large tile amortizes per-step overhead on all gens.
        batch_tile = max(1, min(32, pl.cdiv(B, 2)))
    Bt = int(max(1, min(batch_tile, B)))
    steps = pl.cdiv(B, Bt)
    B_pad = steps * Bt

    s1 = sent1.astype(jnp.float32)
    s2 = sent2.astype(jnp.float32)
    keep1 = (mask1 == 0).astype(jnp.float32).reshape(B, L, 1)
    keep2 = (mask2 == 0).astype(jnp.float32).reshape(B, L, 1)
    if B_pad != B:
        pad = ((0, B_pad - B), (0, 0), (0, 0))
        s1 = jnp.pad(s1, pad)
        s2 = jnp.pad(s2, pad)
        keep1 = jnp.pad(keep1, pad)
        keep2 = jnp.pad(keep2, pad)

    kflat = conv_w.reshape(-1).astype(jnp.float32)        # (18,) SMEM scalars
    bias = conv_b.reshape(-1).astype(jnp.float32)         # (1,)

    seq_spec = pl.BlockSpec((Bt, L, E), lambda b: (b, 0, 0))
    keep_spec = pl.BlockSpec((Bt, L, 1), lambda b: (b, 0, 0))
    out_spec = pl.BlockSpec((Bt, L, E), lambda b: (b, 0, 0))
    smem_spec = pl.BlockSpec(memory_space=pltpu.MemorySpace.SMEM)

    o1, o2 = pl.pallas_call(
        wide_conv_kernel,
        out_shape=(jax.ShapeDtypeStruct((B_pad, L, E), jnp.float32),
                   jax.ShapeDtypeStruct((B_pad, L, E), jnp.float32)),
        grid=(steps,),
        in_specs=[seq_spec, seq_spec, keep_spec, keep_spec,
                  pl.BlockSpec((L, E), lambda b: (0, 0)),
                  smem_spec, smem_spec],
        out_specs=(out_spec, out_spec),
        compiler_params=pltpu.CompilerParams(
            dimension_semantics=("parallel",)),
    )(s1, s2, keep1, keep2, W.astype(jnp.float32), kflat, bias)

    if B_pad != B:
        o1, o2 = o1[:B], o2[:B]
    return o1, o2


def wide_conv_forward(params, sent1, sent2, mask1, mask2):
    return wide_conv_pallas(sent1, sent2, mask1, mask2,
                            params['W'], params['conv_w'], params['conv_b'])


# ------------------------------ pure-JAX reference ----------------------------
def wide_conv_reference(sent1, sent2, mask1, mask2, W, conv_w, conv_b):
    s1 = sent1 * (mask1 == 0)[..., None].astype(jnp.float32)
    s2 = sent2 * (mask2 == 0)[..., None].astype(jnp.float32)
    diff = s1[:, :, None, :] - s2[:, None, :, :]
    A = 1.0 / (1.0 + jnp.sqrt(jnp.sum(diff * diff, axis=-1)))
    attn1 = jnp.einsum('blm,me->ble', A, W, precision=lax.Precision.HIGHEST)
    attn2 = jnp.einsum('bml,me->ble', A, W, precision=lax.Precision.HIGHEST)

    def conv(x):                                     # x: (B, 2, L, E)
        Bx, _, Lx, Ex = x.shape
        xp = jnp.pad(x, ((0, 0), (0, 0), (1, 1), (1, 1)))
        out = jnp.zeros((Bx, Lx, Ex), jnp.float32) + conv_b[0]
        for c in range(2):
            for u in range(3):
                for v in range(3):
                    out = out + conv_w[0, c, u, v] * xp[:, c, u:u + Lx, v:v + Ex]
        return jnp.tanh(out)

    o1 = conv(jnp.stack([sent1, attn1], axis=1))
    o2 = conv(jnp.stack([sent2, attn2], axis=1))
    return o1, o2


# ------------------------------ main ------------------------------------------
if __name__ == "__main__":
    key = jax.random.PRNGKey(0)
    B, SEQ_LEN, EMBED = 8, 16, 128      # lane-dense embed dim, sublane-aligned seq

    ks = jax.random.split(key, 7)
    params = {
        # xavier-normal-ish init of the attention projection W (seq_len, embeds)
        'W': jax.random.normal(ks[0], (SEQ_LEN, EMBED), jnp.float32)
             * jnp.sqrt(2.0 / (SEQ_LEN + EMBED)),
        # Conv2d(in=2, out=1, k=3, padding=1) weight / bias
        'conv_w': jax.random.normal(ks[1], (1, 2, 3, 3), jnp.float32) * 0.1,
        'conv_b': jax.random.normal(ks[2], (1,), jnp.float32) * 0.1,
    }

    sent1 = jax.random.normal(ks[3], (B, SEQ_LEN, EMBED), jnp.float32)
    sent2 = jax.random.normal(ks[4], (B, SEQ_LEN, EMBED), jnp.float32)
    # mask value 0 == keep (matches mask.eq(0) in the module)
    mask1 = jax.random.randint(ks[5], (B, SEQ_LEN), 0, 2)
    mask2 = jax.random.randint(ks[6], (B, SEQ_LEN), 0, 2)

    o1, o2 = jax.jit(wide_conv_forward)(params, sent1, sent2, mask1, mask2)
    o1 = jax.block_until_ready(o1)
    o2 = jax.block_until_ready(o2)

    assert o1.shape == (B, SEQ_LEN, EMBED) and o1.dtype == jnp.float32
    assert o2.shape == (B, SEQ_LEN, EMBED) and o2.dtype == jnp.float32

    # correctness vs pure-JAX reference of the PyTorch forward
    r1, r2 = wide_conv_reference(sent1, sent2, mask1, mask2,
                                 params['W'], params['conv_w'], params['conv_b'])
    err = max(float(jnp.max(jnp.abs(o1 - r1))), float(jnp.max(jnp.abs(o2 - r2))))
    assert err < 5e-3, f"max abs diff vs reference: {err}"

    print("KERNEL_OK")
</pallas_src>

<mosaic_0001>
module attributes {stable_mosaic.version = 11 : i64} {
  func.func @wide_conv_kernel(%arg0: i32, %arg1: memref<4x16x128xf32, #tpu.memory_space<vmem>>, %arg2: memref<4x16x128xf32, #tpu.memory_space<vmem>>, %arg3: memref<4x16x1xf32, #tpu.memory_space<vmem>>, %arg4: memref<4x16x1xf32, #tpu.memory_space<vmem>>, %arg5: memref<16x128xf32, #tpu.memory_space<vmem>>, %arg6: memref<18xf32, #tpu.memory_space<smem>>, %arg7: memref<1xf32, #tpu.memory_space<smem>>, %arg8: memref<4x16x128xf32, #tpu.memory_space<vmem>>, %arg9: memref<4x16x128xf32, #tpu.memory_space<vmem>>) attributes {dimension_semantics = [#tpu.dimension_semantics<parallel>], iteration_bounds = array<i64: 2>, scalar_prefetch = 0 : i64, scratch_operands = 0 : i64, tpu.core_type = #tpu.core_type<tc>, window_params = [{transform_indices = @transform_0, window_bounds = array<i64: 4, 16, 128>}, {transform_indices = @transform_1, window_bounds = array<i64: 4, 16, 128>}, {transform_indices = @transform_2, window_bounds = array<i64: 4, 16, 1>}, {transform_indices = @transform_3, window_bounds = array<i64: 4, 16, 1>}, {pipeline_mode = #tpu.pipeline_mode<synchronous>, transform_indices = @transform_4, window_bounds = array<i64: 16, 128>}, {transform_indices = @transform_5, window_bounds = array<i64: 18>}, {transform_indices = @transform_6, window_bounds = array<i64: 1>}, {transform_indices = @transform_7, window_bounds = array<i64: 4, 16, 128>}, {transform_indices = @transform_8, window_bounds = array<i64: 4, 16, 128>}]} {
    %c0 = arith.constant 0 : index
    %c0_0 = arith.constant 0 : index
    %c0_1 = arith.constant 0 : index
    %0 = vector.load %arg1[%c0, %c0_0, %c0_1] : memref<4x16x128xf32, #tpu.memory_space<vmem>>, vector<4x16x128xf32>
    %c0_2 = arith.constant 0 : index
    %c0_3 = arith.constant 0 : index
    %c0_4 = arith.constant 0 : index
    %1 = vector.load %arg2[%c0_2, %c0_3, %c0_4] : memref<4x16x128xf32, #tpu.memory_space<vmem>>, vector<4x16x128xf32>
    %c0_5 = arith.constant 0 : index
    %c0_6 = arith.constant 0 : index
    %c0_7 = arith.constant 0 : index
    %2 = vector.load %arg3[%c0_5, %c0_6, %c0_7] : memref<4x16x1xf32, #tpu.memory_space<vmem>>, vector<4x16x1xf32>
    %3 = vector.broadcast %2 : vector<4x16x1xf32> to vector<4x16x128xf32>
    %4 = arith.mulf %0, %3 : vector<4x16x128xf32>
    %c0_8 = arith.constant 0 : index
    %c0_9 = arith.constant 0 : index
    %c0_10 = arith.constant 0 : index
    %5 = vector.load %arg4[%c0_8, %c0_9, %c0_10] : memref<4x16x1xf32, #tpu.memory_space<vmem>>, vector<4x16x1xf32>
    %6 = vector.broadcast %5 : vector<4x16x1xf32> to vector<4x16x128xf32>
    %7 = arith.mulf %1, %6 : vector<4x16x128xf32>
    %8 = tpu.concatenate %4, %7 in 0 : vector<4x16x128xf32>, vector<4x16x128xf32> -> vector<8x16x128xf32>
    %9 = tpu.concatenate %7, %4 in 0 : vector<4x16x128xf32>, vector<4x16x128xf32> -> vector<8x16x128xf32>
    "tpu.trace_start"() <{level = 10 : i32, message = "ble,bme->blm"}> : () -> ()
    %cst = arith.constant dense<0.000000e+00> : vector<8x16x16xf32>
    %10 = tpu.matmul %8, %9, %cst {dimension_numbers = #tpu.dot_dimension_numbers<[2], [2], [1], [1], [0, 0, 0, 1, 1, 1], [0], [0]>} : vector<8x16x128xf32>, vector<8x16x128xf32>, vector<8x16x16xf32> -> vector<8x16x16xf32>
    "tpu.trace_stop"() : () -> ()
    %11 = arith.mulf %8, %8 : vector<8x16x128xf32>
    %cst_11 = arith.constant dense<0.000000e+00> : vector<8x16xf32>
    %12 = vector.multi_reduction <add>, %11, %cst_11 [2] : vector<8x16x128xf32> to vector<8x16xf32>
    %13 = vector.shape_cast %12 : vector<8x16xf32> to vector<8x16x1xf32>
    %cst_12 = arith.constant 1.000000e+00 : f32
    %14 = vector.broadcast %cst_12 : f32 to vector<8x1x128xf32>
    %15 = arith.mulf %9, %9 : vector<8x16x128xf32>
    "tpu.trace_start"() <{level = 10 : i32, message = "bke,bme->bkm"}> : () -> ()
    %cst_13 = arith.constant dense<0.000000e+00> : vector<8x1x16xf32>
    %16 = tpu.matmul %14, %15, %cst_13 {dimension_numbers = #tpu.dot_dimension_numbers<[2], [2], [1], [1], [0, 0, 0, 1, 1, 1], [0], [0]>} : vector<8x1x128xf32>, vector<8x16x128xf32>, vector<8x1x16xf32> -> vector<8x1x16xf32>
    "tpu.trace_stop"() : () -> ()
    %17 = vector.broadcast %13 : vector<8x16x1xf32> to vector<8x16x16xf32>
    %18 = vector.broadcast %16 : vector<8x1x16xf32> to vector<8x16x16xf32>
    %19 = arith.addf %17, %18 : vector<8x16x16xf32>
    %cst_14 = arith.constant 2.000000e+00 : f32
    %20 = vector.broadcast %cst_14 : f32 to vector<8x16x16xf32>
    %21 = arith.mulf %20, %10 : vector<8x16x16xf32>
    %22 = arith.subf %19, %21 : vector<8x16x16xf32>
    %cst_15 = arith.constant 0.000000e+00 : f32
    %23 = vector.broadcast %cst_15 : f32 to vector<8x16x16xf32>
    %24 = arith.maximumf %22, %23 : vector<8x16x16xf32>
    %25 = math.sqrt %24 : vector<8x16x16xf32>
    %cst_16 = arith.constant 1.000000e+00 : f32
    %26 = vector.broadcast %cst_16 : f32 to vector<8x16x16xf32>
    %27 = arith.addf %26, %25 : vector<8x16x16xf32>
    %cst_17 = arith.constant 1.000000e+00 : f32
    %28 = vector.broadcast %cst_17 : f32 to vector<8x16x16xf32>
    %29 = arith.divf %28, %27 : vector<8x16x16xf32>
    %30 = vector.shape_cast %29 : vector<8x16x16xf32> to vector<128x16xf32>
    %c0_18 = arith.constant 0 : index
    %c0_19 = arith.constant 0 : index
    %31 = vector.load %arg5[%c0_18, %c0_19] : memref<16x128xf32, #tpu.memory_space<vmem>>, vector<16x128xf32>
    %cst_20 = arith.constant dense<0.000000e+00> : vector<128x128xf32>
    %32 = tpu.matmul %30, %31, %cst_20 {dimension_numbers = #tpu.dot_dimension_numbers<[1], [0], [0], [1], [0, 0, 1, 1], [], []>} : vector<128x16xf32>, vector<16x128xf32>, vector<128x128xf32> -> vector<128x128xf32>
    %33 = vector.shape_cast %32 : vector<128x128xf32> to vector<8x16x128xf32>
    %34 = vector.extract_strided_slice %33 {offsets = [0, 0, 0], sizes = [4, 16, 128], strides = [1, 1, 1]} : vector<8x16x128xf32> to vector<4x16x128xf32>
    %35 = vector.extract_strided_slice %33 {offsets = [4, 0, 0], sizes = [4, 16, 128], strides = [1, 1, 1]} : vector<8x16x128xf32> to vector<4x16x128xf32>
    %36 = tpu.iota {dimensions = array<i32: 1>} : vector<4x16x128xi32>
    %37 = tpu.iota {dimensions = array<i32: 2>} : vector<4x16x128xi32>
    %c15_i32 = arith.constant 15 : i32
    %38 = vector.broadcast %c15_i32 : i32 to vector<4x16x128xi32>
    %39 = arith.cmpi slt, %36, %38 : vector<4x16x128xi32>
    %c1_i32 = arith.constant 1 : i32
    %40 = vector.broadcast %c1_i32 : i32 to vector<4x16x128xi32>
    %41 = arith.cmpi sge, %36, %40 : vector<4x16x128xi32>
    %c127_i32 = arith.constant 127 : i32
    %42 = vector.broadcast %c127_i32 : i32 to vector<4x16x128xi32>
    %43 = arith.cmpi slt, %37, %42 : vector<4x16x128xi32>
    %c1_i32_21 = arith.constant 1 : i32
    %44 = vector.broadcast %c1_i32_21 : i32 to vector<4x16x128xi32>
    %45 = arith.cmpi sge, %37, %44 : vector<4x16x128xi32>
    %c0_22 = arith.constant 0 : index
    %46 = memref.load %arg7[%c0_22] : memref<1xf32, #tpu.memory_space<smem>>
    %47 = vector.broadcast %46 : f32 to vector<4x16x128xf32>
    %c1_i32_23 = arith.constant 1 : i32
    %48 = tpu.dynamic_rotate %0 by %c1_i32_23 dim 2 : vector<4x16x128xf32>, i32 -> vector<4x16x128xf32>
    %cst_24 = arith.constant 0.000000e+00 : f32
    %49 = vector.broadcast %cst_24 : f32 to vector<4x16x128xf32>
    %50 = arith.select %45, %48, %49 : vector<4x16x128xi1>, vector<4x16x128xf32>
    %c127_i32_25 = arith.constant 127 : i32
    %51 = tpu.dynamic_rotate %0 by %c127_i32_25 dim 2 : vector<4x16x128xf32>, i32 -> vector<4x16x128xf32>
    %cst_26 = arith.constant 0.000000e+00 : f32
    %52 = vector.broadcast %cst_26 : f32 to vector<4x16x128xf32>
    %53 = arith.select %43, %51, %52 : vector<4x16x128xi1>, vector<4x16x128xf32>
    %c1_i32_27 = arith.constant 1 : i32
    %54 = tpu.dynamic_rotate %34 by %c1_i32_27 dim 2 : vector<4x16x128xf32>, i32 -> vector<4x16x128xf32>
    %cst_28 = arith.constant 0.000000e+00 : f32
    %55 = vector.broadcast %cst_28 : f32 to vector<4x16x128xf32>
    %56 = arith.select %45, %54, %55 : vector<4x16x128xi1>, vector<4x16x128xf32>
    %c127_i32_29 = arith.constant 127 : i32
    %57 = tpu.dynamic_rotate %34 by %c127_i32_29 dim 2 : vector<4x16x128xf32>, i32 -> vector<4x16x128xf32>
    %cst_30 = arith.constant 0.000000e+00 : f32
    %58 = vector.broadcast %cst_30 : f32 to vector<4x16x128xf32>
    %59 = arith.select %43, %57, %58 : vector<4x16x128xi1>, vector<4x16x128xf32>
    %c0_31 = arith.constant 0 : index
    %60 = memref.load %arg6[%c0_31] : memref<18xf32, #tpu.memory_space<smem>>
    %61 = vector.broadcast %60 : f32 to vector<4x16x128xf32>
    %62 = arith.mulf %61, %50 : vector<4x16x128xf32>
    %c1 = arith.constant 1 : index
    %63 = memref.load %arg6[%c1] : memref<18xf32, #tpu.memory_space<smem>>
    %64 = vector.broadcast %63 : f32 to vector<4x16x128xf32>
    %65 = arith.mulf %64, %0 : vector<4x16x128xf32>
    %66 = arith.addf %62, %65 : vector<4x16x128xf32>
    %c2 = arith.constant 2 : index
    %67 = memref.load %arg6[%c2] : memref<18xf32, #tpu.memory_space<smem>>
    %68 = vector.broadcast %67 : f32 to vector<4x16x128xf32>
    %69 = arith.mulf %68, %53 : vector<4x16x128xf32>
    %70 = arith.addf %66, %69 : vector<4x16x128xf32>
    %c9 = arith.constant 9 : index
    %71 = memref.load %arg6[%c9] : memref<18xf32, #tpu.memory_space<smem>>
    %72 = vector.broadcast %71 : f32 to vector<4x16x128xf32>
    %73 = arith.mulf %72, %56 : vector<4x16x128xf32>
    %74 = arith.addf %70, %73 : vector<4x16x128xf32>
    %c10 = arith.constant 10 : index
    %75 = memref.load %arg6[%c10] : memref<18xf32, #tpu.memory_space<smem>>
    %76 = vector.broadcast %75 : f32 to vector<4x16x128xf32>
    %77 = arith.mulf %76, %34 : vector<4x16x128xf32>
    %78 = arith.addf %74, %77 : vector<4x16x128xf32>
    %c11 = arith.constant 11 : index
    %79 = memref.load %arg6[%c11] : memref<18xf32, #tpu.memory_space<smem>>
    %80 = vector.broadcast %79 : f32 to vector<4x16x128xf32>
    %81 = arith.mulf %80, %59 : vector<4x16x128xf32>
    %82 = arith.addf %78, %81 : vector<4x16x128xf32>
    %c1_i32_32 = arith.constant 1 : i32
    %83 = tpu.dynamic_rotate %82 by %c1_i32_32 dim 1 : vector<4x16x128xf32>, i32 -> vector<4x16x128xf32>
    %cst_33 = arith.constant 0.000000e+00 : f32
    %84 = vector.broadcast %cst_33 : f32 to vector<4x16x128xf32>
    %85 = arith.select %41, %83, %84 : vector<4x16x128xi1>, vector<4x16x128xf32>
    %86 = arith.addf %47, %85 : vector<4x16x128xf32>
    %c3 = arith.constant 3 : index
    %87 = memref.load %arg6[%c3] : memref<18xf32, #tpu.memory_space<smem>>
    %88 = vector.broadcast %87 : f32 to vector<4x16x128xf32>
    %89 = arith.mulf %88, %50 : vector<4x16x128xf32>
    %c4 = arith.constant 4 : index
    %90 = memref.load %arg6[%c4] : memref<18xf32, #tpu.memory_space<smem>>
    %91 = vector.broadcast %90 : f32 to vector<4x16x128xf32>
    %92 = arith.mulf %91, %0 : vector<4x16x128xf32>
    %93 = arith.addf %89, %92 : vector<4x16x128xf32>
    %c5 = arith.constant 5 : index
    %94 = memref.load %arg6[%c5] : memref<18xf32, #tpu.memory_space<smem>>
    %95 = vector.broadcast %94 : f32 to vector<4x16x128xf32>
    %96 = arith.mulf %95, %53 : vector<4x16x128xf32>
    %97 = arith.addf %93, %96 : vector<4x16x128xf32>
    %c12 = arith.constant 12 : index
    %98 = memref.load %arg6[%c12] : memref<18xf32, #tpu.memory_space<smem>>
    %99 = vector.broadcast %98 : f32 to vector<4x16x128xf32>
    %100 = arith.mulf %99, %56 : vector<4x16x128xf32>
    %101 = arith.addf %97, %100 : vector<4x16x128xf32>
    %c13 = arith.constant 13 : index
    %102 = memref.load %arg6[%c13] : memref<18xf32, #tpu.memory_space<smem>>
    %103 = vector.broadcast %102 : f32 to vector<4x16x128xf32>
    %104 = arith.mulf %103, %34 : vector<4x16x128xf32>
    %105 = arith.addf %101, %104 : vector<4x16x128xf32>
    %c14 = arith.constant 14 : index
    %106 = memref.load %arg6[%c14] : memref<18xf32, #tpu.memory_space<smem>>
    %107 = vector.broadcast %106 : f32 to vector<4x16x128xf32>
    %108 = arith.mulf %107, %59 : vector<4x16x128xf32>
    %109 = arith.addf %105, %108 : vector<4x16x128xf32>
    %110 = arith.addf %86, %109 : vector<4x16x128xf32>
    %c6 = arith.constant 6 : index
    %111 = memref.load %arg6[%c6] : memref<18xf32, #tpu.memory_space<smem>>
    %112 = vector.broadcast %111 : f32 to vector<4x16x128xf32>
    %113 = arith.mulf %112, %50 : vector<4x16x128xf32>
    %c7 = arith.constant 7 : index
    %114 = memref.load %arg6[%c7] : memref<18xf32, #tpu.memory_space<smem>>
    %115 = vector.broadcast %114 : f32 to vector<4x16x128xf32>
    %116 = arith.mulf %115, %0 : vector<4x16x128xf32>
    %117 = arith.addf %113, %116 : vector<4x16x128xf32>
    %c8 = arith.constant 8 : index
    %118 = memref.load %arg6[%c8] : memref<18xf32, #tpu.memory_space<smem>>
    %119 = vector.broadcast %118 : f32 to vector<4x16x128xf32>
    %120 = arith.mulf %119, %53 : vector<4x16x128xf32>
    %121 = arith.addf %117, %120 : vector<4x16x128xf32>
    %c15 = arith.constant 15 : index
    %122 = memref.load %arg6[%c15] : memref<18xf32, #tpu.memory_space<smem>>
    %123 = vector.broadcast %122 : f32 to vector<4x16x128xf32>
    %124 = arith.mulf %123, %56 : vector<4x16x128xf32>
    %125 = arith.addf %121, %124 : vector<4x16x128xf32>
    %c16 = arith.constant 16 : index
    %126 = memref.load %arg6[%c16] : memref<18xf32, #tpu.memory_space<smem>>
    %127 = vector.broadcast %126 : f32 to vector<4x16x128xf32>
    %128 = arith.mulf %127, %34 : vector<4x16x128xf32>
    %129 = arith.addf %125, %128 : vector<4x16x128xf32>
    %c17 = arith.constant 17 : index
    %130 = memref.load %arg6[%c17] : memref<18xf32, #tpu.memory_space<smem>>
    %131 = vector.broadcast %130 : f32 to vector<4x16x128xf32>
    %132 = arith.mulf %131, %59 : vector<4x16x128xf32>
    %133 = arith.addf %129, %132 : vector<4x16x128xf32>
    %c15_i32_34 = arith.constant 15 : i32
    %134 = tpu.dynamic_rotate %133 by %c15_i32_34 dim 1 : vector<4x16x128xf32>, i32 -> vector<4x16x128xf32>
    %cst_35 = arith.constant 0.000000e+00 : f32
    %135 = vector.broadcast %cst_35 : f32 to vector<4x16x128xf32>
    %136 = arith.select %39, %134, %135 : vector<4x16x128xi1>, vector<4x16x128xf32>
    %137 = arith.addf %110, %136 : vector<4x16x128xf32>
    %138 = math.tanh %137 : vector<4x16x128xf32>
    %c0_36 = arith.constant 0 : index
    %c0_37 = arith.constant 0 : index
    %c0_38 = arith.constant 0 : index
    %139 = vector.load %arg8[%c0_36, %c0_37, %c0_38] : memref<4x16x128xf32, #tpu.memory_space<vmem>>, vector<4x16x128xf32>
    tpu.vector_store %arg8[%c0_36, %c0_37, %c0_38], %138 {strides = array<i32>} : memref<4x16x128xf32, #tpu.memory_space<vmem>>, vector<4x16x128xf32>,
    %c1_i32_39 = arith.constant 1 : i32
    %140 = tpu.dynamic_rotate %1 by %c1_i32_39 dim 2 : vector<4x16x128xf32>, i32 -> vector<4x16x128xf32>
    %cst_40 = arith.constant 0.000000e+00 : f32
    %141 = vector.broadcast %cst_40 : f32 to vector<4x16x128xf32>
    %142 = arith.select %45, %140, %141 : vector<4x16x128xi1>, vector<4x16x128xf32>
    %c127_i32_41 = arith.constant 127 : i32
    %143 = tpu.dynamic_rotate %1 by %c127_i32_41 dim 2 : vector<4x16x128xf32>, i32 -> vector<4x16x128xf32>
    %cst_42 = arith.constant 0.000000e+00 : f32
    %144 = vector.broadcast %cst_42 : f32 to vector<4x16x128xf32>
    %145 = arith.select %43, %143, %144 : vector<4x16x128xi1>, vector<4x16x128xf32>
    %c1_i32_43 = arith.constant 1 : i32
    %146 = tpu.dynamic_rotate %35 by %c1_i32_43 dim 2 : vector<4x16x128xf32>, i32 -> vector<4x16x128xf32>
    %cst_44 = arith.constant 0.000000e+00 : f32
    %147 = vector.broadcast %cst_44 : f32 to vector<4x16x128xf32>
    %148 = arith.select %45, %146, %147 : vector<4x16x128xi1>, vector<4x16x128xf32>
    %c127_i32_45 = arith.constant 127 : i32
    %149 = tpu.dynamic_rotate %35 by %c127_i32_45 dim 2 : vector<4x16x128xf32>, i32 -> vector<4x16x128xf32>
    %cst_46 = arith.constant 0.000000e+00 : f32
    %150 = vector.broadcast %cst_46 : f32 to vector<4x16x128xf32>
    %151 = arith.select %43, %149, %150 : vector<4x16x128xi1>, vector<4x16x128xf32>
    %c0_47 = arith.constant 0 : index
    %152 = memref.load %arg6[%c0_47] : memref<18xf32, #tpu.memory_space<smem>>
    %153 = vector.broadcast %152 : f32 to vector<4x16x128xf32>
    %154 = arith.mulf %153, %142 : vector<4x16x128xf32>
    %c1_48 = arith.constant 1 : index
    %155 = memref.load %arg6[%c1_48] : memref<18xf32, #tpu.memory_space<smem>>
    %156 = vector.broadcast %155 : f32 to vector<4x16x128xf32>
    %157 = arith.mulf %156, %1 : vector<4x16x128xf32>
    %158 = arith.addf %154, %157 : vector<4x16x128xf32>
    %c2_49 = arith.constant 2 : index
    %159 = memref.load %arg6[%c2_49] : memref<18xf32, #tpu.memory_space<smem>>
    %160 = vector.broadcast %159 : f32 to vector<4x16x128xf32>
    %161 = arith.mulf %160, %145 : vector<4x16x128xf32>
    %162 = arith.addf %158, %161 : vector<4x16x128xf32>
    %c9_50 = arith.constant 9 : index
    %163 = memref.load %arg6[%c9_50] : memref<18xf32, #tpu.memory_space<smem>>
    %164 = vector.broadcast %163 : f32 to vector<4x16x128xf32>
    %165 = arith.mulf %164, %148 : vector<4x16x128xf32>
    %166 = arith.addf %162, %165 : vector<4x16x128xf32>
    %c10_51 = arith.constant 10 : index
    %167 = memref.load %arg6[%c10_51] : memref<18xf32, #tpu.memory_space<smem>>
    %168 = vector.broadcast %167 : f32 to vector<4x16x128xf32>
    %169 = arith.mulf %168, %35 : vector<4x16x128xf32>
    %170 = arith.addf %166, %169 : vector<4x16x128xf32>
    %c11_52 = arith.constant 11 : index
    %171 = memref.load %arg6[%c11_52] : memref<18xf32, #tpu.memory_space<smem>>
    %172 = vector.broadcast %171 : f32 to vector<4x16x128xf32>
    %173 = arith.mulf %172, %151 : vector<4x16x128xf32>
    %174 = arith.addf %170, %173 : vector<4x16x128xf32>
    %c1_i32_53 = arith.constant 1 : i32
    %175 = tpu.dynamic_rotate %174 by %c1_i32_53 dim 1 : vector<4x16x128xf32>, i32 -> vector<4x16x128xf32>
    %cst_54 = arith.constant 0.000000e+00 : f32
    %176 = vector.broadcast %cst_54 : f32 to vector<4x16x128xf32>
    %177 = arith.select %41, %175, %176 : vector<4x16x128xi1>, vector<4x16x128xf32>
    %178 = arith.addf %47, %177 : vector<4x16x128xf32>
    %c3_55 = arith.constant 3 : index
    %179 = memref.load %arg6[%c3_55] : memref<18xf32, #tpu.memory_space<smem>>
    %180 = vector.broadcast %179 : f32 to vector<4x16x128xf32>
    %181 = arith.mulf %180, %142 : vector<4x16x128xf32>
    %c4_56 = arith.constant 4 : index
    %182 = memref.load %arg6[%c4_56] : memref<18xf32, #tpu.memory_space<smem>>
    %183 = vector.broadcast %182 : f32 to vector<4x16x128xf32>
    %184 = arith.mulf %183, %1 : vector<4x16x128xf32>
    %185 = arith.addf %181, %184 : vector<4x16x128xf32>
    %c5_57 = arith.constant 5 : index
    %186 = memref.load %arg6[%c5_57] : memref<18xf32, #tpu.memory_space<smem>>
    %187 = vector.broadcast %186 : f32 to vector<4x16x128xf32>
    %188 = arith.mulf %187, %145 : vector<4x16x128xf32>
    %189 = arith.addf %185, %188 : vector<4x16x128xf32>
    %c12_58 = arith.constant 12 : index
    %190 = memref.load %arg6[%c12_58] : memref<18xf32, #tpu.memory_space<smem>>
    %191 = vector.broadcast %190 : f32 to vector<4x16x128xf32>
    %192 = arith.mulf %191, %148 : vector<4x16x128xf32>
    %193 = arith.addf %189, %192 : vector<4x16x128xf32>
    %c13_59 = arith.constant 13 : index
    %194 = memref.load %arg6[%c13_59] : memref<18xf32, #tpu.memory_space<smem>>
    %195 = vector.broadcast %194 : f32 to vector<4x16x128xf32>
    %196 = arith.mulf %195, %35 : vector<4x16x128xf32>
    %197 = arith.addf %193, %196 : vector<4x16x128xf32>
    %c14_60 = arith.constant 14 : index
    %198 = memref.load %arg6[%c14_60] : memref<18xf32, #tpu.memory_space<smem>>
    %199 = vector.broadcast %198 : f32 to vector<4x16x128xf32>
    %200 = arith.mulf %199, %151 : vector<4x16x128xf32>
    %201 = arith.addf %197, %200 : vector<4x16x128xf32>
    %202 = arith.addf %178, %201 : vector<4x16x128xf32>
    %c6_61 = arith.constant 6 : index
    %203 = memref.load %arg6[%c6_61] : memref<18xf32, #tpu.memory_space<smem>>
    %204 = vector.broadcast %203 : f32 to vector<4x16x128xf32>
    %205 = arith.mulf %204, %142 : vector<4x16x128xf32>
    %c7_62 = arith.constant 7 : index
    %206 = memref.load %arg6[%c7_62] : memref<18xf32, #tpu.memory_space<smem>>
    %207 = vector.broadcast %206 : f32 to vector<4x16x128xf32>
    %208 = arith.mulf %207, %1 : vector<4x16x128xf32>
    %209 = arith.addf %205, %208 : vector<4x16x128xf32>
    %c8_63 = arith.constant 8 : index
    %210 = memref.load %arg6[%c8_63] : memref<18xf32, #tpu.memory_space<smem>>
    %211 = vector.broadcast %210 : f32 to vector<4x16x128xf32>
    %212 = arith.mulf %211, %145 : vector<4x16x128xf32>
    %213 = arith.addf %209, %212 : vector<4x16x128xf32>
    %c15_64 = arith.constant 15 : index
    %214 = memref.load %arg6[%c15_64] : memref<18xf32, #tpu.memory_space<smem>>
    %215 = vector.broadcast %214 : f32 to vector<4x16x128xf32>
    %216 = arith.mulf %215, %148 : vector<4x16x128xf32>
    %217 = arith.addf %213, %216 : vector<4x16x128xf32>
    %c16_65 = arith.constant 16 : index
    %218 = memref.load %arg6[%c16_65] : memref<18xf32, #tpu.memory_space<smem>>
    %219 = vector.broadcast %218 : f32 to vector<4x16x128xf32>
    %220 = arith.mulf %219, %35 : vector<4x16x128xf32>
    %221 = arith.addf %217, %220 : vector<4x16x128xf32>
    %c17_66 = arith.constant 17 : index
    %222 = memref.load %arg6[%c17_66] : memref<18xf32, #tpu.memory_space<smem>>
    %223 = vector.broadcast %222 : f32 to vector<4x16x128xf32>
    %224 = arith.mulf %223, %151 : vector<4x16x128xf32>
    %225 = arith.addf %221, %224 : vector<4x16x128xf32>
    %c15_i32_67 = arith.constant 15 : i32
    %226 = tpu.dynamic_rotate %225 by %c15_i32_67 dim 1 : vector<4x16x128xf32>, i32 -> vector<4x16x128xf32>
    %cst_68 = arith.constant 0.000000e+00 : f32
    %227 = vector.broadcast %cst_68 : f32 to vector<4x16x128xf32>
    %228 = arith.select %39, %226, %227 : vector<4x16x128xi1>, vector<4x16x128xf32>
    %229 = arith.addf %202, %228 : vector<4x16x128xf32>
    %230 = math.tanh %229 : vector<4x16x128xf32>
    %c0_69 = arith.constant 0 : index
    %c0_70 = arith.constant 0 : index
    %c0_71 = arith.constant 0 : index
    %231 = vector.load %arg9[%c0_69, %c0_70, %c0_71] : memref<4x16x128xf32, #tpu.memory_space<vmem>>, vector<4x16x128xf32>
    tpu.vector_store %arg9[%c0_69, %c0_70, %c0_71], %230 {strides = array<i32>} : memref<4x16x128xf32, #tpu.memory_space<vmem>>, vector<4x16x128xf32>,
    return
  }
  func.func @transform_0(%arg0: i32) -> (i32, i32, i32) {
    %c0_i32 = arith.constant 0 : i32
    %c0_i32_0 = arith.constant 0 : i32
    %c0_i32_1 = arith.constant 0 : i32
    return %arg0, %c0_i32, %c0_i32_0 : i32, i32, i32
  }
  func.func @transform_1(%arg0: i32) -> (i32, i32, i32) {
    %c0_i32 = arith.constant 0 : i32
    %c0_i32_0 = arith.constant 0 : i32
    %c0_i32_1 = arith.constant 0 : i32
    return %arg0, %c0_i32, %c0_i32_0 : i32, i32, i32
  }
  func.func @transform_2(%arg0: i32) -> (i32, i32, i32) {
    %c0_i32 = arith.constant 0 : i32
    %c0_i32_0 = arith.constant 0 : i32
    %c0_i32_1 = arith.constant 0 : i32
    return %arg0, %c0_i32, %c0_i32_0 : i32, i32, i32
  }
  func.func @transform_3(%arg0: i32) -> (i32, i32, i32) {
    %c0_i32 = arith.constant 0 : i32
    %c0_i32_0 = arith.constant 0 : i32
    %c0_i32_1 = arith.constant 0 : i32
    return %arg0, %c0_i32, %c0_i32_0 : i32, i32, i32
  }
  func.func @transform_4(%arg0: i32) -> (i32, i32) {
    %c0_i32 = arith.constant 0 : i32
    %c0_i32_0 = arith.constant 0 : i32
    %c0_i32_1 = arith.constant 0 : i32
    return %c0_i32, %c0_i32_0 : i32, i32
  }
  func.func @transform_5(%arg0: i32) -> i32 {
    %c0_i32 = arith.constant 0 : i32
    %c0_i32_0 = arith.constant 0 : i32
    return %c0_i32 : i32
  }
  func.func @transform_6(%arg0: i32) -> i32 {
    %c0_i32 = arith.constant 0 : i32
    %c0_i32_0 = arith.constant 0 : i32
    return %c0_i32 : i32
  }
  func.func @transform_7(%arg0: i32) -> (i32, i32, i32) {
    %c0_i32 = arith.constant 0 : i32
    %c0_i32_0 = arith.constant 0 : i32
    %c0_i32_1 = arith.constant 0 : i32
    return %arg0, %c0_i32, %c0_i32_0 : i32, i32, i32
  }
  func.func @transform_8(%arg0: i32) -> (i32, i32, i32) {
    %c0_i32 = arith.constant 0 : i32
    %c0_i32_0 = arith.constant 0 : i32
    %c0_i32_1 = arith.constant 0 : i32
    return %arg0, %c0_i32, %c0_i32_0 : i32, i32, i32
  }
}

</mosaic_0001>

<bundles_post_ra>
// kernel: wide_conv_forward.1
= control target key start
LH: loop header
LB: loop body
LE: loop exit
PB: predicated region body
PF: predicated region fallthrough
CT: control target
= control target key end

     0   :  { %s5820_s0 = inlined_call_operand.vmem [shape: f32[8,16,128], index: 0, kind: input, shape index: {}]   ;;  %s5821_s1 = inlined_call_operand.vmem [shape: f32[8,16,128], index: 1, kind: input, shape index: {}]   ;;  %s5822_s2 = inlined_call_operand.vmem [shape: f32[8,16,1], index: 2, kind: input, shape index: {}]   ;;  %s5823_s3 = inlined_call_operand.vmem [shape: f32[8,16,1], index: 3, kind: input, shape index: {}]   ;;  %s5824_s4 = inlined_call_operand.vmem [shape: f32[16,128], index: 4, kind: input, shape index: {}]   ;;  %s5825_s5 = inlined_call_operand.vmem [shape: f32[18], index: 5, kind: input, shape index: {}]   ;;  %s5826_s6 = inlined_call_operand.<no memory space> [shape: f32[1], index: 6, kind: input, shape index: {}]   ;;  %s5827_s7 = inlined_call_operand.hbm [shape: f32[8,16,128], index: 7, kind: output, shape index: {0}]   ;;  %s5828_s8 = inlined_call_operand.hbm [shape: f32[8,16,128], index: 8, kind: output, shape index: {1}]  }
   0x1   :  { %14 = sst [smem:[#allocation2]] %s5826_s6 }
   0x2   :  { %15 = vsyncpa [#allocation5], 0 }
   0x3   :  { %16 = vsyncpa [#allocation4], 0 }
   0x4   :  { %18 = vsyncpa [#allocation4 + $0x1], 0 }
   0x5   :  { %19 = vsyncpa [#allocation8], 0 }
   0x6   :  { %21 = vsyncpa [#allocation8 + $0x1], 0  ;;  %s4075_s29 = smov 0   ;;  %s4077_s30 = smov 0  }
   0x7   :  { %s4079_s9 = smov 0   ;;  %s4081_s10 = smov 0  }
   0x8 LB: > { %s4096_s6 = sadd.s32 4294967295, %s4013_s10   ;;  %s3362_s11 = sadd.s32 4294967294, %s4013_s10   ;;  %s4013_s10 = sphi %s4081_s10, %s5955_s10   ;;  %s4009_s9 = sphi %s4079_s9, %s5954_s9   ;;  %s4005_s30 = sphi %s4077_s30, %s5953_s30   ;;  %s4001_s29 = sphi %s4075_s29, %s5952_s29  }
   0x9   : > { %s4100_s12 = sadd.s32 1, %s4013_s10   ;;  %s201_s13 = sadd.s32 1, %s4009_s9 }
   0xa   : > { %s198_s14 = ssub.s32 %s4013_s10, %s4100_s12  ;;  %p211_p0 = scmp.ne.s32.totalorder %s4009_s9, %s4005_s30 }
   0xb   : > { %p199_p1 = scmp.eq.s32.totalorder %s198_s14, 0  ;;  %p212_p2 = scmp.eq.s32.totalorder %s4096_s6, 1 }
   0xc   : > { %p217_p3 = scmp.ne.s32.totalorder %s4005_s30, %s4001_s29  ;;  %p218_p4 = scmp.eq.s32.totalorder %s3362_s11, 1 }
   0xd   : > { %s4111_s15 = scalar_select %p199_p1, %s4009_s9, %s201_s13  }
   0xe   : > { %p4113_p5 = por %p212_p2, %p211_p0  ;;  %p4117_p6 = por %p218_p4, %p217_p3 }
   0xf   : > { %p3363_p7 = scmp.ge.s32.totalorder %s4013_s10, 1  ;;  %p251_p8 = scmp.lt.s32.totalorder %s4013_s10, 3 }
  0x10   : > { %p3745_p9 = scmp.eq.s32.totalorder %s4096_s6, 0  ;;  %s267_s21 = sshll.u32 %s5825_s5, 4  ;;  %s268_s21 = int_to_ptr.vmem [resolvable:$true] %s267_s21 }
  0x11   : > { %p4124_p10 = pnand %p3363_p7, %p251_p8  ;;  %s3900_s22 = scalar_lea.vmem %s268_s21, 16 }
  0x12   : > { %p3901_p13 = scmp.ne.s32.totalorder %s268_s21, %s3900_s22  ;;  %p3908_p3 = scmp.lt.s32.totalorder %s268_s21, %s268_s21 }
  0x13   : > { %p3734_p11 = pneg %p4124_p10  ;;  %p3909_p4 = scmp.lt.s32.totalorder %s3900_s22, %s3900_s22 }
  0x15   : > { %p3735_p12 = pnand %p3745_p9, %p3734_p11  ;;  %p3910_p7 = por %p3909_p4, %p3908_p3 }
  0x17   : > { %p3902_p0 = pneg %p3735_p12 }
  0x19   : > { %p3903_p1 = pnand %p3902_p0, %p3901_p13 }
  0x1b   : > { %p3904_p2 = pneg %p3903_p1 }
  0x1d   : > { %p3911_p8 = pnand %p3910_p7, %p3904_p2 }
  0x1f   : > { %3914 = shalt.err (!%p3911_p8)
}
  0x20   : > { %s4015_s23 = smov [#allocation3]   ;;  %323 = sbr.rel (%p4124_p10) target bundleno = 953 (0x3b9), region = 48 }
  0x21   : > { %3737 = dma.vmem_to_smem (!%p3735_p12), %s268_s21, 16, %s4015_s23, [#allocation5]  }
  0x27   : > { %3988 = dma.done.wait (%p3745_p9), [#allocation5], 16  }
  0x28   : > { %3990 = vsyncadd (%p3745_p9), [#allocation5], 4294967280 }
  0x29   : > { %329 = sfence }
  0x2a   : > { %s3370_s24 = sshll.u32 %s4096_s6, 2  ;;  %v4016_v0 = vmov 0   ;;  %vm4018_vm0 = vmmov 0   ;;  %s4022_s11 = smov 127   ;;  %vm2006_vm8 = vcmask 130048  }
  0x2b   : > { %3791 = vset.pattern.permute.xlu1 %v4016_v0  ;;  %3790 = vset.pattern.permute.xlu0 %v4016_v0  ;;  %p383_p11 = scmp.lt.s32.totalorder %s3370_s24, 7  ;;  %s2309_s13 = sld [smem:[#allocation3]] }
  0x2c   : > { %s3403_s18 = sld [smem:[#allocation3 + $0x3]]  ;;  %s3404_s19 = sld [smem:[#allocation3 + $0x4]] }
  0x2d   : > { %s5957_s24 = smov (!%p383_p11, %s3370_s24), 7  ;;  %s3409_s21 = sld [smem:[#allocation3 + $0x6]] }
  0x2e   : > { %s4142_s25 = sshll.u32 %s5957_s24, 4  ;;  %s3410_s22 = sld [smem:[#allocation3 + $0x7]] }
  0x2f   : > { %s408_s28 = scalar_lea.vmem %s5823_s3, %s4142_s25  ;;  %s401_s14 = scalar_lea.vmem %s5822_s2, %s4142_s25 }
  0x30   : > { %v486_v1 = vld [vmem:[%s408_s28 + $0x10] sm:$0xff]  ;;  %v484_v2 = vld [vmem:[%s408_s28] sm:$0xff]  ;;  %v487_v3 = vld [vmem:[%s408_s28 + $0x18] sm:$0xff]  ;;  %s4156_s20 = scalar_lea.vmem %s5821_s1, %s4142_s25  ;;  %s4197_s23 = scalar_lea.vmem %s5820_s0, %s4142_s25 }
  0x31   : > { %504 = vperm.xlu1 %3791, %v486_v1   ;;  %494 = vperm.xlu0 %3790, %v484_v2   ;;  %v485_v4 = vld [vmem:[%s408_s28 + $0x8] sm:$0xff]  ;;  %v488_v6 = vld [vmem:[%s408_s28 + $0x20] sm:$0xff]  ;;  %v491_v9 = vld [vmem:[%s408_s28 + $0x38] sm:$0xff]  ;;  %s4664_s24 = sld [smem:[#allocation3 + $0x2]]  ;;  %s4669_s25 = sld [smem:[#allocation3 + $0x5]] }
  0x32   : > { %v489_v5 = vld [vmem:[%s408_s28 + $0x28] sm:$0xff]  ;;  %v428_v8 = vld [vmem:[%s401_s14] sm:$0xff]  ;;  %v490_v10 = vld [vmem:[%s408_s28 + $0x30] sm:$0xff]  ;;  %s4021_s28 = smov 1   ;;  %s4671_s26 = sld [smem:[#allocation3 + $0x8]] }
  0x33   : > { %v429_v7 = vld [vmem:[%s401_s14 + $0x8] sm:$0xff]  ;;  %v431_v11 = vld [vmem:[%s401_s14 + $0x18] sm:$0xff]  ;;  %v430_v12 = vld [vmem:[%s401_s14 + $0x10] sm:$0xff]  ;;  %s3407_s27 = sld [smem:[#allocation3 + $0xd]] }
  0x34   : > { %v433_v13 = vld [vmem:[%s401_s14 + $0x28] sm:$0xff]  ;;  %v432_v14 = vld [vmem:[%s401_s14 + $0x20] sm:$0xff]  ;;  %v435_v15 = vld [vmem:[%s401_s14 + $0x38] sm:$0xff] }
  0x35   : > { %509 = vperm.xlu1 %3791, %v487_v3   ;;  %499 = vperm.xlu0 %3790, %v485_v4   ;;  %v434_v16 = vld [vmem:[%s401_s14 + $0x30] sm:$0xff]  ;;  %v4159_v17 = vld [vmem:[%s4156_s20] sm:$0xff]  ;;  %v4168_v22 = vld [vmem:[%s4156_s20 + $0x18] sm:$0xff]  ;;  %s3398_s14 = sld [smem:[#allocation3 + $0x1]] }
  0x36   : > { %v4165_v21 = vld [vmem:[%s4156_s20 + $0x10] sm:$0xff]  ;;  %v4171_v23 = vld [vmem:[%s4156_s20 + $0x8] sm:$0xff]  ;;  %v4191_v31 = vld [vmem:[%s4156_s20 + $0x20] sm:$0xff] }
  0x37   : > { %v4188_v30 = vld [vmem:[%s4156_s20 + $0x28] sm:$0xff]  ;;  %v4213_v39 = vld [vmem:[%s4197_s23] sm:$0xff]  ;;  %v4220_v45 = vld [vmem:[%s4156_s20 + $0x38] sm:$0xff] }
  0x38   : > { %v4210_v38 = vld [vmem:[%s4197_s23 + $0x8] sm:$0xff]  ;;  %v4223_v46 = vld [vmem:[%s4156_s20 + $0x30] sm:$0xff]  ;;  %v4235_v53 = vld [vmem:[%s4197_s23 + $0x18] sm:$0xff] }
  0x39   : > { %519 = vperm.xlu1 %3791, %v489_v5   ;;  %514 = vperm.xlu0 %3790, %v488_v6   ;;  %v4238_v54 = vld [vmem:[%s4197_s23 + $0x10] sm:$0xff]  ;;  %v4248_v61 = vld [vmem:[%s4197_s23 + $0x28] sm:$0xff]  ;;  %v4251_v62 = vld [vmem:[%s4197_s23 + $0x20] sm:$0xff] }
  0x3a   : > { %v4261_v6 = vld [vmem:[%s4197_s23 + $0x38] sm:$0xff] }
  0x3d   : > { %443 = vperm.xlu1 %3791, %v429_v7   ;;  %438 = vperm.xlu0 %3790, %v428_v8   ;;  %v4264_v7 = vld [vmem:[%s4197_s23 + $0x30] sm:$0xff] }
  0x41   : > { %529 = vperm.xlu1 %3791, %v491_v9   ;;  %524 = vperm.xlu0 %3790, %v490_v10  }
  0x45   : > { %453 = vperm.xlu1 %3791, %v431_v11   ;;  %448 = vperm.xlu0 %3790, %v430_v12  }
  0x49   : > { %463 = vperm.xlu1 %3791, %v433_v13   ;;  %458 = vperm.xlu0 %3790, %v432_v14  }
  0x4d   : > { %473 = vperm.xlu1 %3791, %v435_v15   ;;  %468 = vperm.xlu0 %3790, %v434_v16  }
  0xb0   : > { %v505_v18 = vpop.permute.xlu1 %504  ;;  %v495_v19 = vpop.permute.xlu0 %494 }
  0xb1   : > { %v4162_v20 = vmul.f32 %v495_v19, %v4159_v17  ;;  %v4178_v27 = vmul.f32 %v505_v18, %v4165_v21 }
  0xb3   : > { %v4175_v24 = vmul.f32 %v4162_v20, %v4162_v20  ;;  %v1150_v12 = vmul.f32 %v4178_v27, %v4178_v27 }
  0xb4   : > { %v510_v25 = vpop.permute.xlu1 %509  ;;  %v500_v26 = vpop.permute.xlu0 %499 }
  0xb5   : > { %v4181_v28 = vmul.f32 %v510_v25, %v4168_v22  ;;  %v4184_v29 = vmul.f32 %v500_v26, %v4171_v23  ;;  %1172 = vadd.xlane.f32.xlu1 %v4175_v24  ;;  %v4017_v25 = vmov 0.0|0.0  }
  0xb7   : > { %v3664_v32 = vpack.c.bf16 %v4184_v29, %v4162_v20  ;;  %v3668_v33 = vpack.c.bf16 %v4181_v28, %v4178_v27  ;;  %v1149_v3 = vmul.f32 %v4184_v29, %v4184_v29  ;;  %v1151_v18 = vmul.f32 %v4181_v28, %v4181_v28 }
  0xb8   : > { %v520_v34 = vpop.permute.xlu1 %519  ;;  %v515_v35 = vpop.permute.xlu0 %514 }
  0xb9   : > { %v4204_v36 = vmul.f32 %v520_v34, %v4188_v30  ;;  %v4207_v37 = vmul.f32 %v515_v35, %v4191_v31  ;;  %3665 = vmatprep.subr.bf16.mxu0 %v3664_v32  ;;  %3669 = vmatprep.subr.bf16.mxu1 %v3668_v33  ;;  %v3700_v34 = vpack.c.bf16 %v1151_v18, %v1150_v12 }
  0xba   : > { %3667 = vmatpush3.bf16.xpose.msra.mxu0 %v3664_v32  ;;  %3671 = vmatpush3.bf16.xpose.msra.mxu1 %v3668_v33 }
  0xbb   : > { %v3672_v40 = vpack.c.bf16 %v4204_v36, %v4207_v37 }
  0xbc   : > { %v444_v41 = vpop.permute.xlu1 %443  ;;  %v439_v42 = vpop.permute.xlu0 %438 }
  0xbd   : > { %v477_v43 = vmul.f32 %v444_v41, %v4210_v38  ;;  %v476_v44 = vmul.f32 %v439_v42, %v4213_v39  ;;  %3673 = vmatprep.subr.bf16.mxu0 %v3672_v40 }
  0xbf   : > { %3528 = vmatprep.mubr.f32.mxu0 %v476_v44  ;;  %v4225_v47 = vmul.f32 %v476_v44, %v476_v44  ;;  %v3680_v52 = vpack.c.bf16 %v477_v43, %v476_v44  ;;  %v4242_v56 = vmul.f32 %v477_v43, %v477_v43  ;;  %v2004_v44 = vld [vmem:[%s5824_s4] sm:$0xff] }
  0xc0   : > { %v530_v48 = vpop.permute.xlu1 %529  ;;  %v525_v49 = vpop.permute.xlu0 %524 }
  0xc1   : > { %v4228_v50 = vmul.f32 %v530_v48, %v4220_v45  ;;  %v4231_v51 = vmul.f32 %v525_v49, %v4223_v46  ;;  %1156 = vadd.xlane.f32.xlu0 %v4225_v47  ;;  %3529 = vmatmul.mubr.f32.vlgmr.msra.gmra.mrb[0].mxu0 %v477_v43 }
  0xc2   : > { %3675 = vmatpush3.bf16.xpose.msra.mxu0 %v3672_v40  ;;  %v3709_v40 = vpack.c.bf16 %v4242_v56, %v4225_v47  ;;  %v2005_v47 = vld [vmem:[%s5824_s4 + $0x8] sm:$0xff] }
  0xc3   : > { %3681 = vmatprep.subr.bf16.mxu0 %v3680_v52  ;;  %v3676_v55 = vpack.c.bf16 %v4228_v50, %v4231_v51  ;;  %v1154_v33 = vmul.f32 %v4231_v51, %v4231_v51  ;;  %v3720_v48 = vpack.c.bf16 %v2005_v47, %v2004_v44 }
  0xc4   : > { %v454_v57 = vpop.permute.xlu1 %453  ;;  %v449_v58 = vpop.permute.xlu0 %448 }
  0xc5   : > { %v479_v59 = vmul.f32 %v454_v57, %v4235_v53  ;;  %v478_v60 = vmul.f32 %v449_v58, %v4238_v54  ;;  %3677 = vmatprep.subr.bf16.mxu1 %v3676_v55  ;;  %1158 = vadd.xlane.f32.xlu0 %v4242_v56 }
  0xc7   : > { %3535 = vmatprep.mubr.f32.mxu1 %v478_v60  ;;  %v4253_v63 = vmul.f32 %v478_v60, %v478_v60  ;;  %v3684_v0 = vpack.c.bf16 %v479_v59, %v478_v60  ;;  %v4266_v8 = vmul.f32 %v479_v59, %v479_v59 }
  0xc8   : > { %v464_v1 = vpop.permute.xlu1 %463  ;;  %v459_v2 = vpop.permute.xlu0 %458  ;;  %3536 = vmatmul.mubr.f32.vlgmr.msra.gmra.mrb[0].mxu1 %v479_v59 }
  0xc9   : > { %v481_v4 = vmul.f32 %v464_v1, %v4248_v61  ;;  %v480_v5 = vmul.f32 %v459_v2, %v4251_v62  ;;  %3679 = vmatpush3.bf16.xpose.msra.mxu1 %v3676_v55  ;;  %1160 = vadd.xlane.f32.xlu1 %v4253_v63  ;;  %v3712_v41 = vpack.c.bf16 %v4266_v8, %v4253_v63  ;;  %v1748_v63 = vlaneseq }
  0xca   : > { %3685 = vmatprep.subr.bf16.mxu1 %v3684_v0  ;;  %1174 = vadd.xlane.f32.xlu0 %v1149_v3 }
  0xcb   : > { %3542 = vmatprep.mubr.f32.mxu0 %v480_v5  ;;  %v3688_v9 = vpack.c.bf16 %v481_v4, %v480_v5  ;;  %v4274_v15 = vmul.f32 %v480_v5, %v480_v5  ;;  %v1145_v19 = vmul.f32 %v481_v4, %v481_v4 }
  0xcc   : > { %v474_v10 = vpop.permute.xlu1 %473  ;;  %v469_v11 = vpop.permute.xlu0 %468  ;;  %3543 = vmatmul.mubr.f32.vlgmr.msra.gmra.mrb[2].mxu0 %v481_v4 }
  0xcd   : > { %v483_v13 = vmul.f32 %v474_v10, %v4261_v6  ;;  %v482_v14 = vmul.f32 %v469_v11, %v4264_v7  ;;  %3683 = vmatpush3.bf16.xpose.msra.mxu0 %v3680_v52  ;;  %1162 = vadd.xlane.f32.xlu1 %v4266_v8  ;;  %v3715_v42 = vpack.c.bf16 %v1145_v19, %v4274_v15 }
  0xce   : > { %1176 = vadd.xlane.f32.xlu0 %v1150_v12  ;;  %3556 = vmatprep.mubr.f32.mxu0 %v4162_v20  ;;  %v1152_v20 = vmul.f32 %v4207_v37, %v4207_v37 }
  0xcf   : > { %3689 = vmatprep.subr.bf16.mxu0 %v3688_v9  ;;  %3549 = vmatprep.mubr.f32.mxu1 %v482_v14  ;;  %v3692_v16 = vpack.c.bf16 %v483_v13, %v482_v14  ;;  %v1146_v26 = vmul.f32 %v482_v14, %v482_v14  ;;  %v1147_v32 = vmul.f32 %v483_v13, %v483_v13 }
  0xd0   : > { %3550 = vmatmul.mubr.f32.vlgmr.msra.gmra.mrb[2].mxu1 %v483_v13 }
  0xd1   : > { %3687 = vmatpush3.bf16.xpose.msra.mxu1 %v3684_v0  ;;  %1164 = vadd.xlane.f32.xlu1 %v4274_v15  ;;  %v3718_v43 = vpack.c.bf16 %v1147_v32, %v1146_v26 }
  0xd2   : > { %3563 = vmatprep.mubr.f32.mxu1 %v4178_v27  ;;  %3693 = vmatprep.subr.bf16.mxu1 %v3692_v16  ;;  %v1153_v27 = vmul.f32 %v4204_v36, %v4204_v36 }
  0xd3   : > { %1178 = vadd.xlane.f32.xlu0 %v1151_v18 }
  0xd4   : > { %3557 = vmatmul.mubr.f32.vlgmr.msra.gmra.mrb[4].mxu0 %v4184_v29  ;;  %v3697_v29 = vpack.c.bf16 %v1149_v3, %v4175_v24  ;;  %v1155_v24 = vmul.f32 %v4228_v50, %v4228_v50  ;;  %v3703_v35 = vpack.c.bf16 %v1153_v27, %v1152_v20  ;;  %v4377_v3 = vshrl.u32 %v1748_v63, 7 }
  0xd5   : > { %3691 = vmatpush3.bf16.xpose.msra.mxu0 %v3688_v9  ;;  %3570 = vmatprep.mubr.f32.mxu0 %v4207_v37 }
  0xd6   : > { %1166 = vadd.xlane.f32.xlu1 %v1145_v19  ;;  %3696 = vmatprep.subr.bf16.mxu0 %v4017_v25  ;;  %v3706_v37 = vpack.c.bf16 %v1155_v24, %v1154_v33  ;;  %5834 = vst [vmem:[#allocation12_spill] sm:$0xff] %v4377_v3  ;;  %v4388_v9 = vsub.s32 0, %v4377_v3 }
  0xd7   : > { %1180 = vadd.xlane.f32.xlu0 %v1152_v20 }
  0xd8   : > { %3564 = vmatmul.mubr.f32.vlgmr.msra.gmra.mrb[4].mxu1 %v4181_v28  ;;  %v4019_v28 = vmov 0.0  }
  0xd9   : > { %3695 = vmatpush3.bf16.xpose.msra.mxu1 %v3692_v16  ;;  %3577 = vmatprep.mubr.f32.mxu1 %v4231_v51 }
  0xda   : > { %1168 = vadd.xlane.f32.xlu1 %v1146_v26  ;;  %3699 = vmatprep.subr.bf16.mxu1 %v4017_v25 }
  0xdb   : > { %1182 = vadd.xlane.f32.xlu0 %v1153_v27 }
  0xdc   : > { %3571 = vmatmul.mubr.f32.vlgmr.msra.gmra.mrb[6].mxu0 %v4204_v36  ;;  %v4020_v36 = vmov 1.0  }
  0xdd   : > { %3698 = vmatpush3.bf16.xpose.msra.mxu0 %v3697_v29  ;;  %3584 = vmatprep.mubr.msk.f32.mxu0 %vm4018_vm0, %v4019_v28 }
  0xde   : > { %1170 = vadd.xlane.f32.xlu1 %v1147_v32  ;;  %3702 = vmatprep.subr.bf16.mxu0 %v4017_v25 }
  0xdf   : > { %1184 = vadd.xlane.f32.xlu0 %v1154_v33 }
  0xe0   : > { %3578 = vmatmul.mubr.f32.vlgmr.msra.gmra.mrb[6].mxu1 %v4228_v50 }
  0xe1   : > { %3701 = vmatpush3.bf16.xpose.msra.mxu1 %v3700_v34  ;;  %3591 = vmatprep.mubr.msk.f32.mxu1 %vm4018_vm0, %v4019_v28 }
  0xe2   : > { %3705 = vmatprep.subr.bf16.mxu1 %v4017_v25 }
  0xe3   : > { %1186 = vadd.xlane.f32.xlu0 %v1155_v24 }
  0xe4   : > { %3585 = vmatmul.mubr.f32.vlgmr.msra.gmra.mrb[8].mxu0 %v4020_v36 }
  0xe5   : > { %3704 = vmatpush3.bf16.xpose.msra.mxu0 %v3703_v35  ;;  %3598 = vmatprep.mubr.msk.f32.mxu0 %vm4018_vm0, %v4019_v28 }
  0xe6   : > { %3708 = vmatprep.subr.bf16.mxu0 %v4017_v25 }
  0xe8   : > { %3592 = vmatmul.mubr.f32.vlgmr.msra.gmra.mrb[8].mxu1 %v4020_v36 }
  0xe9   : > { %3707 = vmatpush3.bf16.xpose.msra.mxu1 %v3706_v37  ;;  %3605 = vmatprep.mubr.msk.f32.mxu1 %vm4018_vm0, %v4019_v28 }
  0xea   : > { %3711 = vmatprep.subr.bf16.mxu1 %v4017_v25 }
  0xec   : > { %3599 = vmatmul.mubr.f32.vlgmr.msra.gmra.mrb[10].mxu0 %v4020_v36 }
  0xed   : > { %3710 = vmatpush3.bf16.xpose.msra.mxu0 %v3709_v40  ;;  %3612 = vmatprep.mubr.msk.f32.mxu0 %vm4018_vm0, %v4019_v28 }
  0xee   : > { %3714 = vmatprep.subr.bf16.mxu0 %v4017_v25 }
  0xef   : > { %2213 = vrot.lane.b32.xlu1 %v4213_v39, %s4021_s28 }
  0xf0   : > { %3606 = vmatmul.mubr.f32.vlgmr.msra.gmra.mrb[10].mxu1 %v4020_v36 }
  0xf1   : > { %3713 = vmatpush3.bf16.xpose.msra.mxu1 %v3712_v41  ;;  %3619 = vmatprep.mubr.msk.f32.mxu1 %vm4018_vm0, %v4019_v28 }
  0xf2   : > { %3717 = vmatprep.subr.bf16.mxu1 %v4017_v25 }
  0xf3   : > { %2217 = vrot.lane.b32.xlu1 %v4238_v54, %s4021_s28 }
  0xf4   : > { %3613 = vmatmul.mubr.f32.vlgmr.msra.gmra.mrb[12].mxu0 %v4020_v36 }
  0xf5   : > { %3716 = vmatpush3.bf16.xpose.msra.mxu0 %v3715_v42  ;;  %3626 = vmatprep.mubr.msk.f32.mxu0 %vm4018_vm0, %v4019_v28 }
  0xf6   : > { %3721 = vmatprep.subr.bf16.mxu0 %v3720_v48 }
  0xf7   : > { %2219 = vrot.lane.b32.xlu1 %v4235_v53, %s4021_s28 }
  0xf8   : > { %3620 = vmatmul.mubr.f32.vlgmr.msra.gmra.mrb[12].mxu1 %v4020_v36 }
  0xf9   : > { %3719 = vmatpush3.bf16.xpose.msra.mxu1 %v3718_v43  ;;  %3633 = vmatprep.mubr.msk.f32.mxu1 %vm4018_vm0, %v4019_v28 }
  0xfa   : > { %3724 = vmatprep.subr.bf16.mxu1 %v3720_v48  ;;  %2215 = vrot.lane.b32.xlu0 %v4210_v38, %s4021_s28 }
  0xfb   : > { %2223 = vrot.lane.b32.xlu1 %v4248_v61, %s4021_s28 }
  0xfc   : > { %3627 = vmatmul.mubr.f32.vlgmr.msra.gmra.mrb[14].mxu0 %v4020_v36 }
  0xfd   : > { %3723 = vmatpush3.bf16.msra.mxu0 %v3720_v48 }
  0xfe   : > { %2221 = vrot.lane.b32.xlu0 %v4251_v62, %s4021_s28 }
  0xff   : > { %2227 = vrot.lane.b32.xlu1 %v4261_v6, %s4021_s28 }
 0x100   : > { %3634 = vmatmul.mubr.f32.vlgmr.msra.gmra.mrb[14].mxu1 %v4020_v36 }
 0x101   : > { %3725 = vmatpush3.bf16.msra.mxu1 %v3720_v48 }
 0x102   : > { %2225 = vrot.lane.b32.xlu0 %v4264_v7, %s4021_s28 }
 0x103   : > { %2239 = vrot.lane.b32.xlu1 %v4210_v38, %s4022_s11 }
 0x106   : > { %2237 = vrot.lane.b32.xlu0 %v4213_v39, %s4022_s11 }
 0x107   : > { %2243 = vrot.lane.b32.xlu1 %v4235_v53, %s4022_s11 }
 0x10a   : > { %2241 = vrot.lane.b32.xlu0 %v4238_v54, %s4022_s11 }
 0x10b   : > { %2247 = vrot.lane.b32.xlu1 %v4248_v61, %s4022_s11 }
 0x10e   : > { %2245 = vrot.lane.b32.xlu0 %v4251_v62, %s4022_s11 }
 0x10f   : > { %2251 = vrot.lane.b32.xlu1 %v4261_v6, %s4022_s11 }
 0x112   : > { %2249 = vrot.lane.b32.xlu0 %v4264_v7, %s4022_s11 }
 0x113   : > { %2701 = vrot.lane.b32.xlu1 %v4171_v23, %s4021_s28 }
 0x116   : > { %2699 = vrot.lane.b32.xlu0 %v4159_v17, %s4021_s28 }
 0x117   : > { %2705 = vrot.lane.b32.xlu1 %v4168_v22, %s4021_s28 }
 0x11a   : > { %2703 = vrot.lane.b32.xlu0 %v4165_v21, %s4021_s28 }
 0x11b   : > { %2709 = vrot.lane.b32.xlu1 %v4188_v30, %s4021_s28 }
 0x11e   : > { %2707 = vrot.lane.b32.xlu0 %v4191_v31, %s4021_s28 }
 0x11f   : > { %2713 = vrot.lane.b32.xlu1 %v4220_v45, %s4021_s28 }
 0x122   : > { %2711 = vrot.lane.b32.xlu0 %v4223_v46, %s4021_s28 }
 0x123   : > { %2725 = vrot.lane.b32.xlu1 %v4171_v23, %s4022_s11 }
 0x126   : > { %2723 = vrot.lane.b32.xlu0 %v4159_v17, %s4022_s11 }
 0x127   : > { %2729 = vrot.lane.b32.xlu1 %v4168_v22, %s4022_s11 }
 0x12a   : > { %2727 = vrot.lane.b32.xlu0 %v4165_v21, %s4022_s11 }
 0x12b   : > { %2733 = vrot.lane.b32.xlu1 %v4188_v30, %s4022_s11 }
 0x12e   : > { %2731 = vrot.lane.b32.xlu0 %v4191_v31, %s4022_s11 }
 0x12f   : > { %2737 = vrot.lane.b32.xlu1 %v4220_v45, %s4022_s11 }
 0x132   : > { %2735 = vrot.lane.b32.xlu0 %v4223_v46, %s4022_s11 }
 0x142   : > { %v4350_v57 = vpop.xlane.xlu1 %1172 }
 0x14e   : > { %v1157_v4 = vpop.xlane.xlu0 %1156 }
 0x152   : > { %v1159_v12 = vpop.xlane.xlu0 %1158 }
 0x156   : > { %v1161_v53 = vpop.xlane.xlu1 %1160 }
 0x157   : > { %v4404_v32 = vpop.xlane.xlu0 %1174 }
 0x15a   : > { %v1163_v0 = vpop.xlane.xlu1 %1162 }
 0x15b   : > { %v4417_v43 = vpop.xlane.xlu0 %1176 }
 0x15e   : > { %v1165_v10 = vpop.xlane.xlu1 %1164 }
 0x163   : > { %v1167_v20 = vpop.xlane.xlu1 %1166 }
 0x167   : > { %v1169_v40 = vpop.xlane.xlu1 %1168 }
 0x194   : > { %v3530_v49 = vpop.f32.mrb[0].mxu0 }
 0x195   : > { %v606_v50 = vpop.f32.mrb[1].mxu0  ;;  %v1797_v15 = vmul.f32 2.0, %v3530_v49 }
 0x196   : > { %v1796_v16 = vmul.f32 2.0, %v606_v50 }
 0x19b   : > { %v3537_v51 = vpop.f32.mrb[0].mxu1 }
 0x19c   : > { %v681_v52 = vpop.f32.mrb[1].mxu1  ;;  %v1799_v35 = vmul.f32 2.0, %v3537_v51 }
 0x19d   : > { %v1798_v36 = vmul.f32 2.0, %v681_v52 }
 0x19f   : > { %v4338_v55 = vpop.f32.mrb[2].mxu0 }
 0x1a0   : > { %v4340_v56 = vpop.f32.mrb[3].mxu0  ;;  %v1801_v51 = vmul.f32 2.0, %v4338_v55  ;;  %v1171_v55 = vpop.xlane.xlu1 %1170 }
 0x1a1   : > { %v1800_v22 = vmul.f32 2.0, %v4340_v56 }
 0x1a3   : > { %v4346_v39 = vpop.f32.mrb[2].mxu1 }
 0x1a4   : > { %v4348_v54 = vpop.f32.mrb[3].mxu1  ;;  %v1803_v46 = vmul.f32 2.0, %v4346_v39 }
 0x1a7   : > { %v4356_v38 = vpop.f32.mrb[4].mxu0 }
 0x1a8   : > { %v4358_v58 = vpop.f32.mrb[5].mxu0 }
 0x1ab   : > { %v4364_v59 = vpop.f32.mrb[4].mxu1 }
 0x1ac   : > { %v4366_v60 = vpop.f32.mrb[5].mxu1  ;;  %v4438_v56 = vmul.f32 2.0, %v4364_v59 }
 0x1ad   : > { %v4441_v39 = vmul.f32 2.0, %v4366_v60 }
 0x1af   : > { %v4372_v1 = vpop.f32.mrb[6].mxu0 }
 0x1b0   : > { %v4374_v2 = vpop.f32.mrb[7].mxu0 }
 0x1b3   : > { %v4383_v5 = vpop.f32.mrb[6].mxu1 }
 0x1b4   : > { %v4385_v8 = vpop.f32.mrb[7].mxu1  ;;  %v4451_v59 = vmul.f32 2.0, %v4383_v5 }
 0x1b7   : > { %v1254_v11 = vpop.f32.mrb[8].mxu0 }
 0x1b8   : > { %v1751_v13 = vrot.slane %v1254_v11, %v4388_v9  ;;  %v3586_v14 = vpop.f32.mrb[9].mxu0 }
 0x1b9   : > { %v4457_v14 = vpop.xlane.xlu0 %1178 }
 0x1ba   : > { %v1780_v18 = vadd.f32 %v1751_v13, %v1157_v4  ;;  %v1781_v19 = vadd.f32 %v1751_v13, %v1159_v12  ;;  %v4434_v4 = vmul.f32 2.0, %v4358_v58  ;;  %v4448_v13 = vmul.f32 2.0, %v4374_v2 }
 0x1bb   : > { %v1324_v25 = vpop.f32.mrb[8].mxu1 }
 0x1bc   : > { %v1812_v26 = vsub.f32 %v1780_v18, %v1796_v16  ;;  %v1813_v27 = vsub.f32 %v1781_v19, %v1797_v15  ;;  %v1755_v17 = vrot.slane %v1324_v25, %v4388_v9  ;;  %v3593_v29 = vpop.f32.mrb[9].mxu1 }
 0x1be   : > { %v4406_v21 = vmax.f32 %v1812_v26, 0.0  ;;  %v4408_v33 = vmax.f32 %v1813_v27, 0.0  ;;  %v1782_v28 = vadd.f32 %v1755_v17, %v1161_v53  ;;  %v1783_v34 = vadd.f32 %v1755_v17, %v1163_v0 }
 0x1bf   : > { %v1394_v24 = vpop.f32.mrb[10].mxu0  ;;  %v1802_v53 = vmul.f32 2.0, %v4348_v54  ;;  %v4431_v0 = vmul.f32 2.0, %v4356_v38 }
 0x1c0   : > { %3792 = vrsqrt.f32 %v4406_v21  ;;  %v3600_v37 = vpop.f32.mrb[11].mxu0  ;;  %v1814_v23 = vsub.f32 %v1782_v28, %v1798_v36  ;;  %v1815_v31 = vsub.f32 %v1783_v34, %v1799_v35  ;;  %v1759_v41 = vrot.slane %v1394_v24, %v4388_v9 }
 0x1c1   : > { %3794 = vrsqrt.f32 %v4408_v33  ;;  %vm1846_vm1 = vcmp.eq.f32.partialorder %v4406_v21, inf  ;;  %vm1848_vm2 = vcmp.eq.f32.partialorder %v4406_v21, 0.0  ;;  %vm1853_vm3 = vcmp.eq.f32.partialorder %v4408_v33, inf }
 0x1c2   : > { %v4419_v44 = vmax.f32 %v1814_v23, 0.0  ;;  %v4421_v47 = vmax.f32 %v1815_v31, 0.0  ;;  %v1784_v48 = vadd.f32 %v1759_v41, %v1165_v10  ;;  %v1785_v49 = vadd.f32 %v1759_v41, %v1167_v20 }
 0x1c3   : > { %v1464_v42 = vpop.f32.mrb[10].mxu1  ;;  %v4444_v10 = vmul.f32 2.0, %v4372_v1  ;;  %v1849_v20 = vand.u32 2147483648, %v4406_v21  ;;  %vm1855_vm4 = vcmp.eq.f32.partialorder %v4408_v33, 0.0  ;;  %v1856_v28 = vand.u32 2147483648, %v4408_v33 }
 0x1c4   : > { %v3607_v50 = vpop.f32.mrb[11].mxu1  ;;  %v1763_v52 = vrot.slane %v1464_v42, %v4388_v9  ;;  %3796 = vrsqrt.f32 %v4419_v44  ;;  %v1816_v54 = vsub.f32 %v1784_v48, %v1800_v22  ;;  %v1817_v38 = vsub.f32 %v1785_v49, %v1801_v51 }
 0x1c5   : > { %3798 = vrsqrt.f32 %v4421_v47  ;;  %vm1860_vm5 = vcmp.eq.f32.partialorder %v4419_v44, inf  ;;  %vm1862_vm6 = vcmp.eq.f32.partialorder %v4419_v44, 0.0  ;;  %v1863_v35 = vand.u32 2147483648, %v4419_v44 }
 0x1c6   : > { %v1786_v11 = vadd.f32 %v1763_v52, %v1169_v40  ;;  %v1787_v58 = vadd.f32 %v1763_v52, %v1171_v55  ;;  %v4459_v15 = vmax.f32 %v1816_v54, 0.0  ;;  %v4461_v16 = vmax.f32 %v1817_v38, 0.0  ;;  %v1181_v40 = vpop.xlane.xlu0 %1180 }
 0x1c7   : > { %v1534_v30 = vpop.f32.mrb[12].mxu0  ;;  %vm1867_vm7 = vcmp.eq.f32.partialorder %v4421_v47, inf  ;;  %vm1869_vm9 = vcmp.eq.f32.partialorder %v4421_v47, 0.0  ;;  %v1870_v22 = vand.u32 2147483648, %v4421_v47 }
 0x1c8   : > { %v3614_v12 = vpop.f32.mrb[13].mxu0  ;;  %v1767_v60 = vrot.slane %v1534_v30, %v4388_v9  ;;  %v1818_v18 = vsub.f32 %v1786_v11, %v1802_v53  ;;  %v1819_v2 = vsub.f32 %v1787_v58, %v1803_v46  ;;  %3800 = vrsqrt.f32 %v4459_v15 }
 0x1c9   : > { %3802 = vrsqrt.f32 %v4461_v16  ;;  %vm1874_vm10 = vcmp.eq.f32.partialorder %v4459_v15, inf  ;;  %vm1876_vm11 = vcmp.eq.f32.partialorder %v4459_v15, 0.0  ;;  %vm1881_vm12 = vcmp.eq.f32.partialorder %v4461_v16, inf }
 0x1ca   : > { %v3793_v1 = vpop.eup %3792  ;;  %v1788_v26 = vadd.f32 %v1767_v60, %v4350_v57  ;;  %v1789_v27 = vadd.f32 %v1767_v60, %v4404_v32  ;;  %v4481_v36 = vmax.f32 %v1818_v18, 0.0  ;;  %v4483_v31 = vmax.f32 %v1819_v2, 0.0  ;;  %v1183_v12 = vpop.xlane.xlu0 %1182 }
 0x1cb   : > { %v3795_v19 = vpop.eup %3794  ;;  %v1845_v5 = vmul.f32 %v3793_v1, %v4406_v21  ;;  %v1604_v25 = vpop.f32.mrb[12].mxu1  ;;  %v1877_v1 = vand.u32 2147483648, %v4459_v15  ;;  %vm1883_vm13 = vcmp.eq.f32.partialorder %v4461_v16, 0.0  ;;  %v1884_v18 = vand.u32 2147483648, %v4461_v16 }
 0x1cc   : > { %v1852_v45 = vmul.f32 %v3795_v19, %v4408_v33  ;;  %v3621_v17 = vpop.f32.mrb[13].mxu1  ;;  %v1820_v41 = vsub.f32 %v1788_v26, %v4434_v4  ;;  %v1771_v50 = vrot.slane %v1604_v25, %v4388_v9  ;;  %vm1888_vm14 = vcmp.eq.f32.partialorder %v4481_v36, inf }
 0x1cd   : > { %v1847_v29 = vsel %vm1846_vm1, %v4406_v21, %v1845_v5  ;;  %vm1890_vm15 = vcmp.eq.f32.partialorder %v4481_v36, 0.0  ;;  %vm1895_vm0 = vcmp.eq.f32.partialorder %v4483_v31, inf  ;;  %vm1897_vm1 = vcmp.eq.f32.partialorder %v4483_v31, 0.0 }
 0x1ce   : > { %v1850_v34 = vsel %vm1848_vm2, %v1849_v20, %v1847_v29  ;;  %v1854_v24 = vsel %vm1853_vm3, %v4408_v33, %v1852_v45  ;;  %v3797_v37 = vpop.eup %3796  ;;  %v1821_v33 = vsub.f32 %v1789_v27, %v4431_v0  ;;  %v4503_v4 = vmax.f32 %v1820_v41, 0.0 }
 0x1cf   : > { %v1857_v57 = vsel %vm1855_vm4, %v1856_v28, %v1854_v24  ;;  %v1956_v32 = vadd.f32 1.0, %v1850_v34  ;;  %v1674_v21 = vpop.f32.mrb[14].mxu0  ;;  %v3799_v48 = vpop.eup %3798  ;;  %v1859_v49 = vmul.f32 %v3797_v37, %v4419_v44  ;;  %v1790_v11 = vadd.f32 %v1771_v50, %v4417_v43 }
 0x1d0   : > { %v1957_v23 = vadd.f32 1.0, %v1857_v57  ;;  %v3628_v42 = vpop.f32.mrb[15].mxu0  ;;  %v1866_v51 = vmul.f32 %v3799_v48, %v4421_v47  ;;  %v4505_v38 = vmax.f32 %v1821_v33, 0.0  ;;  %v1791_v19 = vadd.f32 %v1771_v50, %v4457_v14 }
 0x1d1   : > { %3804 = vrcp.f32 %v1956_v32  ;;  %v1861_v46 = vsel %vm1860_vm5, %v4419_v44, %v1859_v49  ;;  %v1822_v5 = vsub.f32 %v1790_v11, %v4441_v39  ;;  %v1891_v45 = vand.u32 2147483648, %v4481_v36  ;;  %v1185_v39 = vpop.xlane.xlu0 %1184 }
 0x1d2   : > { %3806 = vrcp.f32 %v1957_v23  ;;  %v1864_v53 = vsel %vm1862_vm6, %v1863_v35, %v1861_v46  ;;  %v1868_v0 = vsel %vm1867_vm7, %v4421_v47, %v1866_v51  ;;  %v3801_v58 = vpop.eup %3800  ;;  %v1775_v26 = vrot.slane %v1674_v21, %v4388_v9 }
 0x1d3   : > { %3808 = vrsqrt.f32 %v4481_v36  ;;  %v1744_v52 = vpop.f32.mrb[14].mxu1  ;;  %v1871_v30 = vsel %vm1869_vm9, %v1870_v22, %v1868_v0  ;;  %v1958_v54 = vadd.f32 1.0, %v1864_v53  ;;  %v3803_v44 = vpop.eup %3802  ;;  %v1873_v47 = vmul.f32 %v3801_v58, %v4459_v15 }
 0x1d4   : > { %3810 = vrsqrt.f32 %v4483_v31  ;;  %v3635_v55 = vpop.f32.mrb[15].mxu1  ;;  %v1959_v60 = vadd.f32 1.0, %v1871_v30  ;;  %v1880_v43 = vmul.f32 %v3803_v44, %v4461_v16  ;;  %v1823_v28 = vsub.f32 %v1791_v19, %v4438_v56 }
 0x1d5   : > { %3812 = vrsqrt.f32 %v4503_v4  ;;  %v1875_v2 = vsel %vm1874_vm10, %v4459_v15, %v1873_v47  ;;  %v4531_v34 = vmax.f32 %v1822_v5, 0.0  ;;  %v1792_v15 = vadd.f32 %v1775_v26, %v1181_v40  ;;  %v1187_v46 = vpop.xlane.xlu0 %1186 }
 0x1d6   : > { %3814 = vrcp.f32 %v1958_v54  ;;  %v1878_v20 = vsel %vm1876_vm11, %v1877_v1, %v1875_v2  ;;  %v1882_v25 = vsel %vm1881_vm12, %v4461_v16, %v1880_v43  ;;  %v1793_v57 = vadd.f32 %v1775_v26, %v1183_v12 }
 0x1d7   : > { %3816 = vrcp.f32 %v1959_v60  ;;  %v1885_v17 = vsel %vm1883_vm13, %v1884_v18, %v1882_v25  ;;  %v1960_v29 = vadd.f32 1.0, %v1878_v20  ;;  %v1898_v32 = vand.u32 2147483648, %v4483_v31 }
 0x1d8   : > { %3818 = vrsqrt.f32 %v4505_v38  ;;  %v1961_v24 = vadd.f32 1.0, %v1885_v17  ;;  %v4537_v35 = vmax.f32 %v1823_v28, 0.0  ;;  %v1824_v37 = vsub.f32 %v1792_v15, %v4448_v13 }
 0x1d9   : > { %3820 = vrcp.f32 %v1960_v29  ;;  %v1779_v40 = vrot.slane %v1744_v52, %v4388_v9  ;;  %vm1902_vm2 = vcmp.eq.f32.partialorder %v4503_v4, inf  ;;  %vm1904_vm3 = vcmp.eq.f32.partialorder %v4503_v4, 0.0 }
 0x1da   : > { %3822 = vrcp.f32 %v1961_v24  ;;  %v1905_v42 = vand.u32 2147483648, %v4503_v4  ;;  %v1825_v13 = vsub.f32 %v1793_v57, %v4444_v10  ;;  %v4559_v51 = vmax.f32 %v1824_v37, 0.0 }
 0x1db   : > { %v3805_v27 = vpop.eup %3804  ;;  %3824 = vrsqrt.f32 %v4531_v34  ;;  %v1794_v10 = vadd.f32 %v1779_v40, %v1185_v39  ;;  %v1795_v54 = vadd.f32 %v1779_v40, %v1187_v46  ;;  %vm1909_vm4 = vcmp.eq.f32.partialorder %v4505_v38, inf }
 0x1dc   : > { %v3807_v14 = vpop.eup %3806  ;;  %3640 = vmatprep.mubr.msk.f32.mxu0 %vm2006_vm8, %v3805_v27  ;;  %3826 = vrsqrt.f32 %v4537_v35  ;;  %v4563_v0 = vmax.f32 %v1825_v13, 0.0  ;;  %v1912_v12 = vand.u32 2147483648, %v4505_v38  ;;  %vm1911_vm5 = vcmp.eq.f32.partialorder %v4505_v38, 0.0 }
 0x1dd   : > { %v3809_v16 = vpop.eup %3808  ;;  %3641 = vmatmul.mubr.msk.f32.vlgmr.msra.gmra.mrb[16].mxu0 %vm2006_vm8, %v3807_v14  ;;  %3828 = vrsqrt.f32 %v4559_v51  ;;  %vm1916_vm6 = vcmp.eq.f32.partialorder %v4531_v34, inf  ;;  %vm1918_vm7 = vcmp.eq.f32.partialorder %v4531_v34, 0.0  ;;  %vm1923_vm9 = vcmp.eq.f32.partialorder %v4537_v35, inf }
 0x1de   : > { %v3811_v56 = vpop.eup %3810  ;;  %v1887_v21 = vmul.f32 %v3809_v16, %v4481_v36  ;;  %v1926_v26 = vand.u32 2147483648, %v4537_v35  ;;  %vm1925_vm10 = vcmp.eq.f32.partialorder %v4537_v35, 0.0  ;;  %vm1930_vm11 = vcmp.eq.f32.partialorder %v4559_v51, inf }
 0x1df   : > { %v1894_v23 = vmul.f32 %v3811_v56, %v4483_v31  ;;  %v3813_v41 = vpop.eup %3812  ;;  %vm1932_vm12 = vcmp.eq.f32.partialorder %v4559_v51, 0.0  ;;  %vm1937_vm13 = vcmp.eq.f32.partialorder %v4563_v0, inf  ;;  %v1940_v37 = vand.u32 2147483648, %v4563_v0 }
 0x1e0   : > { %v1889_v33 = vsel %vm1888_vm14, %v4481_v36, %v1887_v21  ;;  %v3815_v9 = vpop.eup %3814  ;;  %v1901_v50 = vmul.f32 %v3813_v41, %v4503_v4  ;;  %vm1939_vm14 = vcmp.eq.f32.partialorder %v4563_v0, 0.0 }
 0x1e1   : > { %v1892_v48 = vsel %vm1890_vm15, %v1891_v45, %v1889_v33  ;;  %v1896_v49 = vsel %vm1895_vm0, %v4483_v31, %v1894_v23  ;;  %v3817_v22 = vpop.eup %3816  ;;  %3643 = vmatprep.mubr.msk.f32.mxu0 %vm2006_vm8, %v3815_v9  ;;  %v1810_v31 = vmul.f32 2.0, %v4385_v8 }
 0x1e2   : > { %v1899_v52 = vsel %vm1897_vm1, %v1898_v32, %v1896_v49  ;;  %v1962_v53 = vadd.f32 1.0, %v1892_v48  ;;  %v3819_v36 = vpop.eup %3818  ;;  %v1903_v30 = vsel %vm1902_vm2, %v4503_v4, %v1901_v50  ;;  %3644 = vmatmul.mubr.msk.f32.gmra.mrb[18].mxu0 %vm2006_vm8, %v3817_v22  ;;  %v1827_v4 = vsub.f32 %v1795_v54, %v4451_v59 }
 0x1e3   : > { %v1963_v55 = vadd.f32 1.0, %v1899_v52  ;;  %v1906_v11 = vsel %vm1904_vm3, %v1905_v42, %v1903_v30  ;;  %v1908_v58 = vmul.f32 %v3819_v36, %v4505_v38  ;;  %v3821_v44 = vpop.eup %3820  ;;  %v1826_v47 = vsub.f32 %v1794_v10, %v1810_v31 }
 0x1e4   : > { %3830 = vrcp.f32 %v1962_v53  ;;  %v1964_v60 = vadd.f32 1.0, %v1906_v11  ;;  %v3823_v18 = vpop.eup %3822  ;;  %3646 = vmatprep.mubr.msk.f32.mxu0 %vm2006_vm8, %v3821_v44  ;;  %v4582_v5 = vmax.f32 %v1827_v4, 0.0  ;;  %v1919_v59 = vand.u32 2147483648, %v4531_v34 }
 0x1e5   : > { %3832 = vrcp.f32 %v1963_v55  ;;  %v1910_v1 = vsel %vm1909_vm4, %v4505_v38, %v1908_v58  ;;  %v3825_v2 = vpop.eup %3824  ;;  %v1842_v19 = vmax.f32 %v1826_v47, 0.0  ;;  %v4621_v58 = vpop.permute.xlu1 %2213 }
 0x1e6   : > { %3834 = vrsqrt.f32 %v4563_v0  ;;  %v1913_v8 = vsel %vm1911_vm5, %v1912_v12, %v1910_v1  ;;  %3647 = vmatmul.mubr.msk.f32.gmra.mrb[20].mxu0 %vm2006_vm8, %v3823_v18  ;;  %v3827_v20 = vpop.eup %3826  ;;  %v1915_v38 = vmul.f32 %v3825_v2, %v4531_v34  ;;  %vm1951_vm1 = vcmp.eq.f32.partialorder %v4582_v5, inf  ;;  %v4623_v12 = vpop.permute.xlu0 %2215 }
 0x1e7   : > { %3836 = vrcp.f32 %v1964_v60  ;;  %v1965_v43 = vadd.f32 1.0, %v1913_v8  ;;  %v1922_v25 = vmul.f32 %v3827_v20, %v4537_v35  ;;  %v3829_v27 = vpop.eup %3828  ;;  %vm1944_vm15 = vcmp.eq.f32.partialorder %v1842_v19, inf }
 0x1e8   : > { %v1917_v45 = vsel %vm1916_vm6, %v4531_v34, %v1915_v38  ;;  %v1929_v24 = vmul.f32 %v3829_v27, %v4559_v51  ;;  %v1933_v34 = vand.u32 2147483648, %v4559_v51  ;;  %v1947_v49 = vand.u32 2147483648, %v1842_v19 }
 0x1e9   : > { %3838 = vrcp.f32 %v1965_v43  ;;  %v1920_v17 = vsel %vm1918_vm7, %v1919_v59, %v1917_v45  ;;  %v1924_v29 = vsel %vm1923_vm9, %v4537_v35, %v1922_v25  ;;  %vm1946_vm0 = vcmp.eq.f32.partialorder %v1842_v19, 0.0  ;;  %v4625_v60 = vpop.permute.xlu1 %2217 }
 0x1ea   : > { %3840 = vrsqrt.f32 %v1842_v19  ;;  %v1927_v14 = vsel %vm1925_vm10, %v1926_v26, %v1924_v29  ;;  %v1966_v39 = vadd.f32 1.0, %v1920_v17  ;;  %v1931_v32 = vsel %vm1930_vm11, %v4559_v51, %v1929_v24  ;;  %v2222_v1 = vpop.permute.xlu0 %2221 }
 0x1eb   : > { %3842 = vrsqrt.f32 %v4582_v5  ;;  %v1967_v57 = vadd.f32 1.0, %v1927_v14  ;;  %v1934_v56 = vsel %vm1932_vm12, %v1933_v34, %v1931_v32  ;;  %v1954_v22 = vand.u32 2147483648, %v4582_v5 }
 0x1ec   : > { %3844 = vrcp.f32 %v1966_v39  ;;  %v1968_v40 = vadd.f32 1.0, %v1934_v56  ;;  %vm1953_vm2 = vcmp.eq.f32.partialorder %v4582_v5, 0.0  ;;  %v4632_v18 = vand.u32 127, %v1748_v63 }
 0x1ed   : > { %3846 = vrcp.f32 %v1967_v57  ;;  %v4627_v44 = vpop.permute.xlu1 %2219  ;;  %v4641_v20 = vstv %s3398_s14  ;;  %v4645_v25 = vstv %s3403_s18  ;;  %v4647_v45 = vstv %s3404_s19  ;;  %s5168_s14 = sld [smem:[#allocation3 + $0xb]]  ;;  %s5170_s18 = sld [smem:[#allocation3 + $0xe]] }
 0x1ee   : > { %v3831_v28 = vpop.eup %3830  ;;  %3848 = vrcp.f32 %v1968_v40  ;;  %v2226_v8 = vpop.permute.xlu0 %2225  ;;  %v4649_v63 = vstv %s3409_s21  ;;  %v4651_v26 = vstv %s3410_s22  ;;  %v2325_v27 = vmul.f32 %v4641_v20, %v4251_v62  ;;  %s3414_s19 = sld [smem:[#allocation3 + $0x11]]  ;;  %s2211_s21 = sld [smem:[#allocation2]] }
 0x1ef   : > { %v3833_v15 = vpop.eup %3832  ;;  %3649 = vmatprep.mubr.msk.f32.mxu0 %vm2006_vm8, %v3831_v28  ;;  %v2458_v17 = vmul.f32 %v4647_v45, %v4251_v62  ;;  %v2566_v14 = vmul.f32 %v4651_v26, %v4251_v62  ;;  %vm2209_vm3 = vcmp.lt.s32.totalorder %v4632_v18, 127  ;;  %v2326_v62 = vmul.f32 %v4641_v20, %v4248_v61  ;;  %s5407_s22 = sand.u32 1, %s4005_s30  }
 0x1f0   : > { %v3835_v16 = vpop.eup %3834  ;;  %3650 = vmatmul.mubr.msk.f32.gmra.mrb[22].mxu0 %vm2006_vm8, %v3833_v15  ;;  %v2459_v56 = vmul.f32 %v4647_v45, %v4248_v61 }
 0x1f1   : > { %v3837_v35 = vpop.eup %3836  ;;  %v1936_v21 = vmul.f32 %v3835_v16, %v4563_v0  ;;  %v2224_v47 = vpop.permute.xlu1 %2223 }
 0x1f2   : > { %3652 = vmatprep.mubr.msk.f32.mxu1 %vm2006_vm8, %v3837_v35  ;;  %v4629_v4 = vpop.permute.xlu0 %2237 }
 0x1f3   : > { %v1938_v23 = vsel %vm1937_vm13, %v4563_v0, %v1936_v21  ;;  %v3839_v41 = vpop.eup %3838  ;;  %v2567_v21 = vmul.f32 %v4651_v26, %v4248_v61  ;;  %v2568_v61 = vmul.f32 %v4651_v26, %v4264_v7 }
 0x1f4   : > { %v1941_v33 = vsel %vm1939_vm14, %v1940_v37, %v1938_v23  ;;  %v3841_v42 = vpop.eup %3840  ;;  %3653 = vmatmul.mubr.msk.f32.vlgmr.msra.gmra.mrb[16].mxu1 %vm2006_vm8, %v3839_v41  ;;  %v2327_v41 = vmul.f32 %v4641_v20, %v4264_v7 }
 0x1f5   : > { %v1969_v13 = vadd.f32 1.0, %v1941_v33  ;;  %v3843_v9 = vpop.eup %3842  ;;  %v1943_v48 = vmul.f32 %v3841_v42, %v1842_v19  ;;  %v2228_v43 = vpop.permute.xlu1 %2227 }
 0x1f6   : > { %v1950_v50 = vmul.f32 %v3843_v9, %v4582_v5  ;;  %v3845_v53 = vpop.eup %3844  ;;  %v4634_v2 = vpop.permute.xlu0 %2241  ;;  %v2460_v9 = vmul.f32 %v4647_v45, %v4264_v7 }
 0x1f7   : > { %3850 = vrcp.f32 %v1969_v13  ;;  %v1945_v51 = vsel %vm1944_vm15, %v1842_v19, %v1943_v48  ;;  %v3847_v36 = vpop.eup %3846  ;;  %3655 = vmatprep.mubr.msk.f32.mxu1 %vm2006_vm8, %v3845_v53 }
 0x1f8   : > { %v1948_v46 = vsel %vm1946_vm0, %v1947_v49, %v1945_v51  ;;  %v1952_v52 = vsel %vm1951_vm1, %v4582_v5, %v1950_v50  ;;  %3656 = vmatmul.mubr.msk.f32.gmra.mrb[18].mxu1 %vm2006_vm8, %v3847_v36  ;;  %v3849_v30 = vpop.eup %3848  ;;  %v4639_v5 = vstv %s2309_s13  ;;  %v2328_v51 = vmul.f32 %v4641_v20, %v4261_v6  ;;  %s3413_s13 = sld [smem:[#allocation3 + $0x10]] }
 0x1f9   : > { %v1955_v0 = vsel %vm1953_vm2, %v1954_v22, %v1952_v52  ;;  %v1970_v10 = vadd.f32 1.0, %v1948_v46  ;;  %3658 = vmatprep.mubr.msk.f32.mxu1 %vm2006_vm8, %v3849_v30  ;;  %v4643_v38 = vpop.permute.xlu1 %2239  ;;  %v2461_v22 = vmul.f32 %v4647_v45, %v4261_v6  ;;  %v2569_v46 = vmul.f32 %v4651_v26, %v4261_v6 }
 0x1fa   : > { %v1971_v55 = vadd.f32 1.0, %v1955_v0  ;;  %v2246_v59 = vpop.permute.xlu0 %2245  ;;  %v4715_v6 = vstv %s4671_s26  ;;  %s3447_s26 = sshll.u32 %s4096_s6, 10 }
 0x1fb   : > { %3852 = vrcp.f32 %v1970_v10 }
 0x1fc   : > { %3854 = vrcp.f32 %v1971_v55  ;;  %v4707_v55 = vstv %s4664_s24  ;;  %s3368_s24 = sshll.u32 %s5407_s22, 6 }
 0x1fd   : > { %v4666_v15 = vpop.permute.xlu1 %2243 }
 0x1fe   : > { %v2250_v57 = vpop.permute.xlu0 %2249 }
 0x201   : > { %v3851_v54 = vpop.eup %3850  ;;  %v2248_v42 = vpop.permute.xlu1 %2247 }
 0x202   : > { %3659 = vmatmul.mubr.msk.f32.gmra.mrb[20].mxu1 %vm2006_vm8, %v3851_v54  ;;  %v4688_v13 = vpop.permute.xlu0 %2699  ;;  %v2258_v30 = vsel %vm2209_vm3, %v2248_v42, 0.0 }
 0x205   : > { %v3853_v31 = vpop.eup %3852  ;;  %v2252_v54 = vpop.permute.xlu1 %2251 }
 0x206   : > { %v3855_v11 = vpop.eup %3854  ;;  %3661 = vmatprep.mubr.msk.f32.mxu1 %vm2006_vm8, %v3853_v31 }
 0x207   : > { %3662 = vmatmul.mubr.msk.f32.gmra.mrb[22].mxu1 %vm2006_vm8, %v3855_v11  ;;  %vm2210_vm8 = vcmp.ge.s32.totalorder %v4632_v18, 1 }
 0x208   : > { %v2233_v19 = vsel %vm2210_vm8, %v2222_v1, 0.0  ;;  %v2234_v24 = vsel %vm2210_vm8, %v2224_v47, 0.0  ;;  %v2235_v32 = vsel %vm2210_vm8, %v2226_v8, 0.0  ;;  %v2236_v33 = vsel %vm2210_vm8, %v2228_v43, 0.0  ;;  %v4717_v8 = vpop.permute.xlu0 %2703 }
 0x209   : > { %v2315_v29 = vmul.f32 %v4639_v5, %v2233_v19  ;;  %v2448_v28 = vmul.f32 %v4645_v25, %v2233_v19  ;;  %v2556_v39 = vmul.f32 %v4649_v63, %v2233_v19  ;;  %v2316_v37 = vmul.f32 %v4639_v5, %v2234_v24 }
 0x20a   : > { %v2449_v40 = vmul.f32 %v4645_v25, %v2234_v24  ;;  %v2557_v23 = vmul.f32 %v4649_v63, %v2234_v24  ;;  %v2317_v48 = vmul.f32 %v4639_v5, %v2235_v32  ;;  %v2450_v49 = vmul.f32 %v4645_v25, %v2235_v32 }
 0x20b   : > { %v2333_v34 = vadd.f32 %v2325_v27, %v2315_v29  ;;  %v2466_v16 = vadd.f32 %v2458_v17, %v2448_v28  ;;  %v2574_v35 = vadd.f32 %v2566_v14, %v2556_v39  ;;  %v2558_v50 = vmul.f32 %v4649_v63, %v2235_v32 }
 0x20c   : > { %v2334_v52 = vadd.f32 %v2326_v62, %v2316_v37  ;;  %v2318_v7 = vmul.f32 %v4639_v5, %v2236_v33  ;;  %v2451_v53 = vmul.f32 %v4645_v25, %v2236_v33  ;;  %v2559_v0 = vmul.f32 %v4649_v63, %v2236_v33 }
 0x20d   : > { %v2467_v10 = vadd.f32 %v2459_v56, %v2449_v40  ;;  %v2575_v36 = vadd.f32 %v2567_v21, %v2557_v23  ;;  %v2335_v31 = vadd.f32 %v2327_v41, %v2317_v48  ;;  %v2468_v11 = vadd.f32 %v2460_v9, %v2450_v49  ;;  %v2702_v56 = vpop.permute.xlu1 %2701 }
 0x20e   : > { %v4712_v1 = vstv %s4669_s25  ;;  %v2576_v47 = vadd.f32 %v2568_v61, %v2558_v50  ;;  %v2344_v43 = vmul.f32 %v4707_v55, %v2258_v30  ;;  %v2585_v27 = vmul.f32 %v4715_v6, %v2258_v30  ;;  %v4748_v50 = vpop.permute.xlu0 %2707  ;;  %s5449_s25 = scalar_lea.vmem [#allocation6], %s3368_s24 }
 0x20f   : > { %v2477_v19 = vmul.f32 %v4712_v1, %v2258_v30  ;;  %v2336_v17 = vadd.f32 %v2328_v51, %v2318_v7  ;;  %v2469_v29 = vadd.f32 %v2461_v22, %v2451_v53  ;;  %v2577_v28 = vadd.f32 %v2569_v46, %v2559_v0  ;;  %v3889_v30 = vld [vmem:[%s4156_s20] sm:$0xff] }
 0x210   : > { %v2257_v14 = vsel %vm2209_vm3, %v2246_v59, 0.0  ;;  %v4724_v39 = vadd.f32 %v2344_v43, %v2334_v52  ;;  %v4728_v62 = vadd.f32 %v2585_v27, %v2575_v36  ;;  %v2260_v40 = vsel %vm2209_vm3, %v2252_v54, 0.0  ;;  %v3888_v52 = vld [vmem:[%s4156_s20 + $0x8] sm:$0xff] }
 0x211   : > { %v4726_v24 = vadd.f32 %v2477_v19, %v2467_v10  ;;  %v2343_v32 = vmul.f32 %v4707_v55, %v2257_v14  ;;  %v2476_v21 = vmul.f32 %v4712_v1, %v2257_v14  ;;  %v2584_v37 = vmul.f32 %v4715_v6, %v2257_v14  ;;  %v2706_v46 = vpop.permute.xlu1 %2705 }
 0x212   : > { %5835 = vst [vmem:[#allocation13_spill] sm:$0xff] %v4724_v39  ;;  %5837 = vst [vmem:[#allocation15_spill] sm:$0xff] %v4728_v62  ;;  %v2259_v23 = vsel %vm2209_vm3, %v2250_v57, 0.0  ;;  %v2346_v41 = vmul.f32 %v4707_v55, %v2260_v40  ;;  %v2479_v33 = vmul.f32 %v4712_v1, %v2260_v40  ;;  %v2587_v42 = vmul.f32 %v4715_v6, %v2260_v40  ;;  %v4789_v40 = vpop.permute.xlu0 %2711 }
 0x213   : > { %5836 = vst [vmem:[#allocation14_spill] sm:$0xff] %v4726_v24  ;;  %v4737_v59 = vadd.f32 %v2343_v32, %v2333_v34  ;;  %v4742_v9 = vadd.f32 %v2476_v21, %v2466_v16  ;;  %v4744_v61 = vadd.f32 %v2584_v37, %v2574_v35  ;;  %v2345_v48 = vmul.f32 %v4707_v55, %v2259_v23 }
 0x214   : > { %v2478_v49 = vmul.f32 %v4712_v1, %v2259_v23  ;;  %v4750_v57 = vadd.f32 %v2346_v41, %v2336_v17  ;;  %v4752_v34 = vadd.f32 %v2479_v33, %v2469_v29  ;;  %v4754_v51 = vadd.f32 %v2587_v42, %v2577_v28  ;;  %v3890_v17 = vld [vmem:[%s4156_s20 + $0x18] sm:$0xff] }
 0x215   : > { %5838 = vst [vmem:[#allocation16_spill] sm:$0xff] %v4737_v59  ;;  %5839 = vst [vmem:[#allocation17_spill] sm:$0xff] %v4742_v9  ;;  %v2586_v22 = vmul.f32 %v4715_v6, %v2259_v23  ;;  %v4757_v16 = vadd.f32 %v2345_v48, %v2335_v31  ;;  %v2808_v7 = vmul.f32 %v3888_v52, %v4641_v20  ;;  %v2716_v36 = vsel %vm2210_vm8, %v2702_v56, 0.0  ;;  %v2710_v14 = vpop.permute.xlu1 %2709 }
 0x216   : > { %5840 = vst [vmem:[#allocation18_spill] sm:$0xff] %v4744_v61  ;;  %5841 = vst [vmem:[#allocation19_spill] sm:$0xff] %v4750_v57  ;;  %v4759_v35 = vadd.f32 %v2478_v49, %v2468_v11  ;;  %v2940_v53 = vmul.f32 %v3888_v52, %v4647_v45  ;;  %v3048_v10 = vmul.f32 %v3888_v52, %v4651_v26  ;;  %v2718_v33 = vsel %vm2210_vm8, %v2706_v46, 0.0 }
 0x217   : > { %5842 = vst [vmem:[#allocation20_spill] sm:$0xff] %v4752_v34  ;;  %5843 = vst [vmem:[#allocation21_spill] sm:$0xff] %v4754_v51  ;;  %v4764_v0 = vadd.f32 %v2586_v22, %v2576_v47  ;;  %v2807_v54 = vmul.f32 %v3889_v30, %v4641_v20  ;;  %v2798_v31 = vmul.f32 %v2716_v36, %v4639_v5  ;;  %v2715_v47 = vsel %vm2210_vm8, %v4688_v13, 0.0 }
 0x218   : > { %5844 = vst [vmem:[#allocation22_spill] sm:$0xff] %v4757_v16  ;;  %5845 = vst [vmem:[#allocation23_spill] sm:$0xff] %v4759_v35  ;;  %v2930_v11 = vmul.f32 %v2716_v36, %v4645_v25  ;;  %v3038_v43 = vmul.f32 %v2716_v36, %v4649_v63  ;;  %v2939_v19 = vmul.f32 %v3889_v30, %v4647_v45  ;;  %v2721_v24 = vsel %vm2210_vm8, %v4789_v40, 0.0 }
 0x219   : > { %5846 = vst [vmem:[#allocation24_spill] sm:$0xff] %v4764_v0  ;;  %v3047_v27 = vmul.f32 %v3889_v30, %v4651_v26  ;;  %v2810_v29 = vmul.f32 %v3890_v17, %v4641_v20  ;;  %v2942_v28 = vmul.f32 %v3890_v17, %v4647_v45  ;;  %v4782_v32 = vadd.f32 %v2808_v7, %v2798_v31  ;;  %v2714_v30 = vpop.permute.xlu1 %2713 }
 0x21a   : > { %v4784_v56 = vadd.f32 %v2940_v53, %v2930_v11  ;;  %v4786_v21 = vadd.f32 %v3048_v10, %v3038_v43  ;;  %v2797_v37 = vmul.f32 %v2715_v47, %v4639_v5  ;;  %v2929_v23 = vmul.f32 %v2715_v47, %v4645_v25  ;;  %v3891_v53 = vld [vmem:[%s4156_s20 + $0x10] sm:$0xff] }
 0x21b   : > { %v3037_v13 = vmul.f32 %v2715_v47, %v4649_v63  ;;  %v3050_v41 = vmul.f32 %v3890_v17, %v4651_v26  ;;  %v2800_v48 = vmul.f32 %v2718_v33, %v4639_v5  ;;  %v2932_v49 = vmul.f32 %v2718_v33, %v4645_v25 }
 0x21c   : > { %v4796_v42 = vadd.f32 %v2807_v54, %v2797_v37  ;;  %v3040_v22 = vmul.f32 %v2718_v33, %v4649_v63  ;;  %v4801_v52 = vadd.f32 %v2939_v19, %v2929_v23  ;;  %v2809_v10 = vmul.f32 %v3891_v53, %v4641_v20  ;;  %v3892_v19 = vld [vmem:[%s4156_s20 + $0x28] sm:$0xff] }
 0x21d   : > { %v4803_v7 = vadd.f32 %v3047_v27, %v3037_v13  ;;  %v2941_v36 = vmul.f32 %v3891_v53, %v4647_v45  ;;  %v4808_v46 = vadd.f32 %v2810_v29, %v2800_v48  ;;  %v4810_v54 = vadd.f32 %v2942_v28, %v2932_v49  ;;  %v2724_v13 = vpop.permute.xlu0 %2723  ;;  %v3893_v48 = vld [vmem:[%s4156_s20 + $0x20] sm:$0xff] }
 0x21e   : > { %v4812_v31 = vadd.f32 %v3050_v41, %v3040_v22  ;;  %v3049_v11 = vmul.f32 %v3891_v53, %v4651_v26  ;;  %v2717_v43 = vsel %vm2210_vm8, %v4717_v8, 0.0  ;;  %v2812_v27 = vmul.f32 %v3892_v19, %v4641_v20  ;;  %v2726_v22 = vpop.permute.xlu1 %2725 }
 0x21f   : > { %v2944_v47 = vmul.f32 %v3892_v19, %v4647_v45  ;;  %v3052_v17 = vmul.f32 %v3892_v19, %v4651_v26  ;;  %v2799_v29 = vmul.f32 %v2717_v43, %v4639_v5  ;;  %v2931_v28 = vmul.f32 %v2717_v43, %v4645_v25 }
 0x220   : > { %v3039_v37 = vmul.f32 %v2717_v43, %v4649_v63  ;;  %v2720_v23 = vsel %vm2210_vm8, %v2710_v14, 0.0  ;;  %v2811_v49 = vmul.f32 %v3893_v48, %v4641_v20  ;;  %v2943_v14 = vmul.f32 %v3893_v48, %v4647_v45 }
 0x221   : > { %v2802_v8 = vmul.f32 %v2720_v23, %v4639_v5  ;;  %v2934_v41 = vmul.f32 %v2720_v23, %v4645_v25  ;;  %v3042_v33 = vmul.f32 %v2720_v23, %v4649_v63  ;;  %v4832_v53 = vadd.f32 %v2809_v10, %v2799_v29  ;;  %v3894_v29 = vld [vmem:[%s4156_s20 + $0x38] sm:$0xff] }
 0x222   : > { %v4834_v19 = vadd.f32 %v2941_v36, %v2931_v28  ;;  %v4836_v43 = vadd.f32 %v3049_v11, %v3039_v37  ;;  %v3051_v23 = vmul.f32 %v3893_v48, %v4651_v26  ;;  %v2719_v10 = vsel %vm2210_vm8, %v4748_v50, 0.0  ;;  %v3895_v48 = vld [vmem:[%s4156_s20 + $0x30] sm:$0xff]  ;;  %s3401_s20 = sld [smem:[#allocation3 + $0xa]] }
 0x223   : > { %v4839_v0 = vadd.f32 %v2812_v27, %v2802_v8  ;;  %v4841_v35 = vadd.f32 %v2944_v47, %v2934_v41  ;;  %v4843_v16 = vadd.f32 %v3052_v17, %v3042_v33  ;;  %v2814_v36 = vmul.f32 %v3894_v29, %v4641_v20  ;;  %v2730_v8 = vpop.permute.xlu1 %2729 }
 0x224   : > { %v2946_v11 = vmul.f32 %v3894_v29, %v4647_v45  ;;  %v3054_v28 = vmul.f32 %v3894_v29, %v4651_v26  ;;  %v2801_v27 = vmul.f32 %v2719_v10, %v4639_v5  ;;  %v2933_v47 = vmul.f32 %v2719_v10, %v4645_v25  ;;  %v2728_v29 = vpop.permute.xlu0 %2727 }
 0x225   : > { %v3041_v17 = vmul.f32 %v2719_v10, %v4649_v63  ;;  %v2722_v37 = vsel %vm2210_vm8, %v2714_v30, 0.0  ;;  %v2813_v51 = vmul.f32 %v3895_v48, %v4641_v20  ;;  %v2945_v10 = vmul.f32 %v3895_v48, %v4647_v45 }
 0x226   : > { %v2804_v41 = vmul.f32 %v2722_v37, %v4639_v5  ;;  %v2936_v50 = vmul.f32 %v2722_v37, %v4645_v25  ;;  %v3044_v33 = vmul.f32 %v2722_v37, %v4649_v63  ;;  %v2819_v34 = vadd.f32 %v2811_v49, %v2801_v27 }
 0x227   : > { %v2951_v57 = vadd.f32 %v2943_v14, %v2933_v47  ;;  %v4863_v61 = vadd.f32 %v3051_v23, %v3041_v17  ;;  %v3053_v62 = vmul.f32 %v3895_v48, %v4651_v26  ;;  %v2740_v37 = vsel %vm2209_vm3, %v2726_v22, 0.0  ;;  %v2734_v23 = vpop.permute.xlu1 %2733 }
 0x228   : > { %v2822_v9 = vadd.f32 %v2814_v36, %v2804_v41  ;;  %v2954_v59 = vadd.f32 %v2946_v11, %v2936_v50  ;;  %v3062_v30 = vadd.f32 %v3054_v28, %v3044_v33  ;;  %v2739_v49 = vsel %vm2209_vm3, %v2724_v13, 0.0  ;;  %v2732_v33 = vpop.permute.xlu0 %2731 }
 0x229   : > { %v2742_v14 = vsel %vm2209_vm3, %v2730_v8, 0.0  ;;  %v2803_v36 = vmul.f32 %v2721_v24, %v4639_v5  ;;  %v2935_v11 = vmul.f32 %v2721_v24, %v4645_v25  ;;  %v3043_v28 = vmul.f32 %v2721_v24, %v4649_v63 }
 0x22a   : > { %v2826_v27 = vmul.f32 %v2740_v37, %v4707_v55  ;;  %v2958_v40 = vmul.f32 %v2740_v37, %v4712_v1  ;;  %v3066_v47 = vmul.f32 %v2740_v37, %v4715_v6  ;;  %v2825_v22 = vmul.f32 %v2739_v49, %v4707_v55 }
 0x22b   : > { %v2957_v13 = vmul.f32 %v2739_v49, %v4712_v1  ;;  %v2821_v17 = vadd.f32 %v2813_v51, %v2803_v36  ;;  %v2953_v41 = vadd.f32 %v2945_v10, %v2935_v11  ;;  %v3061_v8 = vadd.f32 %v3053_v62, %v3043_v28  ;;  %v2738_v3 = vpop.permute.xlu1 %2737 }
 0x22c   : > { %v4885_v50 = vadd.f32 %v2826_v27, %v4782_v32  ;;  %v4888_v48 = vadd.f32 %v2958_v40, %v4784_v56  ;;  %v4891_v24 = vadd.f32 %v3066_v47, %v4786_v21  ;;  %v4894_v39 = vadd.f32 %v2825_v22, %v4796_v42 }
 0x22d   : > { %v4897_v37 = vadd.f32 %v2957_v13, %v4801_v52  ;;  %v3065_v51 = vmul.f32 %v2739_v49, %v4715_v6  ;;  %v2828_v62 = vmul.f32 %v2742_v14, %v4707_v55  ;;  %v2960_v32 = vmul.f32 %v2742_v14, %v4712_v1  ;;  %v2736_v13 = vpop.permute.xlu0 %2735 }
 0x22e   : > { %5847 = vst [vmem:[#allocation25_spill] sm:$0xff] %v4888_v48  ;;  %5848 = vst [vmem:[#allocation26_spill] sm:$0xff] %v4891_v24  ;;  %v3068_v10 = vmul.f32 %v2742_v14, %v4715_v6  ;;  %v2741_v56 = vsel %vm2209_vm3, %v2728_v29, 0.0  ;;  %v2744_v21 = vsel %vm2209_vm3, %v2734_v23, 0.0  ;;  %v2743_v42 = vsel %vm2209_vm3, %v2732_v33, 0.0 }
 0x22f   : > { %5849 = vst [vmem:[#allocation27_spill] sm:$0xff] %v4894_v39  ;;  %5850 = vst [vmem:[#allocation28_spill] sm:$0xff] %v4897_v37  ;;  %v2746_v52 = vsel %vm2209_vm3, %v2738_v3, 0.0  ;;  %v4912_v49 = vadd.f32 %v3065_v51, %v4803_v7  ;;  %v4915_v36 = vadd.f32 %v2828_v62, %v4808_v46  ;;  %v4918_v14 = vadd.f32 %v2960_v32, %v4810_v54 }
 0x230   : > { %v4921_v29 = vadd.f32 %v3068_v10, %v4812_v31  ;;  %v2827_v23 = vmul.f32 %v2741_v56, %v4707_v55  ;;  %v2959_v11 = vmul.f32 %v2741_v56, %v4712_v1  ;;  %v3067_v28 = vmul.f32 %v2741_v56, %v4715_v6 }
 0x231   : > { %5851 = vst [vmem:[#allocation29_spill] sm:$0xff] %v4912_v49  ;;  %5852 = vst [vmem:[#allocation30_spill] sm:$0xff] %v4915_v36  ;;  %v2830_v3 = vmul.f32 %v2744_v21, %v4707_v55  ;;  %v2962_v7 = vmul.f32 %v2744_v21, %v4712_v1  ;;  %v3070_v27 = vmul.f32 %v2744_v21, %v4715_v6  ;;  %v2745_v10 = vsel %vm2209_vm3, %v2736_v13, 0.0 }
 0x232   : > { %5853 = vst [vmem:[#allocation31_spill] sm:$0xff] %v4918_v14  ;;  %5854 = vst [vmem:[#allocation32_spill] sm:$0xff] %v4921_v29  ;;  %v2829_v46 = vmul.f32 %v2743_v42, %v4707_v55  ;;  %v2961_v54 = vmul.f32 %v2743_v42, %v4712_v1  ;;  %v4932_v40 = vadd.f32 %v2827_v23, %v4832_v53 }
 0x233   : > { %v4935_v31 = vadd.f32 %v2959_v11, %v4834_v19  ;;  %v4938_v47 = vadd.f32 %v3067_v28, %v4836_v43  ;;  %v4941_v22 = vadd.f32 %v2830_v3, %v4839_v0  ;;  %v4944_v33 = vadd.f32 %v2962_v7, %v4841_v35 }
 0x234   : > { %5855 = vst [vmem:[#allocation33_spill] sm:$0xff] %v4932_v40  ;;  %v4947_v51 = vadd.f32 %v3070_v27, %v4843_v16  ;;  %v4949_v62 = vadd.f32 %v2829_v46, %v2819_v34  ;;  %v4951_v53 = vadd.f32 %v2961_v54, %v2951_v57  ;;  %v3069_v19 = vmul.f32 %v2743_v42, %v4715_v6 }
 0x235   : > { %5856 = vst [vmem:[#allocation34_spill] sm:$0xff] %v4935_v31  ;;  %5857 = vst [vmem:[#allocation35_spill] sm:$0xff] %v4938_v47  ;;  %v2832_v32 = vmul.f32 %v2746_v52, %v4707_v55  ;;  %v2964_v43 = vmul.f32 %v2746_v52, %v4712_v1  ;;  %v3072_v0 = vmul.f32 %v2746_v52, %v4715_v6  ;;  %v5029_v27 = vstv %s3401_s20  ;;  %s3203_s20 = sshll.u32 %s5449_s25, 4  ;;  %s5601_s20 = int_to_ptr.vmem [resolvable:$true] %s3203_s20 }
 0x236   : > { %5858 = vst [vmem:[#allocation36_spill] sm:$0xff] %v4941_v22  ;;  %5859 = vst [vmem:[#allocation37_spill] sm:$0xff] %v4944_v33  ;;  %v4960_v35 = vadd.f32 %v3069_v19, %v4863_v61  ;;  %v2831_v56 = vmul.f32 %v2745_v10, %v4707_v55  ;;  %v2963_v21 = vmul.f32 %v2745_v10, %v4712_v1  ;;  %v5031_v46 = vstv %s3407_s27 }
 0x237   : > { %5860 = vst [vmem:[#allocation38_spill] sm:$0xff] %v4947_v51  ;;  %5861 = vst [vmem:[#allocation39_spill] sm:$0xff] %v4949_v62  ;;  %v4962_v16 = vadd.f32 %v2832_v32, %v2822_v9  ;;  %v4964_v34 = vadd.f32 %v2964_v43, %v2954_v59  ;;  %v4966_v57 = vadd.f32 %v3072_v0, %v3062_v30  ;;  %v5033_v54 = vstv %s3413_s13 }
 0x238   : > { %5862 = vst [vmem:[#allocation40_spill] sm:$0xff] %v4951_v53  ;;  %5863 = vst [vmem:[#allocation41_spill] sm:$0xff] %v4960_v35  ;;  %v3071_v42 = vmul.f32 %v2745_v10, %v4715_v6  ;;  %v4971_v23 = vadd.f32 %v2831_v56, %v2821_v17  ;;  %v4973_v52 = vadd.f32 %v2963_v21, %v2953_v41 }
 0x239   : > { %5864 = vst [vmem:[#allocation42_spill] sm:$0xff] %v4962_v16  ;;  %5865 = vst [vmem:[#allocation43_spill] sm:$0xff] %v4964_v34 }
 0x23a   : > { %5866 = vst [vmem:[#allocation44_spill] sm:$0xff] %v4966_v57  ;;  %5867 = vst [vmem:[#allocation45_spill] sm:$0xff] %v4971_v23  ;;  %v4975_v11 = vadd.f32 %v3071_v42, %v3061_v8 }
 0x23b   : > { %5868 = vst [vmem:[#allocation46_spill] sm:$0xff] %v4973_v52 }
 0x23c   : > { %5869 = vst [vmem:[#allocation47_spill] sm:$0xff] %v4975_v11 }
 0x2b0   : > { %v4977_v61 = vpop.f32.mrb[16].mxu0 }
 0x2b1   : > { %2263 = vrot.lane.b32.xlu1 %v4977_v61, %s4021_s28  ;;  %v4981_v59 = vpop.f32.mrb[17].mxu0 }
 0x2b2   : > { %2261 = vrot.lane.b32.xlu0 %v4981_v59, %s4021_s28 }
 0x2b5   : > { %2287 = vrot.lane.b32.xlu1 %v4977_v61, %s4022_s11  ;;  %v4987_v9 = vpop.f32.mrb[18].mxu0 }
 0x2b6   : > { %2285 = vrot.lane.b32.xlu0 %v4981_v59, %s4022_s11  ;;  %v4991_v30 = vpop.f32.mrb[19].mxu0 }
 0x2b9   : > { %2267 = vrot.lane.b32.xlu1 %v4987_v9, %s4021_s28  ;;  %v4997_v17 = vpop.f32.mrb[20].mxu0 }
 0x2ba   : > { %2265 = vrot.lane.b32.xlu0 %v4991_v30, %s4021_s28  ;;  %v4999_v41 = vpop.f32.mrb[21].mxu0 }
 0x2bd   : > { %2291 = vrot.lane.b32.xlu1 %v4987_v9, %s4022_s11 }
 0x2be   : > { %2289 = vrot.lane.b32.xlu0 %v4991_v30, %s4022_s11 }
 0x2c1   : > { %2271 = vrot.lane.b32.xlu1 %v4997_v17, %s4021_s28 }
 0x2c2   : > { %2269 = vrot.lane.b32.xlu0 %v4999_v41, %s4021_s28 }
 0x2c3   : > { %v5009_v8 = vpop.f32.mrb[22].mxu0 }
 0x2c4   : > { %v5011_v28 = vpop.f32.mrb[23].mxu0 }
 0x2c5   : > { %2295 = vrot.lane.b32.xlu1 %v4997_v17, %s4022_s11 }
 0x2c6   : > { %2293 = vrot.lane.b32.xlu0 %v4999_v41, %s4022_s11 }
 0x2c7   : > { %v5017_v3 = vpop.f32.mrb[16].mxu1 }
 0x2c8   : > { %v5019_v7 = vpop.f32.mrb[17].mxu1 }
 0x2c9   : > { %2275 = vrot.lane.b32.xlu1 %v5009_v8, %s4021_s28  ;;  %v5323_v14 = vmul.f32 %v5029_v27, %v5019_v7 }
 0x2ca   : > { %2273 = vrot.lane.b32.xlu0 %v5011_v28, %s4021_s28 }
 0x2cb   : > { %v3657_v13 = vpop.f32.mrb[18].mxu1  ;;  %5892 = vst [vmem:[#allocation68_spill] sm:$0xff] %v5323_v14 }
 0x2cc   : > { %v5036_v19 = vmul.f32 %v3657_v13, %v5029_v27  ;;  %v5039_v32 = vmul.f32 %v3657_v13, %v5031_v46  ;;  %v5042_v43 = vmul.f32 %v3657_v13, %v5033_v54  ;;  %v2171_v0 = vpop.f32.mrb[19].mxu1 }
 0x2cd   : > { %2299 = vrot.lane.b32.xlu1 %v5009_v8, %s4022_s11  ;;  %v5045_v10 = vmul.f32 %v5029_v27, %v2171_v0  ;;  %v5048_v56 = vmul.f32 %v5031_v46, %v2171_v0  ;;  %v5051_v21 = vmul.f32 %v5033_v54, %v2171_v0 }
 0x2ce   : > { %2297 = vrot.lane.b32.xlu0 %v5011_v28, %s4022_s11  ;;  %5870 = vst [vmem:[#allocation48_spill] sm:$0xff] %v5036_v19  ;;  %5871 = vst [vmem:[#allocation49_spill] sm:$0xff] %v5039_v32 }
 0x2cf   : > { %5872 = vst [vmem:[#allocation50_spill] sm:$0xff] %v5042_v43  ;;  %5873 = vst [vmem:[#allocation51_spill] sm:$0xff] %v5045_v10  ;;  %v3899_v43 = vld [vmem:[%s4197_s23 + $0x18] sm:$0xff] }
 0x2d0   : > { %5874 = vst [vmem:[#allocation52_spill] sm:$0xff] %v5048_v56  ;;  %5875 = vst [vmem:[#allocation53_spill] sm:$0xff] %v5051_v21 }
 0x2d1   : > { %2749 = vrot.lane.b32.xlu1 %v5017_v3, %s4021_s28 }
 0x2d2   : > { %2747 = vrot.lane.b32.xlu0 %v5019_v7, %s4021_s28 }
 0x2d5   : > { %v3660_v42 = vpop.f32.mrb[20].mxu1  ;;  %2773 = vrot.lane.b32.xlu1 %v5017_v3, %s4022_s11 }
 0x2d6   : > { %v5060_v11 = vmul.f32 %v3660_v42, %v5029_v27  ;;  %v5063_v52 = vmul.f32 %v3660_v42, %v5031_v46  ;;  %v5066_v23 = vmul.f32 %v3660_v42, %v5033_v54  ;;  %v2181_v57 = vpop.f32.mrb[21].mxu1  ;;  %2771 = vrot.lane.b32.xlu0 %v5019_v7, %s4022_s11 }
 0x2d7   : > { %v5071_v34 = vmul.f32 %v5029_v27, %v2181_v57  ;;  %v5074_v16 = vmul.f32 %v5031_v46, %v2181_v57  ;;  %v5077_v35 = vmul.f32 %v5033_v54, %v2181_v57 }
 0x2d8   : > { %5876 = vst [vmem:[#allocation54_spill] sm:$0xff] %v5060_v11  ;;  %5877 = vst [vmem:[#allocation55_spill] sm:$0xff] %v5063_v52 }
 0x2d9   : > { %5878 = vst [vmem:[#allocation56_spill] sm:$0xff] %v5066_v23  ;;  %5879 = vst [vmem:[#allocation57_spill] sm:$0xff] %v5071_v34  ;;  %2753 = vrot.lane.b32.xlu1 %v3657_v13, %s4021_s28 }
 0x2da   : > { %5880 = vst [vmem:[#allocation58_spill] sm:$0xff] %v5074_v16  ;;  %5881 = vst [vmem:[#allocation59_spill] sm:$0xff] %v5077_v35  ;;  %2751 = vrot.lane.b32.xlu0 %v2171_v0, %s4021_s28  ;;  %v3663_v52 = vpop.f32.mrb[22].mxu1 }
 0x2db   : > { %v5082_v23 = vmul.f32 %v3663_v52, %v5029_v27  ;;  %v5085_v53 = vmul.f32 %v3663_v52, %v5031_v46  ;;  %v5088_v62 = vmul.f32 %v3663_v52, %v5033_v54  ;;  %v2191_v34 = vpop.f32.mrb[23].mxu1 }
 0x2dc   : > { %v5091_v16 = vmul.f32 %v5029_v27, %v2191_v34  ;;  %v5094_v35 = vmul.f32 %v5031_v46, %v2191_v34  ;;  %v5097_v11 = vmul.f32 %v5033_v54, %v2191_v34 }
 0x2dd   : > { %5882 = vst [vmem:[#allocation60_spill] sm:$0xff] %v5082_v23  ;;  %5883 = vst [vmem:[#allocation61_spill] sm:$0xff] %v5085_v53  ;;  %2777 = vrot.lane.b32.xlu1 %v3657_v13, %s4022_s11  ;;  %v2229_v13 = vsel %vm2210_vm8, %v4621_v58, 0.0  ;;  %v3897_v23 = vld [vmem:[%s4197_s23 + $0x10] sm:$0xff] }
 0x2de   : > { %5884 = vst [vmem:[#allocation62_spill] sm:$0xff] %v5088_v62  ;;  %5885 = vst [vmem:[#allocation63_spill] sm:$0xff] %v5091_v16  ;;  %2775 = vrot.lane.b32.xlu0 %v2171_v0, %s4022_s11  ;;  %v2311_v0 = vmul.f32 %v4639_v5, %v2229_v13  ;;  %v2552_v62 = vmul.f32 %v4649_v63, %v2229_v13  ;;  %v2323_v51 = vmul.f32 %v3897_v23, %v4641_v20 }
 0x2df   : > { %5886 = vst [vmem:[#allocation64_spill] sm:$0xff] %v5094_v35  ;;  %5887 = vst [vmem:[#allocation65_spill] sm:$0xff] %v5097_v11  ;;  %v3896_v11 = vld [vmem:[%s4197_s23] sm:$0xff]  ;;  %v2456_v33 = vmul.f32 %v3897_v23, %v4647_v45 }
 0x2e0   : > { %v2454_v35 = vmul.f32 %v3896_v11, %v4647_v45  ;;  %v2562_v53 = vmul.f32 %v3896_v11, %v4651_v26 }
 0x2e1   : > { %2757 = vrot.lane.b32.xlu1 %v3660_v42, %s4021_s28 }
 0x2e2   : > { %2755 = vrot.lane.b32.xlu0 %v2181_v57, %s4021_s28  ;;  %v2570_v19 = vadd.f32 %v2562_v53, %v2552_v62 }
 0x2e5   : > { %2781 = vrot.lane.b32.xlu1 %v3660_v42, %s4022_s11  ;;  %v2321_v42 = vmul.f32 %v3896_v11, %v4641_v20 }
 0x2e6   : > { %2779 = vrot.lane.b32.xlu0 %v2181_v57, %s4022_s11  ;;  %v2444_v57 = vmul.f32 %v4645_v25, %v2229_v13  ;;  %v3898_v13 = vld [vmem:[%s4197_s23 + $0x8] sm:$0xff]  ;;  %s5154_s23 = sld [smem:[#allocation3 + $0x9]] }
 0x2e7   : > { %v2329_v16 = vadd.f32 %v2321_v42, %v2311_v0  ;;  %v2232_v0 = vsel %vm2210_vm8, %v4627_v44, 0.0  ;;  %v2322_v11 = vmul.f32 %v3898_v13, %v4641_v20  ;;  %v2563_v21 = vmul.f32 %v3898_v13, %v4651_v26 }
 0x2e8   : > { %v2462_v58 = vadd.f32 %v2454_v35, %v2444_v57  ;;  %v2455_v57 = vmul.f32 %v3898_v13, %v4647_v45  ;;  %v2324_v44 = vmul.f32 %v3899_v43, %v4641_v20  ;;  %v2447_v32 = vmul.f32 %v4645_v25, %v2232_v0 }
 0x2e9   : > { %2761 = vrot.lane.b32.xlu1 %v3663_v52, %s4021_s28  ;;  %v2253_v13 = vsel %vm2209_vm3, %v4629_v4, 0.0  ;;  %v2254_v20 = vsel %vm2209_vm3, %v4643_v38, 0.0  ;;  %v2256_v38 = vsel %vm2209_vm3, %v4666_v15, 0.0 }
 0x2ea   : > { %2759 = vrot.lane.b32.xlu0 %v2191_v34, %s4021_s28  ;;  %s5160_s28 = sld [smem:[#allocation3 + $0xc]]  ;;  %v2473_v62 = vmul.f32 %v4712_v1, %v2254_v20  ;;  %v2581_v53 = vmul.f32 %v4715_v6, %v2254_v20 }
 0x2ed   : > { %2785 = vrot.lane.b32.xlu1 %v3663_v52, %s4022_s11  ;;  %v2231_v52 = vsel %vm2210_vm8, %v4625_v60, 0.0 }
 0x2ee   : > { %2783 = vrot.lane.b32.xlu0 %v2191_v34, %s4022_s11  ;;  %v2230_v34 = vsel %vm2210_vm8, %v4623_v12, 0.0  ;;  %v2313_v22 = vmul.f32 %v4639_v5, %v2231_v52  ;;  %v2446_v60 = vmul.f32 %v4645_v25, %v2231_v52  ;;  %v2564_v12 = vmul.f32 %v3897_v23, %v4651_v26  ;;  %s5162_s11 = sld [smem:[#allocation3 + $0xf]] }
 0x2ef   : > { %v2554_v35 = vmul.f32 %v4649_v63, %v2231_v52  ;;  %v2312_v42 = vmul.f32 %v4639_v5, %v2230_v34  ;;  %v2445_v56 = vmul.f32 %v4645_v25, %v2230_v34  ;;  %v2553_v10 = vmul.f32 %v4649_v63, %v2230_v34 }
 0x2f0   : > { %v2457_v23 = vmul.f32 %v3899_v43, %v4647_v45  ;;  %v2314_v52 = vmul.f32 %v4639_v5, %v2232_v0  ;;  %v2331_v47 = vadd.f32 %v2323_v51, %v2313_v22  ;;  %v2464_v31 = vadd.f32 %v2456_v33, %v2446_v60 }
 0x2f1   : > { %v2572_v40 = vadd.f32 %v2564_v12, %v2554_v35  ;;  %v2330_v29 = vadd.f32 %v2322_v11, %v2312_v42  ;;  %v2565_v34 = vmul.f32 %v3899_v43, %v4651_v26  ;;  %v2463_v5 = vadd.f32 %v2455_v57, %v2445_v56 }
 0x2f2   : > { %v2571_v45 = vadd.f32 %v2563_v21, %v2553_v10  ;;  %v2555_v25 = vmul.f32 %v4649_v63, %v2232_v0  ;;  %v2255_v22 = vsel %vm2209_vm3, %v4634_v2, 0.0  ;;  %v2332_v4 = vadd.f32 %v2324_v44, %v2314_v52 }
 0x2f3   : > { %v2465_v26 = vadd.f32 %v2457_v23, %v2447_v32  ;;  %v2339_v33 = vmul.f32 %v4707_v55, %v2253_v13  ;;  %v2472_v63 = vmul.f32 %v4712_v1, %v2253_v13  ;;  %v2580_v2 = vmul.f32 %v4715_v6, %v2253_v13 }
 0x2f4   : > { %v2340_v51 = vmul.f32 %v4707_v55, %v2254_v20  ;;  %v2341_v32 = vmul.f32 %v4707_v55, %v2255_v22  ;;  %v2474_v43 = vmul.f32 %v4712_v1, %v2255_v22  ;;  %v2582_v15 = vmul.f32 %v4715_v6, %v2255_v22 }
 0x2f5   : > { %v2573_v10 = vadd.f32 %v2565_v34, %v2555_v25  ;;  %v2342_v56 = vmul.f32 %v4707_v55, %v2256_v38  ;;  %v2475_v21 = vmul.f32 %v4712_v1, %v2256_v38  ;;  %v2583_v60 = vmul.f32 %v4715_v6, %v2256_v38  ;;  %v5888_v34 = vld [vmem:[#allocation12_spill] sm:$0xff] }
 0x2f6   : > { %v5183_v0 = vadd.f32 %v2339_v33, %v2329_v16  ;;  %v5185_v12 = vadd.f32 %v2472_v63, %v2462_v58  ;;  %v5187_v35 = vadd.f32 %v2580_v2, %v2570_v19  ;;  %v2348_v11 = vadd.f32 %v2340_v51, %v2330_v29 }
 0x2f7   : > { %v2481_v42 = vadd.f32 %v2473_v62, %v2463_v5  ;;  %v2589_v57 = vadd.f32 %v2581_v53, %v2571_v45  ;;  %v5189_v55 = vadd.f32 %v2341_v32, %v2331_v47  ;;  %v5191_v44 = vadd.f32 %v2474_v43, %v2464_v31 }
 0x2f8   : > { %v5193_v1 = vadd.f32 %v2582_v15, %v2572_v40  ;;  %v5195_v6 = vadd.f32 %v2342_v56, %v2332_v4  ;;  %v5197_v23 = vadd.f32 %v2475_v21, %v2465_v26  ;;  %v5199_v16 = vadd.f32 %v2583_v60, %v2573_v10 }
 0x2f9   : > { %v5202_v52 = vstv %s5154_s23  ;;  %v5205_v58 = vstv %s5160_s28  ;;  %v5208_v19 = vstv %s5162_s11  ;;  %v5211_v29 = vstv %s5168_s14  ;;  %s5599_s23 = scalar_lea.hbm %s5827_s7, %s3447_s26  ;;  %s3184_s28 = scalar_lea.sflag [#allocation4], %s5407_s22 }
 0x2fa   : > { %v5214_v47 = vstv %s5170_s18  ;;  %v2376_v40 = vmul.f32 %v4977_v61, %v5029_v27  ;;  %v2509_v31 = vmul.f32 %v4977_v61, %v5031_v46  ;;  %v5220_v13 = vstv %s3414_s19  ;;  %s3915_s11 = scalar_lea.vmem %s5601_s20, 1024  ;;  %s4023_s14 = smov [#allocation6]  }
 0x2fb   : > { %v5223_v20 = vadd.s32 8, %v5888_v34  ;;  %v2617_v5 = vmul.f32 %v4977_v61, %v5033_v54  ;;  %v2375_v45 = vmul.f32 %v5029_v27, %v4981_v59  ;;  %v2508_v25 = vmul.f32 %v5031_v46, %v4981_v59  ;;  %p3916_p9 = scmp.ne.s32.totalorder %s5601_s20, %s3915_s11  ;;  %s3919_s18 = sshll.u32 %s4023_s14, 4  ;;  %s3920_s18 = int_to_ptr.vmem [resolvable:$false] %s3919_s18 }
 0x2fc   : > { %v5233_v22 = vmul.f32 %v5033_v54, %v4981_v59  ;;  %v5237_v4 = vmul.f32 %v4987_v9, %v5029_v27  ;;  %v5241_v26 = vmul.f32 %v4987_v9, %v5031_v46  ;;  %v5245_v61 = vmul.f32 %v4987_v9, %v5033_v54  ;;  %s3921_s19 = scalar_lea.vmem %s3920_s18, 2048  ;;  %p3922_p13 = scmp.lt.s32.totalorder %s5601_s20, %s3920_s18 }
 0x2fd   : > { %v5247_v33 = vstv %s2211_s21  ;;  %v5251_v38 = vmul.f32 %v5029_v27, %v4991_v30  ;;  %v5255_v59 = vmul.f32 %v5031_v46, %v4991_v30  ;;  %v5259_v63 = vmul.f32 %v5033_v54, %v4991_v30  ;;  %p3917_p10 = pnand %p3916_p9, %p4113_p5  ;;  %p3923_p0 = scmp.lt.s32.totalorder %s3921_s19, %s3915_s11 }
 0x2fe   : > { %v5263_v2 = vmul.f32 %v4997_v17, %v5029_v27  ;;  %v5267_v9 = vmul.f32 %v4997_v17, %v5031_v46  ;;  %v5271_v51 = vmul.f32 %v4997_v17, %v5033_v54  ;;  %v5275_v62 = vmul.f32 %v5029_v27, %v4999_v41 }
 0x2ff   : > { %v5279_v30 = vmul.f32 %v5031_v46, %v4999_v41  ;;  %v5283_v53 = vmul.f32 %v5033_v54, %v4999_v41  ;;  %v5287_v32 = vmul.f32 %v5009_v8, %v5029_v27  ;;  %v5291_v17 = vmul.f32 %v5009_v8, %v5031_v46  ;;  %p3918_p12 = pneg %p3917_p10  ;;  %p3924_p1 = por %p3923_p0, %p3922_p13 }
 0x300   : > { %v5295_v43 = vmul.f32 %v5009_v8, %v5033_v54  ;;  %v5299_v15 = vmul.f32 %v5029_v27, %v5011_v28  ;;  %v5303_v41 = vmul.f32 %v5031_v46, %v5011_v28  ;;  %v5307_v10 = vmul.f32 %v5033_v54, %v5011_v28 }
 0x301   : > { %v5311_v56 = vmul.f32 %v5017_v3, %v5029_v27  ;;  %v5315_v8 = vmul.f32 %v5017_v3, %v5031_v46  ;;  %v5319_v60 = vmul.f32 %v5017_v3, %v5033_v54  ;;  %v5334_v3 = vmul.f32 %v5031_v46, %v5019_v7  ;;  %p3925_p2 = pnand %p3924_p1, %p3918_p12 }
 0x302   : > { %vm2417_vm4 = vcmp.lt.s32.totalorder %v5888_v34, 1  ;;  %vm2207_vm5 = vcmp.ge.s32.totalorder %v5888_v34, 1  ;;  %vm2658_vm6 = vcmp.lt.s32.totalorder %v5888_v34, 7  ;;  %vm2206_vm7 = vcmp.lt.s32.totalorder %v5223_v20, 15 }
 0x303   : > { %5889 = vst [vmem:[#allocation12_spill] sm:$0xff] %v5311_v56  ;;  %5890 = vst [vmem:[#allocation66_spill] sm:$0xff] %v5315_v8 }
 0x304   : > { %5891 = vst [vmem:[#allocation67_spill] sm:$0xff] %v5319_v60  ;;  %5893 = vst [vmem:[#allocation69_spill] sm:$0xff] %v5334_v3  ;;  %v5342_v60 = vmul.f32 %v5033_v54, %v5019_v7 }
 0x323   : > { %v2264_v21 = vpop.permute.xlu1 %2263 }
 0x324   : > { %v2278_v28 = vsel %vm2210_vm8, %v2264_v21, 0.0  ;;  %v2262_v36 = vpop.permute.xlu0 %2261 }
 0x325   : > { %v2358_v49 = vmul.f32 %v5202_v52, %v2278_v28  ;;  %v2491_v56 = vmul.f32 %v5205_v58, %v2278_v28  ;;  %v2599_v37 = vmul.f32 %v5208_v19, %v2278_v28  ;;  %v2277_v8 = vsel %vm2210_vm8, %v2262_v36, 0.0 }
 0x326   : > { %v2357_v27 = vmul.f32 %v5202_v52, %v2277_v8  ;;  %v2490_v14 = vmul.f32 %v5205_v58, %v2277_v8  ;;  %v2598_v21 = vmul.f32 %v5208_v19, %v2277_v8 }
 0x327   : > { %v2366_v28 = vadd.f32 %v2358_v49, %v2348_v11  ;;  %v2499_v39 = vadd.f32 %v2491_v56, %v2481_v42  ;;  %v2607_v24 = vadd.f32 %v2599_v37, %v2589_v57  ;;  %v2288_v36 = vpop.permute.xlu1 %2287 }
 0x328   : > { %v2365_v46 = vadd.f32 %v2357_v27, %v5183_v0  ;;  %v2498_v3 = vadd.f32 %v2490_v14, %v5185_v12  ;;  %v2606_v8 = vadd.f32 %v2598_v21, %v5187_v35  ;;  %v2302_v48 = vsel %vm2209_vm3, %v2288_v36, 0.0  ;;  %v2286_v7 = vpop.permute.xlu0 %2285 }
 0x329   : > { %v2384_v49 = vadd.f32 %v2376_v40, %v2366_v28  ;;  %v2394_v37 = vmul.f32 %v5211_v29, %v2302_v48  ;;  %v2517_v54 = vadd.f32 %v2509_v31, %v2499_v39  ;;  %v2527_v11 = vmul.f32 %v5214_v47, %v2302_v48 }
 0x32a   : > { %v2625_v42 = vadd.f32 %v2617_v5, %v2607_v24  ;;  %v2635_v57 = vmul.f32 %v5220_v13, %v2302_v48  ;;  %v2301_v14 = vsel %vm2209_vm3, %v2286_v7, 0.0  ;;  %v2383_v0 = vadd.f32 %v2375_v45, %v2365_v46 }
 0x32b   : > { %v2402_v12 = vadd.f32 %v2394_v37, %v2384_v49  ;;  %v2535_v35 = vadd.f32 %v2527_v11, %v2517_v54  ;;  %v2393_v56 = vmul.f32 %v5211_v29, %v2301_v14  ;;  %v2516_v27 = vadd.f32 %v2508_v25, %v2498_v3  ;;  %v2268_v21 = vpop.permute.xlu1 %2267 }
 0x32c   : > { %v2643_v36 = vadd.f32 %v2635_v57, %v2625_v42  ;;  %v2526_v40 = vmul.f32 %v5214_v47, %v2301_v14  ;;  %v2624_v39 = vadd.f32 %v5233_v22, %v2606_v8  ;;  %v2634_v31 = vmul.f32 %v5220_v13, %v2301_v14  ;;  %v2266_v24 = vpop.permute.xlu0 %2265 }
 0x32d   : > { %v2413_v5 = vrot.slane %v2402_v12, 7  ;;  %v2401_v48 = vadd.f32 %v2393_v56, %v2383_v0  ;;  %v2280_v28 = vsel %vm2210_vm8, %v2268_v21, 0.0  ;;  %v2279_v45 = vsel %vm2210_vm8, %v2266_v24, 0.0 }
 0x32e   : > { %v2654_v46 = vrot.slane %v2643_v36, 1  ;;  %v2534_v7 = vadd.f32 %v2526_v40, %v2516_v27  ;;  %v2642_v25 = vadd.f32 %v2634_v31, %v2624_v39  ;;  %v2360_v3 = vmul.f32 %v5202_v52, %v2280_v28 }
 0x32f   : > { %v2409_v49 = vrot.slane %v2401_v48, 7  ;;  %v2493_v37 = vmul.f32 %v5205_v58, %v2280_v28  ;;  %v2601_v22 = vmul.f32 %v5208_v19, %v2280_v28  ;;  %v2359_v8 = vmul.f32 %v5202_v52, %v2279_v45  ;;  %v2292_v54 = vpop.permute.xlu1 %2291 }
 0x330   : > { %v2650_v11 = vrot.slane %v2642_v25, 1  ;;  %v2368_v42 = vadd.f32 %v2360_v3, %v5195_v6  ;;  %v2492_v57 = vmul.f32 %v5205_v58, %v2279_v45  ;;  %v2600_v14 = vmul.f32 %v5208_v19, %v2279_v45  ;;  %v2290_v24 = vpop.permute.xlu0 %2289 }
 0x331   : > { %v2418_v0 = vsel %vm2417_vm4, %v2409_v49, %v2413_v5  ;;  %v2422_v12 = vsel %vm2417_vm4, %v2413_v5, %v2409_v49  ;;  %v2501_v56 = vadd.f32 %v2493_v37, %v5197_v23  ;;  %v2609_v27 = vadd.f32 %v2601_v22, %v5199_v16 }
 0x332   : > { %v2426_v21 = vsel %vm2207_vm5, %v2422_v12, 0.0  ;;  %v2435_v36 = vadd.f32 %v2418_v0, %v5247_v33  ;;  %v2659_v6 = vsel %vm2658_vm6, %v2650_v11, %v2654_v46  ;;  %v2663_v40 = vsel %vm2658_vm6, %v2654_v46, %v2650_v11 }
 0x333   : > { %v2434_v39 = vadd.f32 %v2426_v21, %v5247_v33  ;;  %v2668_v31 = vsel %vm2206_vm7, %v2663_v40, 0.0  ;;  %v2367_v23 = vadd.f32 %v2359_v8, %v5189_v55  ;;  %v2500_v16 = vadd.f32 %v2492_v57, %v5191_v44  ;;  %v2272_v5 = vpop.permute.xlu1 %2271 }
 0x334   : > { %v2543_v48 = vadd.f32 %v2535_v35, %v2435_v36  ;;  %v2608_v28 = vadd.f32 %v2600_v14, %v5193_v1  ;;  %v2304_v45 = vsel %vm2209_vm3, %v2292_v54, 0.0  ;;  %v2386_v25 = vadd.f32 %v5237_v4, %v2368_v42  ;;  %v2270_v14 = vpop.permute.xlu0 %2269 }
 0x335   : > { %v2542_v46 = vadd.f32 %v2534_v7, %v2434_v39  ;;  %v2396_v3 = vmul.f32 %v5211_v29, %v2304_v45  ;;  %v2519_v49 = vadd.f32 %v5241_v26, %v2501_v56  ;;  %v2529_v37 = vmul.f32 %v5214_v47, %v2304_v45 }
 0x336   : > { %v2676_v55 = vadd.f32 %v2668_v31, %v2543_v48  ;;  %v2627_v44 = vadd.f32 %v5245_v61, %v2609_v27  ;;  %v2637_v22 = vmul.f32 %v5220_v13, %v2304_v45  ;;  %v2303_v1 = vsel %vm2209_vm3, %v2290_v24, 0.0  ;;  %v5895_v24 = vld [vmem:[#allocation14_spill] sm:$0xff]  ;;  %v5896_v48 = vld [vmem:[#allocation15_spill] sm:$0xff] }
 0x337   : > { %v2675_v35 = vadd.f32 %v2659_v6, %v2542_v46  ;;  %v2404_v8 = vadd.f32 %v2396_v3, %v2386_v25  ;;  %v2537_v54 = vadd.f32 %v2529_v37, %v2519_v49  ;;  %v2385_v4 = vadd.f32 %v5251_v38, %v2367_v23  ;;  %v2296_v0 = vpop.permute.xlu1 %2295  ;;  %v5894_v23 = vld [vmem:[#allocation13_spill] sm:$0xff] }
 0x338   : > { %3856 = vtanh.f32 %v2676_v55  ;;  %v2645_v7 = vadd.f32 %v2637_v22, %v2627_v44  ;;  %v2395_v26 = vmul.f32 %v5211_v29, %v2303_v1  ;;  %v2518_v11 = vadd.f32 %v5255_v59, %v2500_v16  ;;  %v5897_v44 = vld [vmem:[#allocation16_spill] sm:$0xff] }
 0x339   : > { %3858 = vtanh.f32 %v2675_v35  ;;  %v2414_v42 = vrot.slane %v2404_v8, 7  ;;  %v2528_v61 = vmul.f32 %v5214_v47, %v2303_v1  ;;  %v2626_v57 = vadd.f32 %v5259_v63, %v2608_v28 }
 0x33a   : > { %v2655_v12 = vrot.slane %v2645_v7, 1  ;;  %v2403_v56 = vadd.f32 %v2395_v26, %v2385_v4  ;;  %v2636_v38 = vmul.f32 %v5220_v13, %v2303_v1  ;;  %v2282_v27 = vsel %vm2210_vm8, %v2272_v5, 0.0  ;;  %v5898_v7 = vld [vmem:[#allocation17_spill] sm:$0xff] }
 0x33b   : > { %v2536_v21 = vadd.f32 %v2528_v61, %v2518_v11  ;;  %v2362_v59 = vmul.f32 %v5202_v52, %v2282_v27  ;;  %v2495_v36 = vmul.f32 %v5205_v58, %v2282_v27  ;;  %v2603_v6 = vmul.f32 %v5208_v19, %v2282_v27  ;;  %v2294_v11 = vpop.permute.xlu0 %2293 }
 0x33c   : > { %v2410_v63 = vrot.slane %v2403_v56, 7  ;;  %v2644_v40 = vadd.f32 %v2636_v38, %v2626_v57  ;;  %v2281_v39 = vsel %vm2210_vm8, %v2270_v14, 0.0  ;;  %v2306_v31 = vsel %vm2209_vm3, %v2296_v0, 0.0  ;;  %v5899_v14 = vld [vmem:[#allocation18_spill] sm:$0xff] }
 0x33d   : > { %v2370_v16 = vadd.f32 %v2362_v59, %v5894_v23  ;;  %v2503_v5 = vadd.f32 %v2495_v36, %v5895_v24  ;;  %v2611_v28 = vadd.f32 %v2603_v6, %v5896_v48  ;;  %v2361_v45 = vmul.f32 %v5202_v52, %v2281_v39 }
 0x33e   : > { %v2419_v25 = vsel %vm2417_vm4, %v2410_v63, %v2414_v42  ;;  %v2423_v46 = vsel %vm2417_vm4, %v2414_v42, %v2410_v63  ;;  %v2651_v3 = vrot.slane %v2644_v40, 1  ;;  %v2494_v49 = vmul.f32 %v5205_v58, %v2281_v39  ;;  %v2276_v42 = vpop.permute.xlu1 %2275 }
 0x33f   : > { %v2428_v37 = vsel %vm2207_vm5, %v2423_v46, 0.0  ;;  %v2437_v55 = vadd.f32 %v2419_v25, %v5247_v33  ;;  %v2369_v22 = vadd.f32 %v2361_v45, %v5897_v44  ;;  %v2602_v1 = vmul.f32 %v5208_v19, %v2281_v39 }
 0x340   : > { %v2436_v35 = vadd.f32 %v2428_v37, %v5247_v33  ;;  %v2660_v8 = vsel %vm2658_vm6, %v2651_v3, %v2655_v12  ;;  %v2664_v4 = vsel %vm2658_vm6, %v2655_v12, %v2651_v3  ;;  %v2502_v26 = vadd.f32 %v2494_v49, %v5898_v7 }
 0x341   : > { %v2545_v61 = vadd.f32 %v2537_v54, %v2437_v55  ;;  %v2670_v57 = vsel %vm2206_vm7, %v2664_v4, 0.0  ;;  %v2610_v0 = vadd.f32 %v2602_v1, %v5899_v14  ;;  %v2388_v56 = vadd.f32 %v5263_v2, %v2370_v16  ;;  %v5901_v4 = vld [vmem:[#allocation20_spill] sm:$0xff] }
 0x342   : > { %v3857_v38 = vpop.eup %3856  ;;  %v2544_v27 = vadd.f32 %v2536_v21, %v2436_v35  ;;  %v2398_v59 = vmul.f32 %v5211_v29, %v2306_v31  ;;  %v2521_v36 = vadd.f32 %v5267_v9, %v2503_v5  ;;  %v2531_v12 = vmul.f32 %v5214_v47, %v2306_v31  ;;  %v2300_v45 = vpop.permute.xlu1 %2299  ;;  %v5900_v35 = vld [vmem:[#allocation19_spill] sm:$0xff] }
 0x343   : > { %v3859_v6 = vpop.eup %3858  ;;  %2692 = vst [vmem:[%s5449_s25 + $0x8] sm:$0xff] %v3857_v38  ;;  %v2678_v54 = vadd.f32 %v2670_v57, %v2545_v61  ;;  %v2629_v63 = vadd.f32 %v5271_v51, %v2611_v28  ;;  %v2639_v2 = vmul.f32 %v5220_v13, %v2306_v31  ;;  %v2305_v21 = vsel %vm2209_vm3, %v2294_v11, 0.0  ;;  %v2274_v28 = vpop.permute.xlu0 %2273 }
 0x344   : > { %2691 = vst [vmem:[%s5449_s25] sm:$0xff] %v3859_v6  ;;  %v2677_v40 = vadd.f32 %v2660_v8, %v2544_v27  ;;  %v2406_v9 = vadd.f32 %v2398_v59, %v2388_v56  ;;  %v2539_v39 = vadd.f32 %v2531_v12, %v2521_v36  ;;  %v2387_v23 = vadd.f32 %v5275_v62, %v2369_v22  ;;  %v5903_v27 = vld [vmem:[#allocation22_spill] sm:$0xff] }
 0x345   : > { %3860 = vtanh.f32 %v2678_v54  ;;  %v2647_v16 = vadd.f32 %v2639_v2, %v2629_v63  ;;  %v2397_v24 = vmul.f32 %v5211_v29, %v2305_v21  ;;  %v2520_v5 = vadd.f32 %v5279_v30, %v2502_v26  ;;  %v5902_v26 = vld [vmem:[#allocation21_spill] sm:$0xff]  ;;  %v5904_v2 = vld [vmem:[#allocation23_spill] sm:$0xff] }
 0x346   : > { %3862 = vtanh.f32 %v2677_v40  ;;  %v2415_v48 = vrot.slane %v2406_v9, 7  ;;  %v2530_v51 = vmul.f32 %v5214_v47, %v2305_v21  ;;  %v2628_v31 = vadd.f32 %v5283_v53, %v2610_v0  ;;  %v2750_v40 = vpop.permute.xlu1 %2749 }
 0x347   : > { %v2656_v25 = vrot.slane %v2647_v16, 1  ;;  %v2405_v46 = vadd.f32 %v2397_v24, %v2387_v23  ;;  %v2638_v3 = vmul.f32 %v5220_v13, %v2305_v21  ;;  %v2284_v62 = vsel %vm2210_vm8, %v2276_v42, 0.0  ;;  %v2298_v12 = vpop.permute.xlu0 %2297  ;;  %v5905_v16 = vld [vmem:[#allocation24_spill] sm:$0xff] }
 0x348   : > { %v2538_v49 = vadd.f32 %v2530_v51, %v2520_v5  ;;  %v2364_v37 = vmul.f32 %v5202_v52, %v2284_v62  ;;  %v2497_v30 = vmul.f32 %v5205_v58, %v2284_v62  ;;  %v2605_v55 = vmul.f32 %v5208_v19, %v2284_v62 }
 0x349   : > { %v2411_v44 = vrot.slane %v2405_v46, 7  ;;  %v2646_v22 = vadd.f32 %v2638_v3, %v2628_v31  ;;  %v2283_v53 = vsel %vm2210_vm8, %v2274_v28, 0.0  ;;  %v2308_v1 = vsel %vm2209_vm3, %v2300_v45, 0.0 }
 0x34a   : > { %v2372_v8 = vadd.f32 %v2364_v37, %v5900_v35  ;;  %v2505_v7 = vadd.f32 %v2497_v30, %v5901_v4  ;;  %v2613_v11 = vadd.f32 %v2605_v55, %v5902_v26  ;;  %v2363_v42 = vmul.f32 %v5202_v52, %v2283_v53  ;;  %v2774_v35 = vpop.permute.xlu1 %2773 }
 0x34b   : > { %v2420_v61 = vsel %vm2417_vm4, %v2411_v44, %v2415_v48  ;;  %v2424_v57 = vsel %vm2417_vm4, %v2415_v48, %v2411_v44  ;;  %v2652_v14 = vrot.slane %v2646_v22, 1  ;;  %v2496_v0 = vmul.f32 %v5205_v58, %v2283_v53  ;;  %v2748_v22 = vpop.permute.xlu0 %2747 }
 0x34c   : > { %v2430_v56 = vsel %vm2207_vm5, %v2424_v57, 0.0  ;;  %v2439_v38 = vadd.f32 %v2420_v61, %v5247_v33  ;;  %v2371_v59 = vadd.f32 %v2363_v42, %v5903_v27  ;;  %v2604_v36 = vmul.f32 %v5208_v19, %v2283_v53  ;;  %v5907_v27 = vld [vmem:[#allocation26_spill] sm:$0xff] }
 0x34d   : > { %v2438_v6 = vadd.f32 %v2430_v56, %v5247_v33  ;;  %v2661_v54 = vsel %vm2658_vm6, %v2652_v14, %v2656_v25  ;;  %v2665_v63 = vsel %vm2658_vm6, %v2656_v25, %v2652_v14  ;;  %v2504_v21 = vadd.f32 %v2496_v0, %v5904_v2  ;;  %v5906_v56 = vld [vmem:[#allocation25_spill] sm:$0xff] }
 0x34e   : > { %v2547_v9 = vadd.f32 %v2539_v39, %v2439_v38  ;;  %v2672_v23 = vsel %vm2206_vm7, %v2665_v63, 0.0  ;;  %v2612_v24 = vadd.f32 %v2604_v36, %v5905_v16  ;;  %v2390_v5 = vadd.f32 %v5287_v32, %v2372_v8 }
 0x34f   : > { %v3861_v48 = vpop.eup %3860  ;;  %v2546_v51 = vadd.f32 %v2538_v49, %v2438_v6  ;;  %v2400_v31 = vmul.f32 %v5211_v29, %v2308_v1  ;;  %v2523_v28 = vadd.f32 %v5291_v17, %v2505_v7  ;;  %v2533_v45 = vmul.f32 %v5214_v47, %v2308_v1  ;;  %v2772_v2 = vpop.permute.xlu0 %2771 }
 0x350   : > { %v3863_v25 = vpop.eup %3862  ;;  %2694 = vst [vmem:[%s5449_s25 + $0x18] sm:$0xff] %v3861_v48  ;;  %v2680_v46 = vadd.f32 %v2672_v23, %v2547_v9  ;;  %v2631_v39 = vadd.f32 %v5295_v43, %v2613_v11  ;;  %v2641_v3 = vmul.f32 %v5220_v13, %v2308_v1  ;;  %v2307_v62 = vsel %vm2209_vm3, %v2298_v12, 0.0  ;;  %v5909_v48 = vld [vmem:[#allocation28_spill] sm:$0xff] }
 0x351   : > { %2693 = vst [vmem:[%s5449_s25 + $0x10] sm:$0xff] %v3863_v25  ;;  %v2679_v32 = vadd.f32 %v2661_v54, %v2546_v51  ;;  %v2408_v37 = vadd.f32 %v2400_v31, %v2390_v5  ;;  %v2541_v49 = vadd.f32 %v2533_v45, %v2523_v28  ;;  %v2389_v30 = vadd.f32 %v5299_v15, %v2371_v59  ;;  %v5910_v45 = vld [vmem:[#allocation29_spill] sm:$0xff] }
 0x352   : > { %3864 = vtanh.f32 %v2680_v46  ;;  %v2649_v17 = vadd.f32 %v2641_v3, %v2631_v39  ;;  %v2399_v55 = vmul.f32 %v5211_v29, %v2307_v62  ;;  %v2522_v44 = vadd.f32 %v5303_v41, %v2504_v21  ;;  %v5911_v46 = vld [vmem:[#allocation12_spill] sm:$0xff]  ;;  %v2754_v3 = vpop.permute.xlu1 %2753 }
 0x353   : > { %3866 = vtanh.f32 %v2679_v32  ;;  %v2416_v43 = vrot.slane %v2408_v37, 7  ;;  %v2532_v53 = vmul.f32 %v5214_v47, %v2307_v62  ;;  %v2630_v1 = vadd.f32 %v5307_v10, %v2612_v24  ;;  %v5912_v37 = vld [vmem:[#allocation66_spill] sm:$0xff] }
 0x354   : > { %v2657_v8 = vrot.slane %v2649_v17, 1  ;;  %v2407_v4 = vadd.f32 %v2399_v55, %v2389_v30  ;;  %v2640_v7 = vmul.f32 %v5220_v13, %v2307_v62  ;;  %v2764_v15 = vsel %vm2210_vm8, %v2750_v40, 0.0  ;;  %v5908_v40 = vld [vmem:[#allocation27_spill] sm:$0xff] }
 0x355   : > { %v2540_v26 = vadd.f32 %v2532_v53, %v2522_v44  ;;  %v2844_v11 = vmul.f32 %v2764_v15, %v5202_v52  ;;  %v2976_v41 = vmul.f32 %v2764_v15, %v5205_v58  ;;  %v3084_v42 = vmul.f32 %v2764_v15, %v5208_v19  ;;  %v5913_v17 = vld [vmem:[#allocation67_spill] sm:$0xff] }
 0x356   : > { %v2412_v61 = vrot.slane %v2407_v4, 7  ;;  %v2648_v57 = vadd.f32 %v2640_v7, %v2630_v1  ;;  %v2763_v10 = vsel %vm2210_vm8, %v2748_v22, 0.0  ;;  %v2788_v14 = vsel %vm2209_vm3, %v2774_v35, 0.0  ;;  %v5914_v1 = vld [vmem:[#allocation68_spill] sm:$0xff]  ;;  %v5915_v7 = vld [vmem:[#allocation69_spill] sm:$0xff] }
 0x357   : > { %v2852_v0 = vadd.f32 %v2844_v11, %v4885_v50  ;;  %v2984_v38 = vadd.f32 %v2976_v41, %v5906_v56  ;;  %v3092_v59 = vadd.f32 %v3084_v42, %v5907_v27  ;;  %v2843_v36 = vmul.f32 %v2763_v10, %v5202_v52  ;;  %v2752_v11 = vpop.permute.xlu0 %2751  ;;  %v2778_v27 = vpop.permute.xlu1 %2777 }
 0x358   : > { %v2421_v12 = vsel %vm2417_vm4, %v2412_v61, %v2416_v43  ;;  %v2425_v6 = vsel %vm2417_vm4, %v2416_v43, %v2412_v61  ;;  %v2653_v54 = vrot.slane %v2648_v57, 1  ;;  %v2975_v63 = vmul.f32 %v2763_v10, %v5205_v58 }
 0x359   : > { %v2432_v21 = vsel %vm2207_vm5, %v2425_v6, 0.0  ;;  %v2441_v50 = vadd.f32 %v2421_v12, %v5247_v33  ;;  %v2851_v9 = vadd.f32 %v2843_v36, %v5908_v40  ;;  %v3083_v23 = vmul.f32 %v2763_v10, %v5208_v19  ;;  %v5916_v40 = vld [vmem:[#allocation30_spill] sm:$0xff] }
 0x35a   : > { %v2440_v16 = vadd.f32 %v2432_v21, %v5247_v33  ;;  %v2662_v24 = vsel %vm2658_vm6, %v2653_v54, %v2657_v8  ;;  %v2666_v5 = vsel %vm2658_vm6, %v2657_v8, %v2653_v54  ;;  %v2983_v51 = vadd.f32 %v2975_v63, %v5909_v48  ;;  %v5918_v48 = vld [vmem:[#allocation32_spill] sm:$0xff] }
 0x35b   : > { %v2549_v31 = vadd.f32 %v2541_v49, %v2441_v50  ;;  %v2674_v28 = vsel %vm2206_vm7, %v2666_v5, 0.0  ;;  %v3091_v25 = vadd.f32 %v3083_v23, %v5910_v45  ;;  %v2870_v39 = vadd.f32 %v5911_v46, %v2852_v0  ;;  %v5917_v23 = vld [vmem:[#allocation31_spill] sm:$0xff]  ;;  %v5920_v45 = vld [vmem:[#allocation34_spill] sm:$0xff] }
 0x35c   : > { %v3865_v62 = vpop.eup %3864  ;;  %v2548_v32 = vadd.f32 %v2540_v26, %v2440_v16  ;;  %v3002_v30 = vadd.f32 %v5912_v37, %v2984_v38  ;;  %v3110_v55 = vadd.f32 %v5913_v17, %v3092_v59  ;;  %v2880_v44 = vmul.f32 %v2788_v14, %v5211_v29 }
 0x35d   : > { %v3867_v22 = vpop.eup %3866  ;;  %2696 = vst [vmem:[%s5449_s25 + $0x28] sm:$0xff] %v3865_v62  ;;  %v2682_v49 = vadd.f32 %v2674_v28, %v2549_v31  ;;  %v3012_v43 = vmul.f32 %v2788_v14, %v5214_v47  ;;  %v3120_v53 = vmul.f32 %v2788_v14, %v5220_v13  ;;  %v2869_v35 = vadd.f32 %v5914_v1, %v2851_v9  ;;  %v5919_v31 = vld [vmem:[#allocation33_spill] sm:$0xff] }
 0x35e   : > { %2695 = vst [vmem:[%s5449_s25 + $0x20] sm:$0xff] %v3867_v22  ;;  %v2681_v8 = vadd.f32 %v2662_v24, %v2548_v32  ;;  %v2888_v4 = vadd.f32 %v2880_v44, %v2870_v39  ;;  %v3001_v15 = vadd.f32 %v5915_v7, %v2983_v51  ;;  %v3109_v26 = vadd.f32 %v5342_v60, %v3091_v25  ;;  %v5922_v32 = vld [vmem:[#allocation48_spill] sm:$0xff]  ;;  %v2776_v22 = vpop.permute.xlu0 %2775  ;;  %v5923_v1 = vld [vmem:[#allocation49_spill] sm:$0xff] }
 0x35f   : > { %3868 = vtanh.f32 %v2682_v49  ;;  %v3020_v41 = vadd.f32 %v3012_v43, %v3002_v30  ;;  %v3128_v42 = vadd.f32 %v3120_v53, %v3110_v55  ;;  %v2787_v61 = vsel %vm2209_vm3, %v2772_v2, 0.0  ;;  %v2758_v49 = vpop.permute.xlu1 %2757 }
 0x360   : > { %3870 = vtanh.f32 %v2681_v8  ;;  %v2899_v57 = vrot.slane %v2888_v4, 7  ;;  %v2879_v10 = vmul.f32 %v2787_v61, %v5211_v29  ;;  %v3011_v14 = vmul.f32 %v2787_v61, %v5214_v47  ;;  %v5924_v8 = vld [vmem:[#allocation50_spill] sm:$0xff] }
 0x361   : > { %v3139_v0 = vrot.slane %v3128_v42, 1  ;;  %v3119_v56 = vmul.f32 %v2787_v61, %v5220_v13  ;;  %v2766_v38 = vsel %vm2210_vm8, %v2754_v3, 0.0  ;;  %v2765_v60 = vsel %vm2210_vm8, %v2752_v11, 0.0  ;;  %v5921_v3 = vld [vmem:[#allocation35_spill] sm:$0xff]  ;;  %v5926_v61 = vld [vmem:[#allocation52_spill] sm:$0xff] }
 0x362   : > { %v2887_v59 = vadd.f32 %v2879_v10, %v2869_v35  ;;  %v3019_v36 = vadd.f32 %v3011_v14, %v3001_v15  ;;  %v2846_v12 = vmul.f32 %v2766_v38, %v5202_v52  ;;  %v2978_v6 = vmul.f32 %v2766_v38, %v5205_v58  ;;  %v5925_v11 = vld [vmem:[#allocation51_spill] sm:$0xff] }
 0x363   : > { %v3127_v54 = vadd.f32 %v3119_v56, %v3109_v26  ;;  %v3086_v63 = vmul.f32 %v2766_v38, %v5208_v19  ;;  %v2845_v2 = vmul.f32 %v2765_v60, %v5202_v52  ;;  %v2977_v21 = vmul.f32 %v2765_v60, %v5205_v58 }
 0x364   : > { %v2895_v50 = vrot.slane %v2887_v59, 7  ;;  %v2854_v9 = vadd.f32 %v2846_v12, %v5916_v40  ;;  %v2986_v16 = vadd.f32 %v2978_v6, %v5917_v23  ;;  %v3085_v24 = vmul.f32 %v2765_v60, %v5208_v19  ;;  %v5927_v60 = vld [vmem:[#allocation53_spill] sm:$0xff] }
 0x365   : > { %v3135_v5 = vrot.slane %v3127_v54, 1  ;;  %v3094_v51 = vadd.f32 %v3086_v63, %v5918_v48  ;;  %v2853_v28 = vadd.f32 %v2845_v2, %v5919_v31  ;;  %v2985_v25 = vadd.f32 %v2977_v21, %v5920_v45 }
 0x366   : > { %v2903_v46 = vsel %vm2417_vm4, %v2895_v50, %v2899_v57  ;;  %v2907_v39 = vsel %vm2417_vm4, %v2899_v57, %v2895_v50  ;;  %v3093_v62 = vadd.f32 %v3085_v24, %v5921_v3  ;;  %v2872_v37 = vadd.f32 %v5922_v32, %v2854_v9 }
 0x367   : > { %v2911_v30 = vsel %vm2207_vm5, %v2907_v39, 0.0  ;;  %v2920_v17 = vadd.f32 %v2903_v46, %v5247_v33  ;;  %v3143_v55 = vsel %vm2658_vm6, %v3135_v5, %v3139_v0  ;;  %v3147_v44 = vsel %vm2658_vm6, %v3139_v0, %v3135_v5 }
 0x368   : > { %v2919_v43 = vadd.f32 %v2911_v30, %v5247_v33  ;;  %v3152_v53 = vsel %vm2206_vm7, %v3147_v44, 0.0  ;;  %v3004_v35 = vadd.f32 %v5923_v1, %v2986_v16  ;;  %v3112_v4 = vadd.f32 %v5924_v8, %v3094_v51 }
 0x369   : > { %v3869_v7 = vpop.eup %3868  ;;  %v3028_v15 = vadd.f32 %v3020_v41, %v2920_v17  ;;  %v2790_v26 = vsel %vm2209_vm3, %v2778_v27, 0.0  ;;  %v2871_v42 = vadd.f32 %v5925_v11, %v2853_v28  ;;  %v3003_v57 = vadd.f32 %v5926_v61, %v2985_v25 }
 0x36a   : > { %v3871_v10 = vpop.eup %3870  ;;  %2698 = vst [vmem:[%s5449_s25 + $0x38] sm:$0xff] %v3869_v7  ;;  %v3027_v14 = vadd.f32 %v3019_v36, %v2919_v43  ;;  %v2882_v0 = vmul.f32 %v2790_v26, %v5211_v29  ;;  %v3014_v56 = vmul.f32 %v2790_v26, %v5214_v47  ;;  %v3122_v41 = vmul.f32 %v2790_v26, %v5220_v13 }
 0x36b   : > { %2697 = vst [vmem:[%s5449_s25 + $0x30] sm:$0xff] %v3871_v10  ;;  %v3160_v38 = vadd.f32 %v3152_v53, %v3028_v15  ;;  %v3111_v27 = vadd.f32 %v5927_v60, %v3093_v62  ;;  %v2789_v59 = vsel %vm2209_vm3, %v2776_v22, 0.0  ;;  %v2768_v12 = vsel %vm2210_vm8, %v2758_v49, 0.0 }
 0x36c   : > { %v3159_v6 = vadd.f32 %v3143_v55, %v3027_v14  ;;  %v2890_v36 = vadd.f32 %v2882_v0, %v2872_v37  ;;  %v5617_v54 = vadd.f32 %v3014_v56, %v3004_v35  ;;  %v3130_v63 = vadd.f32 %v3122_v41, %v3112_v4 }
 0x36d   : > { %3928 = shalt.err (!%p3925_p2)
}
 0x36e   : > { %s3929_s21 = scalar_lea.hbm %s5599_s23, 1024  ;;  %s3933_s13 = scalar_lea.hbm %s5827_s7, 2048 }
 0x36f   : > { %p3930_p3 = scmp.ne.s32.totalorder %s5599_s23, %s3929_s21  ;;  %p3934_p8 = scmp.lt.u32.totalorder %s5599_s23, %s5827_s7 }
 0x370   : > { %p3935_p11 = scmp.lt.u32.totalorder %s3933_s13, %s3929_s21  ;;  %p3937_p10 = scmp.lt.u32.totalorder %s3929_s21, %s5599_s23 }
 0x371   : > { %p3931_p4 = pnand %p3930_p3, %p4113_p5 }
 0x372   : > { %p3936_p9 = por %p3935_p11, %p3934_p8 }
 0x373   : > { %p3932_p7 = pneg %p3931_p4 }
 0x374   : > { %p3938_p12 = por %p3937_p10, %p3936_p9 }
 0x376   : > { %p3939_p13 = pnand %p3938_p12, %p3932_p7 }
 0x378   : > { %3942 = shalt.err (!%p3939_p13)
}
 0x379   : > { %s4024_s11 = smov 128   ;;  %s4025_s19 = smov 8   ;;  %3872 = vtanh.f32 %v3160_v38  ;;  %v2881_v2 = vmul.f32 %v2789_v59, %v5211_v29  ;;  %v3013_v21 = vmul.f32 %v2789_v59, %v5214_v47  ;;  %v3121_v50 = vmul.f32 %v2789_v59, %v5220_v13  ;;  %v2756_v40 = vpop.permute.xlu0 %2755  ;;  %v2782_v9 = vpop.permute.xlu1 %2781  ;;  %v5928_v28 = vld [vmem:[#allocation36_spill] sm:$0xff]  ;;  %v5929_v32 = vld [vmem:[#allocation37_spill] sm:$0xff]  ;;  %v5930_v17 = vld [vmem:[#allocation38_spill] sm:$0xff] }
 0x37a   : > { %3730 = dma.vmem_to_hbm [thread:$0]  (%p4113_p5), %s5601_s20, 1024, %s5599_s23, %s3184_s28, %s4024_s11, %s4024_s11, %s4025_s19   ;;  %3874 = vtanh.f32 %v3159_v6  ;;  %v2900_v23 = vrot.slane %v2890_v36, 7  ;;  %v3140_v16 = vrot.slane %v3130_v63, 1  ;;  %v2848_v24 = vmul.f32 %v2768_v12, %v5202_v52  ;;  %v5931_v49 = vld [vmem:[#allocation54_spill] sm:$0xff]  ;;  %v5932_v26 = vld [vmem:[#allocation39_spill] sm:$0xff]  ;;  %v5933_v10 = vld [vmem:[#allocation40_spill] sm:$0xff] }
 0x37b   : > { %v2889_v5 = vadd.f32 %v2881_v2, %v2871_v42  ;;  %v3021_v48 = vadd.f32 %v3013_v21, %v3003_v57  ;;  %v3129_v51 = vadd.f32 %v3121_v50, %v3111_v27  ;;  %v2980_v31 = vmul.f32 %v2768_v12, %v5205_v58  ;;  %v5934_v0 = vld [vmem:[#allocation41_spill] sm:$0xff]  ;;  %v5935_v41 = vld [vmem:[#allocation55_spill] sm:$0xff]  ;;  %v5936_v27 = vld [vmem:[#allocation56_spill] sm:$0xff]  ;;  %s5690_s20 = scalar_lea.vmem [#allocation7], %s3368_s24  ;;  %s5770_s21 = scalar_lea.hbm %s5828_s8, %s3447_s26 }
 0x37c   : > { %v2856_v45 = vadd.f32 %v2848_v24, %v5928_v28  ;;  %v3088_v25 = vmul.f32 %v2768_v12, %v5208_v19  ;;  %v2767_v46 = vsel %vm2210_vm8, %v2756_v40, 0.0  ;;  %v2792_v39 = vsel %vm2209_vm3, %v2782_v9, 0.0  ;;  %v5937_v21 = vld [vmem:[#allocation57_spill] sm:$0xff]  ;;  %v5938_v40 = vld [vmem:[#allocation58_spill] sm:$0xff]  ;;  %v5939_v24 = vld [vmem:[#allocation59_spill] sm:$0xff]  ;;  %s3220_s24 = sshll.u32 %s5690_s20, 4  ;;  %s5772_s24 = int_to_ptr.vmem [resolvable:$true] %s3220_s24 }
 0x37d   : > { %v2896_v3 = vrot.slane %v2889_v5, 7  ;;  %v3136_v62 = vrot.slane %v3129_v51, 1  ;;  %v2988_v37 = vadd.f32 %v2980_v31, %v5929_v32  ;;  %v2847_v30 = vmul.f32 %v2767_v46, %v5202_v52  ;;  %v2780_v42 = vpop.permute.xlu0 %2779  ;;  %v2762_v61 = vpop.permute.xlu1 %2761  ;;  %s3189_s25 = scalar_lea.sflag [#allocation8], %s5407_s22  ;;  %s3943_s27 = scalar_lea.vmem %s5772_s24, 1024 }
 0x37e   : > { %v3096_v55 = vadd.f32 %v3088_v25, %v5930_v17  ;;  %v2979_v44 = vmul.f32 %v2767_v46, %v5205_v58  ;;  %v3087_v22 = vmul.f32 %v2767_v46, %v5208_v19  ;;  %v2874_v43 = vadd.f32 %v5931_v49, %v2856_v45  ;;  %v5940_v49 = vld [vmem:[#allocation42_spill] sm:$0xff]  ;;  %p3944_p0 = scmp.ne.s32.totalorder %s5772_s24, %s3943_s27  ;;  %s4026_s6 = smov [#allocation7]  }
 0x37f   : > { %v2904_v53 = vsel %vm2417_vm4, %v2896_v3, %v2900_v23  ;;  %v2908_v1 = vsel %vm2417_vm4, %v2900_v23, %v2896_v3  ;;  %v3144_v35 = vsel %vm2658_vm6, %v3136_v62, %v3140_v16  ;;  %v3148_v8 = vsel %vm2658_vm6, %v3140_v16, %v3136_v62  ;;  %s3947_s13 = sshll.u32 %s4026_s6, 4  ;;  %s3948_s13 = int_to_ptr.vmem [resolvable:$false] %s3947_s13 }
 0x380   : > { %v2913_v4 = vsel %vm2207_vm5, %v2908_v1, 0.0  ;;  %v2922_v7 = vadd.f32 %v2904_v53, %v5247_v33  ;;  %v3154_v15 = vsel %vm2206_vm7, %v3148_v8, 0.0  ;;  %v2855_v11 = vadd.f32 %v2847_v30, %v5932_v26  ;;  %v5941_v8 = vld [vmem:[#allocation43_spill] sm:$0xff]  ;;  %p3945_p1 = pnand %p3944_p0, %p4113_p5  ;;  %s3949_s14 = scalar_lea.vmem %s3948_s13, 2048 }
 0x381   : > { %v2921_v57 = vadd.f32 %v2913_v4, %v5247_v33  ;;  %v2987_v14 = vadd.f32 %v2979_v44, %v5933_v10  ;;  %v3095_v56 = vadd.f32 %v3087_v22, %v5934_v0  ;;  %v3006_v38 = vadd.f32 %v5935_v41, %v2988_v37  ;;  %v2786_v3 = vpop.permute.xlu1 %2785  ;;  %p3950_p3 = scmp.lt.s32.totalorder %s5772_s24, %s3948_s13  ;;  %p3951_p4 = scmp.lt.s32.totalorder %s3949_s14, %s3943_s27 }
 0x382   : > { %v3030_v60 = vadd.f32 %v5617_v54, %v2922_v7  ;;  %v3114_v59 = vadd.f32 %v5936_v27, %v3096_v55  ;;  %v2884_v12 = vmul.f32 %v2792_v39, %v5211_v29  ;;  %v3016_v6 = vmul.f32 %v2792_v39, %v5214_v47  ;;  %v5942_v7 = vld [vmem:[#allocation44_spill] sm:$0xff]  ;;  %p3946_p2 = pneg %p3945_p1 }
 0x383   : > { %v3873_v36 = vpop.eup %3872  ;;  %v3029_v63 = vadd.f32 %v3021_v48, %v2921_v57  ;;  %v3124_v2 = vmul.f32 %v2792_v39, %v5220_v13  ;;  %v2873_v50 = vadd.f32 %v5937_v21, %v2855_v11  ;;  %v3005_v9 = vadd.f32 %v5938_v40, %v2987_v14  ;;  %v2760_v39 = vpop.permute.xlu0 %2759  ;;  %v5943_v57 = vld [vmem:[#allocation60_spill] sm:$0xff]  ;;  %v5948_v40 = vld [vmem:[#allocation62_spill] sm:$0xff]  ;;  %p3952_p7 = por %p3951_p4, %p3950_p3 }
 0x384   : > { %v3875_v23 = vpop.eup %3874  ;;  %3176 = vst [vmem:[%s5690_s20 + $0x8] sm:$0xff] %v3873_v36  ;;  %v3162_v54 = vadd.f32 %v3154_v15, %v3030_v60  ;;  %v2892_v16 = vadd.f32 %v2884_v12, %v2874_v43  ;;  %v3113_v5 = vadd.f32 %v5939_v24, %v3095_v56  ;;  %v2791_v31 = vsel %vm2209_vm3, %v2780_v42, 0.0  ;;  %v5944_v56 = vld [vmem:[#allocation45_spill] sm:$0xff] }
 0x385   : > { %3175 = vst [vmem:[%s5690_s20] sm:$0xff] %v3875_v23  ;;  %v3161_v51 = vadd.f32 %v3144_v35, %v3029_v63  ;;  %v3132_v48 = vadd.f32 %v3124_v2, %v3114_v59  ;;  %v2770_v28 = vsel %vm2210_vm8, %v2762_v61, 0.0  ;;  %v3024_v25 = vadd.f32 %v3016_v6, %v3006_v38  ;;  %v5945_v38 = vld [vmem:[#allocation61_spill] sm:$0xff]  ;;  %v5946_v6 = vld [vmem:[#allocation46_spill] sm:$0xff]  ;;  %v5947_v63 = vld [vmem:[#allocation47_spill] sm:$0xff]  ;;  %p3953_p8 = pnand %p3952_p7, %p3946_p2 }
 0x386   : > { %3876 = vtanh.f32 %v3162_v54  ;;  %v2901_v45 = vrot.slane %v2892_v16, 7  ;;  %v2883_v46 = vmul.f32 %v2791_v31, %v5211_v29  ;;  %v3015_v62 = vmul.f32 %v2791_v31, %v5214_v47 }
 0x387   : > { %3878 = vtanh.f32 %v3161_v51  ;;  %v3123_v32 = vmul.f32 %v2791_v31, %v5220_v13  ;;  %v2850_v37 = vmul.f32 %v2770_v28, %v5202_v52  ;;  %v3141_v30 = vrot.slane %v3132_v48, 1  ;;  %v2784_v16 = vpop.permute.xlu0 %2783  ;;  %v5949_v48 = vld [vmem:[#allocation63_spill] sm:$0xff]  ;;  %v5950_v31 = vld [vmem:[#allocation64_spill] sm:$0xff] }
 0x388   : > { %v2891_v17 = vadd.f32 %v2883_v46, %v2873_v50  ;;  %v2982_v55 = vmul.f32 %v2770_v28, %v5205_v58  ;;  %v3090_v44 = vmul.f32 %v2770_v28, %v5208_v19  ;;  %v2769_v53 = vsel %vm2210_vm8, %v2760_v39, 0.0  ;;  %v5951_v39 = vld [vmem:[#allocation65_spill] sm:$0xff] }
 0x389   : > { %v3131_v22 = vadd.f32 %v3123_v32, %v3113_v5  ;;  %v2858_v43 = vadd.f32 %v2850_v37, %v5940_v49  ;;  %v2794_v1 = vsel %vm2209_vm3, %v2786_v3, 0.0  ;;  %v2849_v26 = vmul.f32 %v2769_v53, %v5202_v52 }
 0x38a   : > { %v2897_v35 = vrot.slane %v2891_v17, 7  ;;  %v2990_v4 = vadd.f32 %v2982_v55, %v5941_v8  ;;  %v3098_v15 = vadd.f32 %v3090_v44, %v5942_v7  ;;  %v2981_v42 = vmul.f32 %v2769_v53, %v5205_v58 }
 0x38b   : > { %v3137_v11 = vrot.slane %v3131_v22, 1  ;;  %v3089_v61 = vmul.f32 %v2769_v53, %v5208_v19  ;;  %v2876_v10 = vadd.f32 %v5943_v57, %v2858_v43  ;;  %v2857_v41 = vadd.f32 %v2849_v26, %v5944_v56 }
 0x38c   : > { %v2905_v14 = vsel %vm2417_vm4, %v2897_v35, %v2901_v45  ;;  %v2909_v0 = vsel %vm2417_vm4, %v2901_v45, %v2897_v35  ;;  %v3008_v60 = vadd.f32 %v5945_v38, %v2990_v4  ;;  %v3023_v12 = vadd.f32 %v3015_v62, %v3005_v9 }
 0x38d   : > { %v2915_v52 = vsel %vm2207_vm5, %v2909_v0, 0.0  ;;  %v2924_v27 = vadd.f32 %v2905_v14, %v5247_v33  ;;  %v3145_v58 = vsel %vm2658_vm6, %v3137_v11, %v3141_v30  ;;  %v3149_v19 = vsel %vm2658_vm6, %v3141_v30, %v3137_v11 }
 0x38e   : > { %v2923_v59 = vadd.f32 %v2915_v52, %v5247_v33  ;;  %v2989_v36 = vadd.f32 %v2981_v42, %v5946_v6  ;;  %v3097_v2 = vadd.f32 %v3089_v61, %v5947_v63  ;;  %v3156_v50 = vsel %vm2206_vm7, %v3149_v19, 0.0 }
 0x38f   : > { %v3032_v21 = vadd.f32 %v3024_v25, %v2924_v27  ;;  %v3116_v23 = vadd.f32 %v5948_v40, %v3098_v15  ;;  %v2886_v54 = vmul.f32 %v2794_v1, %v5211_v29  ;;  %v3126_v51 = vmul.f32 %v2794_v1, %v5220_v13 }
 0x390   : > { %v3877_v24 = vpop.eup %3876  ;;  %v3031_v5 = vadd.f32 %v3023_v12, %v2923_v59  ;;  %v2875_v9 = vadd.f32 %v5949_v48, %v2857_v41  ;;  %v3007_v28 = vadd.f32 %v5950_v31, %v2989_v36  ;;  %v3115_v3 = vadd.f32 %v5951_v39, %v3097_v2 }
 0x391   : > { %v3879_v45 = vpop.eup %3878  ;;  %3178 = vst [vmem:[%s5690_s20 + $0x18] sm:$0xff] %v3877_v24  ;;  %v3164_v46 = vadd.f32 %v3156_v50, %v3032_v21  ;;  %v2894_v25 = vadd.f32 %v2886_v54, %v2876_v10  ;;  %v3134_v32 = vadd.f32 %v3126_v51, %v3116_v23  ;;  %v2793_v37 = vsel %vm2209_vm3, %v2784_v16, 0.0 }
 0x392   : > { %3177 = vst [vmem:[%s5690_s20 + $0x10] sm:$0xff] %v3879_v45  ;;  %v3163_v62 = vadd.f32 %v3145_v58, %v3031_v5  ;;  %v2885_v30 = vmul.f32 %v2793_v37, %v5211_v29  ;;  %v3125_v17 = vmul.f32 %v2793_v37, %v5220_v13  ;;  %v3018_v44 = vmul.f32 %v2794_v1, %v5214_v47 }
 0x393   : > { %3880 = vtanh.f32 %v3164_v46  ;;  %v2902_v55 = vrot.slane %v2894_v25, 7  ;;  %v3142_v49 = vrot.slane %v3134_v32, 1  ;;  %v3017_v35 = vmul.f32 %v2793_v37, %v5214_v47 }
 0x394   : > { %3882 = vtanh.f32 %v3163_v62  ;;  %v2893_v22 = vadd.f32 %v2885_v30, %v2875_v9  ;;  %v3133_v43 = vadd.f32 %v3125_v17, %v3115_v3  ;;  %v3026_v4 = vadd.f32 %v3018_v44, %v3008_v60 }
 0x395   : > { %v3025_v26 = vadd.f32 %v3017_v35, %v3007_v28 }
 0x396   : > { %v2898_v53 = vrot.slane %v2893_v22, 7  ;;  %v3138_v8 = vrot.slane %v3133_v43, 1 }
 0x398   : > { %v2906_v18 = vsel %vm2417_vm4, %v2898_v53, %v2902_v55  ;;  %v2910_v29 = vsel %vm2417_vm4, %v2902_v55, %v2898_v53  ;;  %v3146_v7 = vsel %vm2658_vm6, %v3138_v8, %v3142_v49  ;;  %v3150_v47 = vsel %vm2658_vm6, %v3142_v49, %v3138_v8 }
 0x399   : > { %v2917_v13 = vsel %vm2207_vm5, %v2910_v29, 0.0  ;;  %v2926_v1 = vadd.f32 %v2906_v18, %v5247_v33  ;;  %v3158_v57 = vsel %vm2206_vm7, %v3150_v47, 0.0 }
 0x39a   : > { %v2925_v15 = vadd.f32 %v2917_v13, %v5247_v33 }
 0x39b   : > { %v3034_v11 = vadd.f32 %v3026_v4, %v2926_v1 }
 0x39c   : > { %v3033_v61 = vadd.f32 %v3025_v26, %v2925_v15 }
 0x39d   : > { %v3881_v42 = vpop.eup %3880  ;;  %v3166_v14 = vadd.f32 %v3158_v57, %v3034_v11 }
 0x39e   : > { %v3883_v10 = vpop.eup %3882  ;;  %3180 = vst [vmem:[%s5690_s20 + $0x28] sm:$0xff] %v3881_v42  ;;  %v3165_v34 = vadd.f32 %v3146_v7, %v3033_v61 }
 0x39f   : > { %3179 = vst [vmem:[%s5690_s20 + $0x20] sm:$0xff] %v3883_v10  ;;  %3884 = vtanh.f32 %v3166_v14 }
 0x3a0   : > { %3886 = vtanh.f32 %v3165_v34 }
 0x3a9   : > { %v3885_v33 = vpop.eup %3884 }
 0x3aa   : > { %v3887_v20 = vpop.eup %3886  ;;  %3182 = vst [vmem:[%s5690_s20 + $0x38] sm:$0xff] %v3885_v33 }
 0x3ab   : > { %3181 = vst [vmem:[%s5690_s20 + $0x30] sm:$0xff] %v3887_v20 }
 0x3ac   : > { %3956 = shalt.err (!%p3953_p8)
}
 0x3ad   : > { %s3957_s26 = scalar_lea.hbm %s5770_s21, 1024  ;;  %s3961_s23 = scalar_lea.hbm %s5828_s8, 2048 }
 0x3ae   : > { %p3958_p11 = scmp.ne.s32.totalorder %s5770_s21, %s3957_s26  ;;  %p3962_p12 = scmp.lt.u32.totalorder %s5770_s21, %s5828_s8 }
 0x3af   : > { %p3963_p13 = scmp.lt.u32.totalorder %s3961_s23, %s3957_s26  ;;  %p3965_p1 = scmp.lt.u32.totalorder %s3957_s26, %s5770_s21 }
 0x3b0   : > { %p3959_p9 = pnand %p3958_p11, %p4113_p5 }
 0x3b1   : > { %p3964_p0 = por %p3963_p13, %p3962_p12 }
 0x3b2   : > { %p3960_p10 = pneg %p3959_p9 }
 0x3b3   : > { %p3966_p2 = por %p3965_p1, %p3964_p0 }
 0x3b5   : > { %p3967_p3 = pnand %p3966_p2, %p3960_p10 }
 0x3b7   : > { %3970 = shalt.err (!%p3967_p3)
}
 0x3b8   : > { %3731 = dma.vmem_to_hbm [thread:$0]  (%p4113_p5), %s5772_s24, 1024, %s5770_s21, %s3189_s25, %s4024_s11, %s4024_s11, %s4025_s19  }
 0x3b9 PF: > { %p3747_p4 = scmp.ge.s32.totalorder %s4013_s10, 2  ;;  %s3235_s27 = sand.u32 1, %s4001_s29  }
 0x3ba   : > { %s3236_s13 = scalar_lea.sflag [#allocation4], %s3235_s27 }
 0x3bb   : > { %p3739_p7 = pnand %p3747_p4, %p4117_p6 }
 0x3bd   : > { %3992 = dma.done.wait (!%p3739_p7), %s3236_s13, 1024  }
 0x3be   : > { %3994 = vsyncadd (!%p3739_p7), %s3236_s13, 4294966272  ;;  %s3245_s16 = scalar_lea.sflag [#allocation8], %s3235_s27 }
 0x3bf   : > { %3996 = dma.done.wait (!%p3739_p7), %s3245_s16, 1024  }
 0x3c0   : > { %3998 = vsyncadd (!%p3739_p7), %s3245_s16, 4294966272  ;;  %p24_p5 = scmp.ge.s32.totalorder %s4100_s12, 4   ;;  %s5952_s29 = smov %s4005_s30 }
 0x3c1   : > { %s5953_s30 = smov %s4009_s9  ;;  %s5954_s9 = smov %s4111_s15 }
 0x3c2   : > { %s5955_s10 = smov %s4100_s12  ;;  %26 = sbr.rel (!%p24_p5) target bundleno = 8 (0x8), region = 114 }
 0x3c9   :  { %3250 = vsyncpa [#allocation4], 1 }
 0x3ca   :  { %3252 = vsyncpa [#allocation4 + $0x1], 1 }
 0x3cb   :  { %3253 = vsyncpa [#allocation8], 1 }
 0x3cc   :  { %3255 = vsyncpa [#allocation8 + $0x1], 1 }
 0x3cd   :  { %3256 = vsyncpa [#allocation5], 1 }
 0x3ce   :  { %3258 = vsyncpa [#allocation5 + $0x1], 1 }

</bundles_post_ra>
